<compile_context>
chip_gen: v6e
topology: v6e:2x2x1
jax: 0.10.0
libtpu: 0.0.40
codegen_flags: <defaults>
</compile_context>

<pallas_src>
import functools
import math

import jax
import jax.numpy as jnp
from jax.experimental import pallas as pl
from jax.experimental.pallas import tpu as pltpu

EPS = 1e-5            # torch.nn.LayerNorm default
NEG_INF = -1e9        # finite mask fill (f32/exp safe; added before any bf16 cast)


# ----------------------- generation-aware sizing -----------------------------

def _vmem_budget_bytes():
    """~75% of physical VMEM (capped), so v5e/v6e get ~96 MB and v7x ~48 MB."""
    cap = None
    try:
        info = pltpu.get_tpu_info()
        cap = getattr(info, "vmem_capacity_bytes", None)
    except Exception:
        cap = None
    if not cap:
        cap = 64 * 1024 * 1024          # conservative default (v7x-sized)
    return min(int(cap * 3 // 4), 100 * 1024 * 1024)


_VMEM_LIMIT = _vmem_budget_bytes()
_BIG_VMEM = _VMEM_LIMIT >= 80 * 1024 * 1024
_TH_TARGET = 2560 if _BIG_VMEM else 1280     # MLP hidden-tile target
_TV_TARGET = 8192 if _BIG_VMEM else 4096     # vocab-tile target


def _round_up(x, m):
    return (x + m - 1) // m * m


def _pick_tile(total, target):
    """Largest multiple of 128 <= target that divides total (else total)."""
    if total <= target:
        return total
    t = (target // 128) * 128
    while t >= 128:
        if total % t == 0:
            return t
        t -= 128
    return total


# ----------------------------- in-kernel math -------------------------------

def _layernorm(x, w, b):
    # LayerNorm in float32 (matches x.float() in the PyTorch LayerNorm).
    m = jnp.mean(x, axis=-1, keepdims=True)
    v = jnp.mean((x - m) ** 2, axis=-1, keepdims=True)
    return (x - m) * jax.lax.rsqrt(v + EPS) * w + b


def _erf(x):
    # Abramowitz & Stegun 7.1.26; |err| < 1.5e-7 (f32-exact for GELU).
    a1, a2, a3, a4, a5 = (0.254829592, -0.284496736, 1.421413741,
                          -1.453152027, 1.061405429)
    p = 0.3275911
    s = jnp.where(x >= 0, 1.0, -1.0)
    ax = jnp.abs(x)
    t = pl.reciprocal(1.0 + p * ax, approx=True)        # EUP, not VPU divide
    poly = ((((a5 * t + a4) * t + a3) * t + a2) * t + a1) * t
    return s * (1.0 - poly * jnp.exp(-ax * ax))


def _gelu(x):
    # nn.GELU() exact (erf) formulation.
    return 0.5 * x * (1.0 + _erf(x * (1.0 / math.sqrt(2.0))))


def _attend(q, k, v, n_head, mask, ctx_ref):
    """Per-head scores + softmax + PV written into ctx_ref (Tq, D) f32 scratch.

    q:(Tq,D) k/v:(Tk,D) bf16.  Heads are a static Python loop: the next head's
    score matmul has no dependency on this head's softmax, so the LLO scheduler
    can keep MXU pushes back-to-back while exp/reciprocal run on the EUP.
    """
    D = q.shape[-1]
    hd = D // n_head
    scale = 1.0 / math.sqrt(hd)   # == (hd ** -0.25) applied to both q and k
    for h in range(n_head):
        lo, hi = h * hd, (h + 1) * hd
        qh = q[:, lo:hi]
        kh = k[:, lo:hi]
        vh = v[:, lo:hi]
        # qh @ kh.T without an in-kernel transpose (contract last dims).
        s = jax.lax.dot_general(qh, kh, (((1,), (1,)), ((), ())),
                                preferred_element_type=jnp.float32) * scale
        if mask is not None:
            s = s + mask
        s = s - jnp.max(s, axis=-1, keepdims=True)
        e = jnp.exp(s)
        w = e * pl.reciprocal(jnp.sum(e, axis=-1, keepdims=True), approx=True)
        ctx_ref[:, lo:hi] = jnp.dot(w.astype(jnp.bfloat16), vh,
                                    preferred_element_type=jnp.float32)


# -------------------------------- kernels -----------------------------------

def _block_kernel(n_head,
                  x_ref, xa_ref,
                  a_lnw, a_lnb, a_qkv_wT, a_qkv_b, a_owT, a_ob,
                  c_lnw, c_lnb, c_qwT, c_qb, c_kv_wT, c_kv_b, c_owT, c_ob,
                  m_lnw, m_lnb, m_w1T, m_b1, m_w2T, m_b2,
                  o_ref, xn_scratch, ctx_scratch):
    """One ResidualAttentionBlock for one batch element.

    grid = (B, KH): axis 0 = batch (parallel), axis 1 = MLP hidden tiles
    (arbitrary, accumulated into the resident output block).
    """
    ht = pl.program_id(1)
    T, D = x_ref.shape

    @pl.when(ht == 0)
    def _():
        x = x_ref[...]                                     # (T, D) f32

        # ---- x = x + self_attn(attn_ln(x), mask) -------------------------
        xn = _layernorm(x, a_lnw[...], a_lnb[...]).astype(jnp.bfloat16)
        qkv = (jnp.dot(xn, a_qkv_wT[...], preferred_element_type=jnp.float32)
               + a_qkv_b[...]).astype(jnp.bfloat16)        # cast once, not per head
        row = jax.lax.broadcasted_iota(jnp.int32, (T, T), 0)
        col = jax.lax.broadcasted_iota(jnp.int32, (T, T), 1)
        mask = jnp.where(col > row, NEG_INF, 0.0).astype(jnp.float32)
        _attend(qkv[:, 0:D], qkv[:, D:2 * D], qkv[:, 2 * D:3 * D],
                n_head, mask, ctx_scratch)
        x = x + jnp.dot(ctx_scratch[...].astype(jnp.bfloat16), a_owT[...],
                        preferred_element_type=jnp.float32) + a_ob[...]

        # ---- x = x + cross_attn(cross_attn_ln(x), xa) --------------------
        xn = _layernorm(x, c_lnw[...], c_lnb[...]).astype(jnp.bfloat16)
        q = (jnp.dot(xn, c_qwT[...], preferred_element_type=jnp.float32)
             + c_qb[...]).astype(jnp.bfloat16)
        xab = xa_ref[...]                                  # (S, D) already bf16
        kv = (jnp.dot(xab, c_kv_wT[...], preferred_element_type=jnp.float32)
              + c_kv_b[...]).astype(jnp.bfloat16)          # no (S,2D) f32 live value
        _attend(q, kv[:, 0:D], kv[:, D:2 * D], n_head, None, ctx_scratch)
        x = x + jnp.dot(ctx_scratch[...].astype(jnp.bfloat16), c_owT[...],
                        preferred_element_type=jnp.float32) + c_ob[...]

        # ---- MLP prologue: stash mlp_ln(x); init output accumulator ------
        xn_scratch[...] = _layernorm(x, m_lnw[...], m_lnb[...])
        o_ref[...] = x + m_b2[...]                         # residual + final bias

    # ---- MLP partial sum over hidden tile `ht` ---------------------------
    xn = xn_scratch[...].astype(jnp.bfloat16)
    h = jnp.dot(xn, m_w1T[...], preferred_element_type=jnp.float32) + m_b1[...]
    h = _gelu(h)
    o_ref[...] += jnp.dot(h.astype(jnp.bfloat16), m_w2T[...],
                          preferred_element_type=jnp.float32)


def _final_ln_kernel(x_ref, lnw, lnb, o_ref):
    """Final LayerNorm, computed once per batch element, emitted in bf16."""
    o_ref[...] = _layernorm(x_ref[...], lnw[...], lnb[...]).astype(jnp.bfloat16)


def _head_kernel(y_ref, embT_ref, o_ref):
    """Logits tile: LN(x) (T, D) bf16 @ (D, tv) bf16 -> (T, tv) f32."""
    o_ref[...] = jnp.dot(y_ref[...], embT_ref[...],
                         preferred_element_type=jnp.float32)


# ------------------------------ pallas wrappers ------------------------------

def _const_spec(arr, single):
    """Whole array in VMEM, constant across the grid.

    With single=True the spec is single-buffered (pl.Buffered(1)) so resident
    weights don't pay double-buffer VMEM for data that never re-DMAs.
    """
    idx = lambda *_: (0,) * arr.ndim
    if single:
        return pl.BlockSpec(arr.shape, idx, pipeline_mode=pl.Buffered(1))
    return pl.BlockSpec(arr.shape, idx)


def _run_block(x, xa, bp, n_head):
    B, T, D = x.shape
    S = xa.shape[1]
    H4 = bp["m_w1T"].shape[1]
    th = _pick_tile(H4, _TH_TARGET)          # MLP hidden tile (multiple of 128)
    KH = H4 // th

    args = (x, xa,
            bp["a_ln_w"], bp["a_ln_b"], bp["a_qkv_wT"], bp["a_qkv_b"],
            bp["a_owT"], bp["a_ob"],
            bp["c_ln_w"], bp["c_ln_b"], bp["c_qwT"], bp["c_qb"],
            bp["c_kv_wT"], bp["c_kv_b"], bp["c_owT"], bp["c_ob"],
            bp["m_ln_w"], bp["m_ln_b"], bp["m_w1T"], bp["m_b1"],
            bp["m_w2T"], bp["m_b2"])

    def call(single):
        cs = functools.partial(_const_spec, single=single)
        if single:
            xa_spec = pl.BlockSpec((None, S, D), lambda b, h: (b, 0, 0),
                                   pipeline_mode=pl.Buffered(1))
        else:
            xa_spec = pl.BlockSpec((None, S, D), lambda b, h: (b, 0, 0))
        in_specs = [
            pl.BlockSpec((None, T, D), lambda b, h: (b, 0, 0)),    # x
            xa_spec,                                               # xa (bf16)
            cs(bp["a_ln_w"]), cs(bp["a_ln_b"]),
            cs(bp["a_qkv_wT"]), cs(bp["a_qkv_b"]),
            cs(bp["a_owT"]), cs(bp["a_ob"]),
            cs(bp["c_ln_w"]), cs(bp["c_ln_b"]),
            cs(bp["c_qwT"]), cs(bp["c_qb"]),
            cs(bp["c_kv_wT"]), cs(bp["c_kv_b"]),
            cs(bp["c_owT"]), cs(bp["c_ob"]),
            cs(bp["m_ln_w"]), cs(bp["m_ln_b"]),
            pl.BlockSpec((D, th), lambda b, h: (0, h)),            # m_w1T tile
            pl.BlockSpec((1, th), lambda b, h: (0, h)),            # m_b1 tile
            pl.BlockSpec((th, D), lambda b, h: (h, 0)),            # m_w2T tile
            cs(bp["m_b2"]),
        ]
        return pl.pallas_call(
            functools.partial(_block_kernel, n_head),
            out_shape=jax.ShapeDtypeStruct((B, T, D), jnp.float32),
            grid=(B, KH),
            in_specs=in_specs,
            out_specs=pl.BlockSpec((None, T, D), lambda b, h: (b, 0, 0)),
            scratch_shapes=[pltpu.VMEM((T, D), jnp.float32),   # mlp_ln(x)
                            pltpu.VMEM((T, D), jnp.float32)],  # attention ctx
            compiler_params=pltpu.CompilerParams(
                dimension_semantics=("parallel", "arbitrary"),
                vmem_limit_bytes=_VMEM_LIMIT),
        )(*args)

    try:
        return call(True)
    except Exception:
        # TODO(synk): drop fallback once pl.Buffered(1) is guaranteed available.
        return call(False)


def _run_final_ln(x, ln_w, ln_b):
    B, T, D = x.shape
    return pl.pallas_call(
        _final_ln_kernel,
        out_shape=jax.ShapeDtypeStruct((B, T, D), jnp.bfloat16),
        grid=(B,),
        in_specs=[
            pl.BlockSpec((None, T, D), lambda b: (b, 0, 0)),
            pl.BlockSpec((1, D), lambda b: (0, 0)),
            pl.BlockSpec((1, D), lambda b: (0, 0)),
        ],
        out_specs=pl.BlockSpec((None, T, D), lambda b: (b, 0, 0)),
        compiler_params=pltpu.CompilerParams(
            dimension_semantics=("parallel",),
            vmem_limit_bytes=_VMEM_LIMIT),
    )(x, ln_w, ln_b)


def _run_head(y, embT):
    """y: (B, T, D) bf16 (already LayerNorm'ed).  Streams the (D, Vp) table."""
    B, T, D = y.shape
    Vp = embT.shape[1]
    tv = _pick_tile(Vp, _TV_TARGET)     # lane-dense vocab tile (mult of 128)
    NV = Vp // tv

    return pl.pallas_call(
        _head_kernel,
        out_shape=jax.ShapeDtypeStruct((B, T, Vp), jnp.float32),
        grid=(B, NV),
        in_specs=[
            pl.BlockSpec((None, T, D), lambda b, j: (b, 0, 0)),
            pl.BlockSpec((D, tv), lambda b, j: (0, j)),
        ],
        out_specs=pl.BlockSpec((None, T, tv), lambda b, j: (b, 0, j)),
        compiler_params=pltpu.CompilerParams(
            dimension_semantics=("parallel", "parallel"),
            vmem_limit_bytes=_VMEM_LIMIT),
    )(y, embT)


# --------------------------- parameter handling ------------------------------

def init_params(key, n_vocab, n_ctx, n_state, n_head, n_layer):
    """Deterministic synthetic parameters, PyTorch-shaped (Linear: (out,in))."""
    def nxt():
        nonlocal key
        key, sub = jax.random.split(key)
        return sub

    def w(shape, scale=0.05):
        return scale * jax.random.normal(nxt(), shape, jnp.float32)

    params = {
        "tok_emb": w((n_vocab, n_state)),
        "pos_emb": w((n_ctx, n_state)),
        "ln_w": 1.0 + w((n_state,), 0.1),
        "ln_b": w((n_state,)),
        "blocks": [],
    }
    for _ in range(n_layer):
        blk = {}
        for pre in ("attn", "cross"):
            blk[pre] = {
                "q_w": w((n_state, n_state)), "q_b": w((n_state,)),
                "k_w": w((n_state, n_state)),                       # no bias
                "v_w": w((n_state, n_state)), "v_b": w((n_state,)),
                "o_w": w((n_state, n_state)), "o_b": w((n_state,)),
                "ln_w": 1.0 + w((n_state,), 0.1), "ln_b": w((n_state,)),
            }
        blk["mlp"] = {
            "w1": w((4 * n_state, n_state)), "b1": w((4 * n_state,)),
            "w2": w((n_state, 4 * n_state)), "b2": w((n_state,)),
        }
        blk["mlp_ln_w"] = 1.0 + w((n_state,), 0.1)
        blk["mlp_ln_b"] = w((n_state,))
        params["blocks"].append(blk)
    return params


def pack_block(blk):
    """Pre-transpose/fuse weights; matmul operands in bf16, LN/bias in f32."""
    a, c, m = blk["attn"], blk["cross"], blk["mlp"]
    D = a["q_w"].shape[0]
    bf = jnp.bfloat16
    zeros_b = jnp.zeros((D,), jnp.float32)
    return {
        "a_ln_w": a["ln_w"].reshape(1, D), "a_ln_b": a["ln_b"].reshape(1, D),
        # fused QKV: x @ (D,3D); key bias is zero (Linear(bias=False)).
        "a_qkv_wT": jnp.concatenate([a["q_w"].T, a["k_w"].T, a["v_w"].T],
                                    axis=1).astype(bf),
        "a_qkv_b": jnp.concatenate([a["q_b"], zeros_b, a["v_b"]]).reshape(1, 3 * D),
        "a_owT": a["o_w"].T.astype(bf), "a_ob": a["o_b"].reshape(1, D),
        "c_ln_w": c["ln_w"].reshape(1, D), "c_ln_b": c["ln_b"].reshape(1, D),
        "c_qwT": c["q_w"].T.astype(bf), "c_qb": c["q_b"].reshape(1, D),
        "c_kv_wT": jnp.concatenate([c["k_w"].T, c["v_w"].T], axis=1).astype(bf),
        "c_kv_b": jnp.concatenate([zeros_b, c["v_b"]]).reshape(1, 2 * D),
        "c_owT": c["o_w"].T.astype(bf), "c_ob": c["o_b"].reshape(1, D),
        "m_ln_w": blk["mlp_ln_w"].reshape(1, D),
        "m_ln_b": blk["mlp_ln_b"].reshape(1, D),
        "m_w1T": m["w1"].T.astype(bf), "m_b1": m["b1"].reshape(1, 4 * D),
        "m_w2T": m["w2"].T.astype(bf), "m_b2": m["b2"].reshape(1, D),
    }


def pack_params(params):
    D = params["tok_emb"].shape[1]
    V = params["tok_emb"].shape[0]
    Vp = _round_up(V, 128)                 # lane-dense 128-padded vocab
    embT = jnp.pad(params["tok_emb"].T, ((0, 0), (0, Vp - V))).astype(jnp.bfloat16)
    return {
        "blocks": [pack_block(blk) for blk in params["blocks"]],
        "ln_w": params["ln_w"].reshape(1, D),
        "ln_b": params["ln_b"].reshape(1, D),
        "embT": embT,                       # (D, Vp)
        "n_vocab": V,
    }


# --------------------------------- forward -----------------------------------

def text_decoder_forward(packed, params, tokens, xa, n_head):
    """TextDecoder.forward with kv_cache=None (offset=0)."""
    B, T = tokens.shape
    # Glue: embedding gather + positional embedding (not the hot path).
    h = params["tok_emb"][tokens] + params["pos_emb"][:T]
    h = h.astype(jnp.float32)
    xa_bf = xa.astype(jnp.bfloat16)          # cast once; kernels consume bf16
    for bp in packed["blocks"]:
        h = _run_block(h, xa_bf, bp, n_head)
    y = _run_final_ln(h, packed["ln_w"], packed["ln_b"])      # LN once, bf16
    logits = _run_head(y, packed["embT"])
    return logits[:, :, :packed["n_vocab"]].astype(jnp.float32)


# --------------------------- pure-JAX reference -------------------------------

def ref_forward(params, tokens, xa, n_head):
    def layernorm(x, w, b):
        m = x.mean(-1, keepdims=True)
        v = ((x - m) ** 2).mean(-1, keepdims=True)
        return (x - m) / jnp.sqrt(v + EPS) * w + b

    def mha(x, kv, p, mask):
        Bq, Tq, D = x.shape
        Tk = kv.shape[1]
        hd = D // n_head
        q = x @ p["q_w"].T + p["q_b"]
        k = kv @ p["k_w"].T
        v = kv @ p["v_w"].T + p["v_b"]
        q = q.reshape(Bq, Tq, n_head, hd).transpose(0, 2, 1, 3)
        k = k.reshape(Bq, Tk, n_head, hd).transpose(0, 2, 1, 3)
        v = v.reshape(Bq, Tk, n_head, hd).transpose(0, 2, 1, 3)
        scale = hd ** (-0.25)
        qk = (q * scale) @ (k * scale).transpose(0, 1, 3, 2)
        if mask is not None:
            qk = qk + mask[:Tq, :Tq]
        w = jax.nn.softmax(qk, axis=-1)
        out = (w @ v).transpose(0, 2, 1, 3).reshape(Bq, Tq, D)
        return out @ p["o_w"].T + p["o_b"]

    B, T = tokens.shape
    x = params["tok_emb"][tokens] + params["pos_emb"][:T]
    x = x.astype(xa.dtype)
    mask = jnp.where(jnp.arange(T)[None, :] > jnp.arange(T)[:, None],
                     -jnp.inf, 0.0)
    for blk in params["blocks"]:
        a, c, m = blk["attn"], blk["cross"], blk["mlp"]
        xn = layernorm(x, a["ln_w"], a["ln_b"])
        x = x + mha(xn, xn, a, mask)
        x = x + mha(layernorm(x, c["ln_w"], c["ln_b"]), xa, c, None)
        xn = layernorm(x, blk["mlp_ln_w"], blk["mlp_ln_b"])
        hid = jax.nn.gelu(xn @ m["w1"].T + m["b1"], approximate=False)
        x = x + hid @ m["w2"].T + m["b2"]
    x = layernorm(x, params["ln_w"], params["ln_b"])
    return (x @ params["tok_emb"].T).astype(jnp.float32)


# ----------------------------------- main -------------------------------------

if __name__ == "__main__":
    n_vocab, n_ctx, n_state, n_head, n_layer = 96, 16, 32, 2, 2
    B, T, S = 2, 8, 12  # batch, text tokens (<= n_ctx), audio ctx

    key = jax.random.PRNGKey(0)
    k_tok, k_xa, k_par = jax.random.split(key, 3)
    tokens = jax.random.randint(k_tok, (B, T), 0, n_vocab, dtype=jnp.int32)
    xa = 0.1 * jax.random.normal(k_xa, (B, S, n_state), jnp.float32)

    params = init_params(k_par, n_vocab, n_ctx, n_state, n_head, n_layer)
    packed = pack_params(params)

    logits = text_decoder_forward(packed, params, tokens, xa, n_head)
    logits = jax.block_until_ready(logits)
    assert logits.shape == (B, T, n_vocab)
    assert logits.dtype == jnp.float32

    ref = ref_forward(params, tokens, xa, n_head)
    err = float(jnp.max(jnp.abs(logits - ref)))
    # bf16 matmuls + approx reciprocal => looser tolerance than pure-f32.
    assert err < 5e-2, f"max abs err too large: {err}"

    print("KERNEL_OK")
</pallas_src>

<mosaic_0001>
module attributes {stable_mosaic.version = 11 : i64} {
  func.func @_block_kernel(%arg0: i32, %arg1: i32, %arg2: memref<1x8x32xf32, #tpu.memory_space<vmem>>, %arg3: memref<1x12x32xbf16, #tpu.memory_space<vmem>>, %arg4: memref<1x32xf32, #tpu.memory_space<vmem>>, %arg5: memref<1x32xf32, #tpu.memory_space<vmem>>, %arg6: memref<32x96xbf16, #tpu.memory_space<vmem>>, %arg7: memref<1x96xf32, #tpu.memory_space<vmem>>, %arg8: memref<32x32xbf16, #tpu.memory_space<vmem>>, %arg9: memref<1x32xf32, #tpu.memory_space<vmem>>, %arg10: memref<1x32xf32, #tpu.memory_space<vmem>>, %arg11: memref<1x32xf32, #tpu.memory_space<vmem>>, %arg12: memref<32x32xbf16, #tpu.memory_space<vmem>>, %arg13: memref<1x32xf32, #tpu.memory_space<vmem>>, %arg14: memref<32x64xbf16, #tpu.memory_space<vmem>>, %arg15: memref<1x64xf32, #tpu.memory_space<vmem>>, %arg16: memref<32x32xbf16, #tpu.memory_space<vmem>>, %arg17: memref<1x32xf32, #tpu.memory_space<vmem>>, %arg18: memref<1x32xf32, #tpu.memory_space<vmem>>, %arg19: memref<1x32xf32, #tpu.memory_space<vmem>>, %arg20: memref<32x128xbf16, #tpu.memory_space<vmem>>, %arg21: memref<1x128xf32, #tpu.memory_space<vmem>>, %arg22: memref<128x32xbf16, #tpu.memory_space<vmem>>, %arg23: memref<1x32xf32, #tpu.memory_space<vmem>>, %arg24: memref<1x8x32xf32, #tpu.memory_space<vmem>>, %arg25: memref<8x32xf32, #tpu.memory_space<vmem>>, %arg26: memref<8x32xf32, #tpu.memory_space<vmem>>) attributes {dimension_semantics = [#tpu.dimension_semantics<parallel>, #tpu.dimension_semantics<arbitrary>], iteration_bounds = array<i64: 2, 1>, scalar_prefetch = 0 : i64, scratch_operands = 2 : i64, tpu.core_type = #tpu.core_type<tc>, window_params = [{transform_indices = @transform_0, window_bounds = array<i64: 1, 8, 32>}, {pipeline_mode = #tpu.pipeline_mode<synchronous>, transform_indices = @transform_1, window_bounds = array<i64: 1, 12, 32>}, {pipeline_mode = #tpu.pipeline_mode<synchronous>, transform_indices = @transform_2, window_bounds = array<i64: 1, 32>}, {pipeline_mode = #tpu.pipeline_mode<synchronous>, transform_indices = @transform_3, window_bounds = array<i64: 1, 32>}, {pipeline_mode = #tpu.pipeline_mode<synchronous>, transform_indices = @transform_4, window_bounds = array<i64: 32, 96>}, {pipeline_mode = #tpu.pipeline_mode<synchronous>, transform_indices = @transform_5, window_bounds = array<i64: 1, 96>}, {pipeline_mode = #tpu.pipeline_mode<synchronous>, transform_indices = @transform_6, window_bounds = array<i64: 32, 32>}, {pipeline_mode = #tpu.pipeline_mode<synchronous>, transform_indices = @transform_7, window_bounds = array<i64: 1, 32>}, {pipeline_mode = #tpu.pipeline_mode<synchronous>, transform_indices = @transform_8, window_bounds = array<i64: 1, 32>}, {pipeline_mode = #tpu.pipeline_mode<synchronous>, transform_indices = @transform_9, window_bounds = array<i64: 1, 32>}, {pipeline_mode = #tpu.pipeline_mode<synchronous>, transform_indices = @transform_10, window_bounds = array<i64: 32, 32>}, {pipeline_mode = #tpu.pipeline_mode<synchronous>, transform_indices = @transform_11, window_bounds = array<i64: 1, 32>}, {pipeline_mode = #tpu.pipeline_mode<synchronous>, transform_indices = @transform_12, window_bounds = array<i64: 32, 64>}, {pipeline_mode = #tpu.pipeline_mode<synchronous>, transform_indices = @transform_13, window_bounds = array<i64: 1, 64>}, {pipeline_mode = #tpu.pipeline_mode<synchronous>, transform_indices = @transform_14, window_bounds = array<i64: 32, 32>}, {pipeline_mode = #tpu.pipeline_mode<synchronous>, transform_indices = @transform_15, window_bounds = array<i64: 1, 32>}, {pipeline_mode = #tpu.pipeline_mode<synchronous>, transform_indices = @transform_16, window_bounds = array<i64: 1, 32>}, {pipeline_mode = #tpu.pipeline_mode<synchronous>, transform_indices = @transform_17, window_bounds = array<i64: 1, 32>}, {transform_indices = @transform_18, window_bounds = array<i64: 32, 128>}, {transform_indices = @transform_19, window_bounds = array<i64: 1, 128>}, {transform_indices = @transform_20, window_bounds = array<i64: 128, 32>}, {pipeline_mode = #tpu.pipeline_mode<synchronous>, transform_indices = @transform_21, window_bounds = array<i64: 1, 32>}, {transform_indices = @transform_22, window_bounds = array<i64: 1, 8, 32>}]} {
    %c0_i32 = arith.constant 0 : i32
    %0 = arith.cmpi eq, %arg1, %c0_i32 : i32
    %1 = arith.extui %0 : i1 to i32
    %c0_i32_0 = arith.constant 0 : i32
    %2 = arith.cmpi ne, %1, %c0_i32_0 : i32
    scf.if %2 {
      %c0_30 = arith.constant 0 : index
      %c0_31 = arith.constant 0 : index
      %c0_32 = arith.constant 0 : index
      %59 = vector.load %arg2[%c0_30, %c0_31, %c0_32] : memref<1x8x32xf32, #tpu.memory_space<vmem>>, vector<1x8x32xf32>
      %60 = vector.shape_cast %59 : vector<1x8x32xf32> to vector<8x32xf32>
      %c0_33 = arith.constant 0 : index
      %c0_34 = arith.constant 0 : index
      %61 = vector.load %arg4[%c0_33, %c0_34] : memref<1x32xf32, #tpu.memory_space<vmem>>, vector<1x32xf32>
      %c0_35 = arith.constant 0 : index
      %c0_36 = arith.constant 0 : index
      %62 = vector.load %arg5[%c0_35, %c0_36] : memref<1x32xf32, #tpu.memory_space<vmem>>, vector<1x32xf32>
      %cst_37 = arith.constant dense<0.000000e+00> : vector<8xf32>
      %63 = vector.multi_reduction <add>, %60, %cst_37 [1] : vector<8x32xf32> to vector<8xf32>
      %64 = vector.shape_cast %63 : vector<8xf32> to vector<8x1xf32>
      %cst_38 = arith.constant 3.200000e+01 : f32
      %65 = vector.broadcast %cst_38 : f32 to vector<8x1xf32>
      %66 = arith.divf %64, %65 : vector<8x1xf32>
      %67 = vector.broadcast %66 : vector<8x1xf32> to vector<8x32xf32>
      %68 = arith.subf %60, %67 : vector<8x32xf32>
      %69 = arith.mulf %68, %68 : vector<8x32xf32>
      %cst_39 = arith.constant dense<0.000000e+00> : vector<8xf32>
      %70 = vector.multi_reduction <add>, %69, %cst_39 [1] : vector<8x32xf32> to vector<8xf32>
      %71 = vector.shape_cast %70 : vector<8xf32> to vector<8x1xf32>
      %cst_40 = arith.constant 3.200000e+01 : f32
      %72 = vector.broadcast %cst_40 : f32 to vector<8x1xf32>
      %73 = arith.divf %71, %72 : vector<8x1xf32>
      %74 = vector.broadcast %66 : vector<8x1xf32> to vector<8x32xf32>
      %75 = arith.subf %60, %74 : vector<8x32xf32>
      %cst_41 = arith.constant 9.99999974E-6 : f32
      %76 = vector.broadcast %cst_41 : f32 to vector<8x1xf32>
      %77 = arith.addf %73, %76 : vector<8x1xf32>
      %78 = math.rsqrt %77 : vector<8x1xf32>
      %79 = vector.broadcast %78 : vector<8x1xf32> to vector<8x32xf32>
      %80 = arith.mulf %75, %79 : vector<8x32xf32>
      %81 = vector.broadcast %61 : vector<1x32xf32> to vector<8x32xf32>
      %82 = arith.mulf %80, %81 : vector<8x32xf32>
      %83 = vector.broadcast %62 : vector<1x32xf32> to vector<8x32xf32>
      %84 = arith.addf %82, %83 : vector<8x32xf32>
      %85 = arith.truncf %84 : vector<8x32xf32> to vector<8x32xbf16>
      %c0_42 = arith.constant 0 : index
      %c0_43 = arith.constant 0 : index
      %86 = vector.load %arg6[%c0_42, %c0_43] : memref<32x96xbf16, #tpu.memory_space<vmem>>, vector<32x96xbf16>
      %cst_44 = arith.constant dense<0.000000e+00> : vector<8x96xf32>
      %87 = tpu.matmul %85, %86, %cst_44 {dimension_numbers = #tpu.dot_dimension_numbers<[1], [0], [0], [1], [0, 0, 1, 1], [], []>} : vector<8x32xbf16>, vector<32x96xbf16>, vector<8x96xf32> -> vector<8x96xf32>
      %c0_45 = arith.constant 0 : index
      %c0_46 = arith.constant 0 : index
      %88 = vector.load %arg7[%c0_45, %c0_46] : memref<1x96xf32, #tpu.memory_space<vmem>>, vector<1x96xf32>
      %89 = vector.broadcast %88 : vector<1x96xf32> to vector<8x96xf32>
      %90 = arith.addf %87, %89 : vector<8x96xf32>
      %91 = arith.truncf %90 : vector<8x96xf32> to vector<8x96xbf16>
      %92 = tpu.iota {dimensions = array<i32: 0>} : vector<8x8xi32>
      %93 = tpu.iota {dimensions = array<i32: 1>} : vector<8x8xi32>
      %94 = arith.cmpi sgt, %93, %92 : vector<8x8xi32>
      %cst_47 = arith.constant -1.000000e+09 : f32
      %cst_48 = arith.constant 0.000000e+00 : f32
      %95 = vector.broadcast %cst_47 : f32 to vector<8x8xf32>
      %96 = vector.broadcast %cst_48 : f32 to vector<8x8xf32>
      %97 = arith.select %94, %95, %96 : vector<8x8xi1>, vector<8x8xf32>
      %98 = vector.extract_strided_slice %91 {offsets = [0, 0], sizes = [8, 32], strides = [1, 1]} : vector<8x96xbf16> to vector<8x32xbf16>
      %99 = vector.extract_strided_slice %91 {offsets = [0, 32], sizes = [8, 32], strides = [1, 1]} : vector<8x96xbf16> to vector<8x32xbf16>
      %100 = vector.extract_strided_slice %91 {offsets = [0, 64], sizes = [8, 32], strides = [1, 1]} : vector<8x96xbf16> to vector<8x32xbf16>
      %101 = vector.extract_strided_slice %98 {offsets = [0, 0], sizes = [8, 16], strides = [1, 1]} : vector<8x32xbf16> to vector<8x16xbf16>
      %102 = vector.extract_strided_slice %99 {offsets = [0, 0], sizes = [8, 16], strides = [1, 1]} : vector<8x32xbf16> to vector<8x16xbf16>
      %103 = vector.extract_strided_slice %100 {offsets = [0, 0], sizes = [8, 16], strides = [1, 1]} : vector<8x32xbf16> to vector<8x16xbf16>
      %cst_49 = arith.constant dense<0.000000e+00> : vector<8x8xf32>
      %104 = tpu.matmul %101, %102, %cst_49 {dimension_numbers = #tpu.dot_dimension_numbers<[1], [1], [0], [0], [0, 0, 1, 0], [], []>} : vector<8x16xbf16>, vector<8x16xbf16>, vector<8x8xf32> -> vector<8x8xf32>
      %cst_50 = arith.constant 2.500000e-01 : f32
      %105 = vector.broadcast %cst_50 : f32 to vector<8x8xf32>
      %106 = arith.mulf %104, %105 : vector<8x8xf32>
      %107 = arith.addf %106, %97 : vector<8x8xf32>
      %cst_51 = arith.constant dense<0xFF800000> : vector<8xf32>
      %108 = vector.multi_reduction <maximumf>, %107, %cst_51 [1] : vector<8x8xf32> to vector<8xf32>
      %109 = vector.shape_cast %108 : vector<8xf32> to vector<8x1xf32>
      %110 = vector.broadcast %109 : vector<8x1xf32> to vector<8x8xf32>
      %111 = arith.subf %107, %110 : vector<8x8xf32>
      %112 = math.exp %111 : vector<8x8xf32>
      %cst_52 = arith.constant dense<0.000000e+00> : vector<8xf32>
      %113 = vector.multi_reduction <add>, %112, %cst_52 [1] : vector<8x8xf32> to vector<8xf32>
      %114 = vector.shape_cast %113 : vector<8xf32> to vector<8x1xf32>
      %115 = tpu.reciprocal %114 {approx = true} : vector<8x1xf32> -> vector<8x1xf32>
      %116 = vector.broadcast %115 : vector<8x1xf32> to vector<8x8xf32>
      %117 = arith.mulf %112, %116 : vector<8x8xf32>
      %118 = arith.truncf %117 : vector<8x8xf32> to vector<8x8xbf16>
      %cst_53 = arith.constant dense<0.000000e+00> : vector<8x16xf32>
      %119 = tpu.matmul %118, %103, %cst_53 {dimension_numbers = #tpu.dot_dimension_numbers<[1], [0], [0], [1], [0, 0, 1, 1], [], []>} : vector<8x8xbf16>, vector<8x16xbf16>, vector<8x16xf32> -> vector<8x16xf32>
      %c0_54 = arith.constant 0 : index
      %c0_55 = arith.constant 0 : index
      %120 = vector.load %arg26[%c0_54, %c0_55] : memref<8x32xf32, #tpu.memory_space<vmem>>, vector<8x16xf32>
      tpu.vector_store %arg26[%c0_54, %c0_55], %119 {strides = array<i32>} : memref<8x32xf32, #tpu.memory_space<vmem>>, vector<8x16xf32>,
      %121 = vector.extract_strided_slice %98 {offsets = [0, 16], sizes = [8, 16], strides = [1, 1]} : vector<8x32xbf16> to vector<8x16xbf16>
      %122 = vector.extract_strided_slice %99 {offsets = [0, 16], sizes = [8, 16], strides = [1, 1]} : vector<8x32xbf16> to vector<8x16xbf16>
      %123 = vector.extract_strided_slice %100 {offsets = [0, 16], sizes = [8, 16], strides = [1, 1]} : vector<8x32xbf16> to vector<8x16xbf16>
      %cst_56 = arith.constant dense<0.000000e+00> : vector<8x8xf32>
      %124 = tpu.matmul %121, %122, %cst_56 {dimension_numbers = #tpu.dot_dimension_numbers<[1], [1], [0], [0], [0, 0, 1, 0], [], []>} : vector<8x16xbf16>, vector<8x16xbf16>, vector<8x8xf32> -> vector<8x8xf32>
      %cst_57 = arith.constant 2.500000e-01 : f32
      %125 = vector.broadcast %cst_57 : f32 to vector<8x8xf32>
      %126 = arith.mulf %124, %125 : vector<8x8xf32>
      %127 = arith.addf %126, %97 : vector<8x8xf32>
      %cst_58 = arith.constant dense<0xFF800000> : vector<8xf32>
      %128 = vector.multi_reduction <maximumf>, %127, %cst_58 [1] : vector<8x8xf32> to vector<8xf32>
      %129 = vector.shape_cast %128 : vector<8xf32> to vector<8x1xf32>
      %130 = vector.broadcast %129 : vector<8x1xf32> to vector<8x8xf32>
      %131 = arith.subf %127, %130 : vector<8x8xf32>
      %132 = math.exp %131 : vector<8x8xf32>
      %cst_59 = arith.constant dense<0.000000e+00> : vector<8xf32>
      %133 = vector.multi_reduction <add>, %132, %cst_59 [1] : vector<8x8xf32> to vector<8xf32>
      %134 = vector.shape_cast %133 : vector<8xf32> to vector<8x1xf32>
      %135 = tpu.reciprocal %134 {approx = true} : vector<8x1xf32> -> vector<8x1xf32>
      %136 = vector.broadcast %135 : vector<8x1xf32> to vector<8x8xf32>
      %137 = arith.mulf %132, %136 : vector<8x8xf32>
      %138 = arith.truncf %137 : vector<8x8xf32> to vector<8x8xbf16>
      %cst_60 = arith.constant dense<0.000000e+00> : vector<8x16xf32>
      %139 = tpu.matmul %138, %123, %cst_60 {dimension_numbers = #tpu.dot_dimension_numbers<[1], [0], [0], [1], [0, 0, 1, 1], [], []>} : vector<8x8xbf16>, vector<8x16xbf16>, vector<8x16xf32> -> vector<8x16xf32>
      %c0_61 = arith.constant 0 : index
      %c16 = arith.constant 16 : index
      %140 = vector.load %arg26[%c0_61, %c16] : memref<8x32xf32, #tpu.memory_space<vmem>>, vector<8x16xf32>
      tpu.vector_store %arg26[%c0_61, %c16], %139 {strides = array<i32>} : memref<8x32xf32, #tpu.memory_space<vmem>>, vector<8x16xf32>,
      %c0_62 = arith.constant 0 : index
      %c0_63 = arith.constant 0 : index
      %141 = vector.load %arg26[%c0_62, %c0_63] : memref<8x32xf32, #tpu.memory_space<vmem>>, vector<8x32xf32>
      %142 = arith.truncf %141 : vector<8x32xf32> to vector<8x32xbf16>
      %c0_64 = arith.constant 0 : index
      %c0_65 = arith.constant 0 : index
      %143 = vector.load %arg8[%c0_64, %c0_65] : memref<32x32xbf16, #tpu.memory_space<vmem>>, vector<32x32xbf16>
      %cst_66 = arith.constant dense<0.000000e+00> : vector<8x32xf32>
      %144 = tpu.matmul %142, %143, %cst_66 {dimension_numbers = #tpu.dot_dimension_numbers<[1], [0], [0], [1], [0, 0, 1, 1], [], []>} : vector<8x32xbf16>, vector<32x32xbf16>, vector<8x32xf32> -> vector<8x32xf32>
      %145 = arith.addf %60, %144 : vector<8x32xf32>
      %c0_67 = arith.constant 0 : index
      %c0_68 = arith.constant 0 : index
      %146 = vector.load %arg9[%c0_67, %c0_68] : memref<1x32xf32, #tpu.memory_space<vmem>>, vector<1x32xf32>
      %147 = vector.broadcast %146 : vector<1x32xf32> to vector<8x32xf32>
      %148 = arith.addf %145, %147 : vector<8x32xf32>
      %c0_69 = arith.constant 0 : index
      %c0_70 = arith.constant 0 : index
      %149 = vector.load %arg10[%c0_69, %c0_70] : memref<1x32xf32, #tpu.memory_space<vmem>>, vector<1x32xf32>
      %c0_71 = arith.constant 0 : index
      %c0_72 = arith.constant 0 : index
      %150 = vector.load %arg11[%c0_71, %c0_72] : memref<1x32xf32, #tpu.memory_space<vmem>>, vector<1x32xf32>
      %cst_73 = arith.constant dense<0.000000e+00> : vector<8xf32>
      %151 = vector.multi_reduction <add>, %148, %cst_73 [1] : vector<8x32xf32> to vector<8xf32>
      %152 = vector.shape_cast %151 : vector<8xf32> to vector<8x1xf32>
      %cst_74 = arith.constant 3.200000e+01 : f32
      %153 = vector.broadcast %cst_74 : f32 to vector<8x1xf32>
      %154 = arith.divf %152, %153 : vector<8x1xf32>
      %155 = vector.broadcast %154 : vector<8x1xf32> to vector<8x32xf32>
      %156 = arith.subf %148, %155 : vector<8x32xf32>
      %157 = arith.mulf %156, %156 : vector<8x32xf32>
      %cst_75 = arith.constant dense<0.000000e+00> : vector<8xf32>
      %158 = vector.multi_reduction <add>, %157, %cst_75 [1] : vector<8x32xf32> to vector<8xf32>
      %159 = vector.shape_cast %158 : vector<8xf32> to vector<8x1xf32>
      %cst_76 = arith.constant 3.200000e+01 : f32
      %160 = vector.broadcast %cst_76 : f32 to vector<8x1xf32>
      %161 = arith.divf %159, %160 : vector<8x1xf32>
      %162 = vector.broadcast %154 : vector<8x1xf32> to vector<8x32xf32>
      %163 = arith.subf %148, %162 : vector<8x32xf32>
      %cst_77 = arith.constant 9.99999974E-6 : f32
      %164 = vector.broadcast %cst_77 : f32 to vector<8x1xf32>
      %165 = arith.addf %161, %164 : vector<8x1xf32>
      %166 = math.rsqrt %165 : vector<8x1xf32>
      %167 = vector.broadcast %166 : vector<8x1xf32> to vector<8x32xf32>
      %168 = arith.mulf %163, %167 : vector<8x32xf32>
      %169 = vector.broadcast %149 : vector<1x32xf32> to vector<8x32xf32>
      %170 = arith.mulf %168, %169 : vector<8x32xf32>
      %171 = vector.broadcast %150 : vector<1x32xf32> to vector<8x32xf32>
      %172 = arith.addf %170, %171 : vector<8x32xf32>
      %173 = arith.truncf %172 : vector<8x32xf32> to vector<8x32xbf16>
      %c0_78 = arith.constant 0 : index
      %c0_79 = arith.constant 0 : index
      %174 = vector.load %arg12[%c0_78, %c0_79] : memref<32x32xbf16, #tpu.memory_space<vmem>>, vector<32x32xbf16>
      %cst_80 = arith.constant dense<0.000000e+00> : vector<8x32xf32>
      %175 = tpu.matmul %173, %174, %cst_80 {dimension_numbers = #tpu.dot_dimension_numbers<[1], [0], [0], [1], [0, 0, 1, 1], [], []>} : vector<8x32xbf16>, vector<32x32xbf16>, vector<8x32xf32> -> vector<8x32xf32>
      %c0_81 = arith.constant 0 : index
      %c0_82 = arith.constant 0 : index
      %176 = vector.load %arg13[%c0_81, %c0_82] : memref<1x32xf32, #tpu.memory_space<vmem>>, vector<1x32xf32>
      %177 = vector.broadcast %176 : vector<1x32xf32> to vector<8x32xf32>
      %178 = arith.addf %175, %177 : vector<8x32xf32>
      %179 = arith.truncf %178 : vector<8x32xf32> to vector<8x32xbf16>
      %c0_83 = arith.constant 0 : index
      %c0_84 = arith.constant 0 : index
      %c0_85 = arith.constant 0 : index
      %180 = vector.load %arg3[%c0_83, %c0_84, %c0_85] : memref<1x12x32xbf16, #tpu.memory_space<vmem>>, vector<1x12x32xbf16>
      %181 = vector.shape_cast %180 : vector<1x12x32xbf16> to vector<12x32xbf16>
      %c0_86 = arith.constant 0 : index
      %c0_87 = arith.constant 0 : index
      %182 = vector.load %arg14[%c0_86, %c0_87] : memref<32x64xbf16, #tpu.memory_space<vmem>>, vector<32x64xbf16>
      %cst_88 = arith.constant dense<0.000000e+00> : vector<12x64xf32>
      %183 = tpu.matmul %181, %182, %cst_88 {dimension_numbers = #tpu.dot_dimension_numbers<[1], [0], [0], [1], [0, 0, 1, 1], [], []>} : vector<12x32xbf16>, vector<32x64xbf16>, vector<12x64xf32> -> vector<12x64xf32>
      %c0_89 = arith.constant 0 : index
      %c0_90 = arith.constant 0 : index
      %184 = vector.load %arg15[%c0_89, %c0_90] : memref<1x64xf32, #tpu.memory_space<vmem>>, vector<1x64xf32>
      %185 = vector.broadcast %184 : vector<1x64xf32> to vector<12x64xf32>
      %186 = arith.addf %183, %185 : vector<12x64xf32>
      %187 = arith.truncf %186 : vector<12x64xf32> to vector<12x64xbf16>
      %188 = vector.extract_strided_slice %187 {offsets = [0, 0], sizes = [12, 32], strides = [1, 1]} : vector<12x64xbf16> to vector<12x32xbf16>
      %189 = vector.extract_strided_slice %187 {offsets = [0, 32], sizes = [12, 32], strides = [1, 1]} : vector<12x64xbf16> to vector<12x32xbf16>
      %190 = vector.extract_strided_slice %179 {offsets = [0, 0], sizes = [8, 16], strides = [1, 1]} : vector<8x32xbf16> to vector<8x16xbf16>
      %191 = vector.extract_strided_slice %188 {offsets = [0, 0], sizes = [12, 16], strides = [1, 1]} : vector<12x32xbf16> to vector<12x16xbf16>
      %192 = vector.extract_strided_slice %189 {offsets = [0, 0], sizes = [12, 16], strides = [1, 1]} : vector<12x32xbf16> to vector<12x16xbf16>
      %cst_91 = arith.constant dense<0.000000e+00> : vector<8x12xf32>
      %193 = tpu.matmul %190, %191, %cst_91 {dimension_numbers = #tpu.dot_dimension_numbers<[1], [1], [0], [0], [0, 0, 1, 0], [], []>} : vector<8x16xbf16>, vector<12x16xbf16>, vector<8x12xf32> -> vector<8x12xf32>
      %cst_92 = arith.constant 2.500000e-01 : f32
      %194 = vector.broadcast %cst_92 : f32 to vector<8x12xf32>
      %195 = arith.mulf %193, %194 : vector<8x12xf32>
      %cst_93 = arith.constant dense<0xFF800000> : vector<8xf32>
      %196 = vector.multi_reduction <maximumf>, %195, %cst_93 [1] : vector<8x12xf32> to vector<8xf32>
      %197 = vector.shape_cast %196 : vector<8xf32> to vector<8x1xf32>
      %198 = vector.broadcast %197 : vector<8x1xf32> to vector<8x12xf32>
      %199 = arith.subf %195, %198 : vector<8x12xf32>
      %200 = math.exp %199 : vector<8x12xf32>
      %cst_94 = arith.constant dense<0.000000e+00> : vector<8xf32>
      %201 = vector.multi_reduction <add>, %200, %cst_94 [1] : vector<8x12xf32> to vector<8xf32>
      %202 = vector.shape_cast %201 : vector<8xf32> to vector<8x1xf32>
      %203 = tpu.reciprocal %202 {approx = true} : vector<8x1xf32> -> vector<8x1xf32>
      %204 = vector.broadcast %203 : vector<8x1xf32> to vector<8x12xf32>
      %205 = arith.mulf %200, %204 : vector<8x12xf32>
      %206 = arith.truncf %205 : vector<8x12xf32> to vector<8x12xbf16>
      %cst_95 = arith.constant dense<0.000000e+00> : vector<8x16xf32>
      %207 = tpu.matmul %206, %192, %cst_95 {dimension_numbers = #tpu.dot_dimension_numbers<[1], [0], [0], [1], [0, 0, 1, 1], [], []>} : vector<8x12xbf16>, vector<12x16xbf16>, vector<8x16xf32> -> vector<8x16xf32>
      %c0_96 = arith.constant 0 : index
      %c0_97 = arith.constant 0 : index
      %208 = vector.load %arg26[%c0_96, %c0_97] : memref<8x32xf32, #tpu.memory_space<vmem>>, vector<8x16xf32>
      tpu.vector_store %arg26[%c0_96, %c0_97], %207 {strides = array<i32>} : memref<8x32xf32, #tpu.memory_space<vmem>>, vector<8x16xf32>,
      %209 = vector.extract_strided_slice %179 {offsets = [0, 16], sizes = [8, 16], strides = [1, 1]} : vector<8x32xbf16> to vector<8x16xbf16>
      %210 = vector.extract_strided_slice %188 {offsets = [0, 16], sizes = [12, 16], strides = [1, 1]} : vector<12x32xbf16> to vector<12x16xbf16>
      %211 = vector.extract_strided_slice %189 {offsets = [0, 16], sizes = [12, 16], strides = [1, 1]} : vector<12x32xbf16> to vector<12x16xbf16>
      %cst_98 = arith.constant dense<0.000000e+00> : vector<8x12xf32>
      %212 = tpu.matmul %209, %210, %cst_98 {dimension_numbers = #tpu.dot_dimension_numbers<[1], [1], [0], [0], [0, 0, 1, 0], [], []>} : vector<8x16xbf16>, vector<12x16xbf16>, vector<8x12xf32> -> vector<8x12xf32>
      %cst_99 = arith.constant 2.500000e-01 : f32
      %213 = vector.broadcast %cst_99 : f32 to vector<8x12xf32>
      %214 = arith.mulf %212, %213 : vector<8x12xf32>
      %cst_100 = arith.constant dense<0xFF800000> : vector<8xf32>
      %215 = vector.multi_reduction <maximumf>, %214, %cst_100 [1] : vector<8x12xf32> to vector<8xf32>
      %216 = vector.shape_cast %215 : vector<8xf32> to vector<8x1xf32>
      %217 = vector.broadcast %216 : vector<8x1xf32> to vector<8x12xf32>
      %218 = arith.subf %214, %217 : vector<8x12xf32>
      %219 = math.exp %218 : vector<8x12xf32>
      %cst_101 = arith.constant dense<0.000000e+00> : vector<8xf32>
      %220 = vector.multi_reduction <add>, %219, %cst_101 [1] : vector<8x12xf32> to vector<8xf32>
      %221 = vector.shape_cast %220 : vector<8xf32> to vector<8x1xf32>
      %222 = tpu.reciprocal %221 {approx = true} : vector<8x1xf32> -> vector<8x1xf32>
      %223 = vector.broadcast %222 : vector<8x1xf32> to vector<8x12xf32>
      %224 = arith.mulf %219, %223 : vector<8x12xf32>
      %225 = arith.truncf %224 : vector<8x12xf32> to vector<8x12xbf16>
      %cst_102 = arith.constant dense<0.000000e+00> : vector<8x16xf32>
      %226 = tpu.matmul %225, %211, %cst_102 {dimension_numbers = #tpu.dot_dimension_numbers<[1], [0], [0], [1], [0, 0, 1, 1], [], []>} : vector<8x12xbf16>, vector<12x16xbf16>, vector<8x16xf32> -> vector<8x16xf32>
      %c0_103 = arith.constant 0 : index
      %c16_104 = arith.constant 16 : index
      %227 = vector.load %arg26[%c0_103, %c16_104] : memref<8x32xf32, #tpu.memory_space<vmem>>, vector<8x16xf32>
      tpu.vector_store %arg26[%c0_103, %c16_104], %226 {strides = array<i32>} : memref<8x32xf32, #tpu.memory_space<vmem>>, vector<8x16xf32>,
      %c0_105 = arith.constant 0 : index
      %c0_106 = arith.constant 0 : index
      %228 = vector.load %arg26[%c0_105, %c0_106] : memref<8x32xf32, #tpu.memory_space<vmem>>, vector<8x32xf32>
      %229 = arith.truncf %228 : vector<8x32xf32> to vector<8x32xbf16>
      %c0_107 = arith.constant 0 : index
      %c0_108 = arith.constant 0 : index
      %230 = vector.load %arg16[%c0_107, %c0_108] : memref<32x32xbf16, #tpu.memory_space<vmem>>, vector<32x32xbf16>
      %cst_109 = arith.constant dense<0.000000e+00> : vector<8x32xf32>
      %231 = tpu.matmul %229, %230, %cst_109 {dimension_numbers = #tpu.dot_dimension_numbers<[1], [0], [0], [1], [0, 0, 1, 1], [], []>} : vector<8x32xbf16>, vector<32x32xbf16>, vector<8x32xf32> -> vector<8x32xf32>
      %232 = arith.addf %148, %231 : vector<8x32xf32>
      %c0_110 = arith.constant 0 : index
      %c0_111 = arith.constant 0 : index
      %233 = vector.load %arg17[%c0_110, %c0_111] : memref<1x32xf32, #tpu.memory_space<vmem>>, vector<1x32xf32>
      %234 = vector.broadcast %233 : vector<1x32xf32> to vector<8x32xf32>
      %235 = arith.addf %232, %234 : vector<8x32xf32>
      %c0_112 = arith.constant 0 : index
      %c0_113 = arith.constant 0 : index
      %236 = vector.load %arg18[%c0_112, %c0_113] : memref<1x32xf32, #tpu.memory_space<vmem>>, vector<1x32xf32>
      %c0_114 = arith.constant 0 : index
      %c0_115 = arith.constant 0 : index
      %237 = vector.load %arg19[%c0_114, %c0_115] : memref<1x32xf32, #tpu.memory_space<vmem>>, vector<1x32xf32>
      %cst_116 = arith.constant dense<0.000000e+00> : vector<8xf32>
      %238 = vector.multi_reduction <add>, %235, %cst_116 [1] : vector<8x32xf32> to vector<8xf32>
      %239 = vector.shape_cast %238 : vector<8xf32> to vector<8x1xf32>
      %cst_117 = arith.constant 3.200000e+01 : f32
      %240 = vector.broadcast %cst_117 : f32 to vector<8x1xf32>
      %241 = arith.divf %239, %240 : vector<8x1xf32>
      %242 = vector.broadcast %241 : vector<8x1xf32> to vector<8x32xf32>
      %243 = arith.subf %235, %242 : vector<8x32xf32>
      %244 = arith.mulf %243, %243 : vector<8x32xf32>
      %cst_118 = arith.constant dense<0.000000e+00> : vector<8xf32>
      %245 = vector.multi_reduction <add>, %244, %cst_118 [1] : vector<8x32xf32> to vector<8xf32>
      %246 = vector.shape_cast %245 : vector<8xf32> to vector<8x1xf32>
      %cst_119 = arith.constant 3.200000e+01 : f32
      %247 = vector.broadcast %cst_119 : f32 to vector<8x1xf32>
      %248 = arith.divf %246, %247 : vector<8x1xf32>
      %249 = vector.broadcast %241 : vector<8x1xf32> to vector<8x32xf32>
      %250 = arith.subf %235, %249 : vector<8x32xf32>
      %cst_120 = arith.constant 9.99999974E-6 : f32
      %251 = vector.broadcast %cst_120 : f32 to vector<8x1xf32>
      %252 = arith.addf %248, %251 : vector<8x1xf32>
      %253 = math.rsqrt %252 : vector<8x1xf32>
      %254 = vector.broadcast %253 : vector<8x1xf32> to vector<8x32xf32>
      %255 = arith.mulf %250, %254 : vector<8x32xf32>
      %256 = vector.broadcast %236 : vector<1x32xf32> to vector<8x32xf32>
      %257 = arith.mulf %255, %256 : vector<8x32xf32>
      %258 = vector.broadcast %237 : vector<1x32xf32> to vector<8x32xf32>
      %259 = arith.addf %257, %258 : vector<8x32xf32>
      %c0_121 = arith.constant 0 : index
      %c0_122 = arith.constant 0 : index
      %260 = vector.load %arg25[%c0_121, %c0_122] : memref<8x32xf32, #tpu.memory_space<vmem>>, vector<8x32xf32>
      tpu.vector_store %arg25[%c0_121, %c0_122], %259 {strides = array<i32>} : memref<8x32xf32, #tpu.memory_space<vmem>>, vector<8x32xf32>,
      %c0_123 = arith.constant 0 : index
      %c0_124 = arith.constant 0 : index
      %261 = vector.load %arg23[%c0_123, %c0_124] : memref<1x32xf32, #tpu.memory_space<vmem>>, vector<1x32xf32>
      %262 = vector.broadcast %261 : vector<1x32xf32> to vector<8x32xf32>
      %263 = arith.addf %235, %262 : vector<8x32xf32>
      %c0_125 = arith.constant 0 : index
      %c0_126 = arith.constant 0 : index
      %c0_127 = arith.constant 0 : index
      %264 = vector.load %arg24[%c0_125, %c0_126, %c0_127] : memref<1x8x32xf32, #tpu.memory_space<vmem>>, vector<1x8x32xf32>
      %265 = vector.shape_cast %264 : vector<1x8x32xf32> to vector<8x32xf32>
      %266 = vector.shape_cast %263 : vector<8x32xf32> to vector<1x8x32xf32>
      tpu.vector_store %arg24[%c0_125, %c0_126, %c0_127], %266 {strides = array<i32>} : memref<1x8x32xf32, #tpu.memory_space<vmem>>, vector<1x8x32xf32>,
    } else {
    }
    %c0 = arith.constant 0 : index
    %c0_1 = arith.constant 0 : index
    %3 = vector.load %arg25[%c0, %c0_1] : memref<8x32xf32, #tpu.memory_space<vmem>>, vector<8x32xf32>
    %4 = arith.truncf %3 : vector<8x32xf32> to vector<8x32xbf16>
    %c0_2 = arith.constant 0 : index
    %c0_3 = arith.constant 0 : index
    %5 = vector.load %arg20[%c0_2, %c0_3] : memref<32x128xbf16, #tpu.memory_space<vmem>>, vector<32x128xbf16>
    %cst = arith.constant dense<0.000000e+00> : vector<8x128xf32>
    %6 = tpu.matmul %4, %5, %cst {dimension_numbers = #tpu.dot_dimension_numbers<[1], [0], [0], [1], [0, 0, 1, 1], [], []>} : vector<8x32xbf16>, vector<32x128xbf16>, vector<8x128xf32> -> vector<8x128xf32>
    %c0_4 = arith.constant 0 : index
    %c0_5 = arith.constant 0 : index
    %7 = vector.load %arg21[%c0_4, %c0_5] : memref<1x128xf32, #tpu.memory_space<vmem>>, vector<1x128xf32>
    %8 = vector.broadcast %7 : vector<1x128xf32> to vector<8x128xf32>
    %9 = arith.addf %6, %8 : vector<8x128xf32>
    %cst_6 = arith.constant 5.000000e-01 : f32
    %10 = vector.broadcast %cst_6 : f32 to vector<8x128xf32>
    %11 = arith.mulf %10, %9 : vector<8x128xf32>
    %cst_7 = arith.constant 0.707106769 : f32
    %12 = vector.broadcast %cst_7 : f32 to vector<8x128xf32>
    %13 = arith.mulf %9, %12 : vector<8x128xf32>
    %cst_8 = arith.constant 0.000000e+00 : f32
    %14 = vector.broadcast %cst_8 : f32 to vector<8x128xf32>
    %15 = arith.cmpf oge, %13, %14 : vector<8x128xf32>
    %cst_9 = arith.constant 1.000000e+00 : f32
    %cst_10 = arith.constant -1.000000e+00 : f32
    %16 = vector.broadcast %cst_9 : f32 to vector<8x128xf32>
    %17 = vector.broadcast %cst_10 : f32 to vector<8x128xf32>
    %18 = arith.select %15, %16, %17 : vector<8x128xi1>, vector<8x128xf32>
    %19 = math.absf %13 : vector<8x128xf32>
    %cst_11 = arith.constant 0.327591091 : f32
    %20 = vector.broadcast %cst_11 : f32 to vector<8x128xf32>
    %21 = arith.mulf %20, %19 : vector<8x128xf32>
    %cst_12 = arith.constant 1.000000e+00 : f32
    %22 = vector.broadcast %cst_12 : f32 to vector<8x128xf32>
    %23 = arith.addf %22, %21 : vector<8x128xf32>
    %24 = tpu.reciprocal %23 {approx = true} : vector<8x128xf32> -> vector<8x128xf32>
    %cst_13 = arith.constant 1.06140542 : f32
    %25 = vector.broadcast %cst_13 : f32 to vector<8x128xf32>
    %26 = arith.mulf %25, %24 : vector<8x128xf32>
    %cst_14 = arith.constant -1.45315206 : f32
    %27 = vector.broadcast %cst_14 : f32 to vector<8x128xf32>
    %28 = arith.addf %26, %27 : vector<8x128xf32>
    %29 = arith.mulf %28, %24 : vector<8x128xf32>
    %cst_15 = arith.constant 1.42141378 : f32
    %30 = vector.broadcast %cst_15 : f32 to vector<8x128xf32>
    %31 = arith.addf %29, %30 : vector<8x128xf32>
    %32 = arith.mulf %31, %24 : vector<8x128xf32>
    %cst_16 = arith.constant -0.284496725 : f32
    %33 = vector.broadcast %cst_16 : f32 to vector<8x128xf32>
    %34 = arith.addf %32, %33 : vector<8x128xf32>
    %35 = arith.mulf %34, %24 : vector<8x128xf32>
    %cst_17 = arith.constant 0.254829586 : f32
    %36 = vector.broadcast %cst_17 : f32 to vector<8x128xf32>
    %37 = arith.addf %35, %36 : vector<8x128xf32>
    %38 = arith.mulf %37, %24 : vector<8x128xf32>
    %cst_18 = arith.constant 0.000000e+00 : f32
    %39 = vector.broadcast %cst_18 : f32 to vector<8x128xf32>
    %40 = arith.subf %39, %19 : vector<8x128xf32>
    %41 = arith.mulf %40, %19 : vector<8x128xf32>
    %42 = math.exp %41 : vector<8x128xf32>
    %43 = arith.mulf %38, %42 : vector<8x128xf32>
    %cst_19 = arith.constant 1.000000e+00 : f32
    %44 = vector.broadcast %cst_19 : f32 to vector<8x128xf32>
    %45 = arith.subf %44, %43 : vector<8x128xf32>
    %46 = arith.mulf %18, %45 : vector<8x128xf32>
    %cst_20 = arith.constant 1.000000e+00 : f32
    %47 = vector.broadcast %cst_20 : f32 to vector<8x128xf32>
    %48 = arith.addf %47, %46 : vector<8x128xf32>
    %49 = arith.mulf %11, %48 : vector<8x128xf32>
    %c0_21 = arith.constant 0 : index
    %c0_22 = arith.constant 0 : index
    %c0_23 = arith.constant 0 : index
    %50 = vector.load %arg24[%c0_21, %c0_22, %c0_23] : memref<1x8x32xf32, #tpu.memory_space<vmem>>, vector<1x8x32xf32>
    %51 = vector.shape_cast %50 : vector<1x8x32xf32> to vector<8x32xf32>
    %52 = arith.truncf %49 : vector<8x128xf32> to vector<8x128xbf16>
    %c0_24 = arith.constant 0 : index
    %c0_25 = arith.constant 0 : index
    %53 = vector.load %arg22[%c0_24, %c0_25] : memref<128x32xbf16, #tpu.memory_space<vmem>>, vector<128x32xbf16>
    %cst_26 = arith.constant dense<0.000000e+00> : vector<8x32xf32>
    %54 = tpu.matmul %52, %53, %cst_26 {dimension_numbers = #tpu.dot_dimension_numbers<[1], [0], [0], [1], [0, 0, 1, 1], [], []>} : vector<8x128xbf16>, vector<128x32xbf16>, vector<8x32xf32> -> vector<8x32xf32>
    %55 = arith.addf %51, %54 : vector<8x32xf32>
    %c0_27 = arith.constant 0 : index
    %c0_28 = arith.constant 0 : index
    %c0_29 = arith.constant 0 : index
    %56 = vector.load %arg24[%c0_27, %c0_28, %c0_29] : memref<1x8x32xf32, #tpu.memory_space<vmem>>, vector<1x8x32xf32>
    %57 = vector.shape_cast %56 : vector<1x8x32xf32> to vector<8x32xf32>
    %58 = vector.shape_cast %55 : vector<8x32xf32> to vector<1x8x32xf32>
    tpu.vector_store %arg24[%c0_27, %c0_28, %c0_29], %58 {strides = array<i32>} : memref<1x8x32xf32, #tpu.memory_space<vmem>>, vector<1x8x32xf32>,
    return
  }
  func.func @transform_0(%arg0: i32, %arg1: i32) -> (i32, i32, i32) {
    %c0_i32 = arith.constant 0 : i32
    %c0_i32_0 = arith.constant 0 : i32
    %c0_i32_1 = arith.constant 0 : i32
    return %arg0, %c0_i32, %c0_i32_0 : i32, i32, i32
  }
  func.func @transform_1(%arg0: i32, %arg1: i32) -> (i32, i32, i32) {
    %c0_i32 = arith.constant 0 : i32
    %c0_i32_0 = arith.constant 0 : i32
    %c0_i32_1 = arith.constant 0 : i32
    return %arg0, %c0_i32, %c0_i32_0 : i32, i32, i32
  }
  func.func @transform_2(%arg0: i32, %arg1: i32) -> (i32, i32) {
    %c0_i32 = arith.constant 0 : i32
    %c0_i32_0 = arith.constant 0 : i32
    %c0_i32_1 = arith.constant 0 : i32
    return %c0_i32, %c0_i32_0 : i32, i32
  }
  func.func @transform_3(%arg0: i32, %arg1: i32) -> (i32, i32) {
    %c0_i32 = arith.constant 0 : i32
    %c0_i32_0 = arith.constant 0 : i32
    %c0_i32_1 = arith.constant 0 : i32
    return %c0_i32, %c0_i32_0 : i32, i32
  }
  func.func @transform_4(%arg0: i32, %arg1: i32) -> (i32, i32) {
    %c0_i32 = arith.constant 0 : i32
    %c0_i32_0 = arith.constant 0 : i32
    %c0_i32_1 = arith.constant 0 : i32
    return %c0_i32, %c0_i32_0 : i32, i32
  }
  func.func @transform_5(%arg0: i32, %arg1: i32) -> (i32, i32) {
    %c0_i32 = arith.constant 0 : i32
    %c0_i32_0 = arith.constant 0 : i32
    %c0_i32_1 = arith.constant 0 : i32
    return %c0_i32, %c0_i32_0 : i32, i32
  }
  func.func @transform_6(%arg0: i32, %arg1: i32) -> (i32, i32) {
    %c0_i32 = arith.constant 0 : i32
    %c0_i32_0 = arith.constant 0 : i32
    %c0_i32_1 = arith.constant 0 : i32
    return %c0_i32, %c0_i32_0 : i32, i32
  }
  func.func @transform_7(%arg0: i32, %arg1: i32) -> (i32, i32) {
    %c0_i32 = arith.constant 0 : i32
    %c0_i32_0 = arith.constant 0 : i32
    %c0_i32_1 = arith.constant 0 : i32
    return %c0_i32, %c0_i32_0 : i32, i32
  }
  func.func @transform_8(%arg0: i32, %arg1: i32) -> (i32, i32) {
    %c0_i32 = arith.constant 0 : i32
    %c0_i32_0 = arith.constant 0 : i32
    %c0_i32_1 = arith.constant 0 : i32
    return %c0_i32, %c0_i32_0 : i32, i32
  }
  func.func @transform_9(%arg0: i32, %arg1: i32) -> (i32, i32) {
    %c0_i32 = arith.constant 0 : i32
    %c0_i32_0 = arith.constant 0 : i32
    %c0_i32_1 = arith.constant 0 : i32
    return %c0_i32, %c0_i32_0 : i32, i32
  }
  func.func @transform_10(%arg0: i32, %arg1: i32) -> (i32, i32) {
    %c0_i32 = arith.constant 0 : i32
    %c0_i32_0 = arith.constant 0 : i32
    %c0_i32_1 = arith.constant 0 : i32
    return %c0_i32, %c0_i32_0 : i32, i32
  }
  func.func @transform_11(%arg0: i32, %arg1: i32) -> (i32, i32) {
    %c0_i32 = arith.constant 0 : i32
    %c0_i32_0 = arith.constant 0 : i32
    %c0_i32_1 = arith.constant 0 : i32
    return %c0_i32, %c0_i32_0 : i32, i32
  }
  func.func @transform_12(%arg0: i32, %arg1: i32) -> (i32, i32) {
    %c0_i32 = arith.constant 0 : i32
    %c0_i32_0 = arith.constant 0 : i32
    %c0_i32_1 = arith.constant 0 : i32
    return %c0_i32, %c0_i32_0 : i32, i32
  }
  func.func @transform_13(%arg0: i32, %arg1: i32) -> (i32, i32) {
    %c0_i32 = arith.constant 0 : i32
    %c0_i32_0 = arith.constant 0 : i32
    %c0_i32_1 = arith.constant 0 : i32
    return %c0_i32, %c0_i32_0 : i32, i32
  }
  func.func @transform_14(%arg0: i32, %arg1: i32) -> (i32, i32) {
    %c0_i32 = arith.constant 0 : i32
    %c0_i32_0 = arith.constant 0 : i32
    %c0_i32_1 = arith.constant 0 : i32
    return %c0_i32, %c0_i32_0 : i32, i32
  }
  func.func @transform_15(%arg0: i32, %arg1: i32) -> (i32, i32) {
    %c0_i32 = arith.constant 0 : i32
    %c0_i32_0 = arith.constant 0 : i32
    %c0_i32_1 = arith.constant 0 : i32
    return %c0_i32, %c0_i32_0 : i32, i32
  }
  func.func @transform_16(%arg0: i32, %arg1: i32) -> (i32, i32) {
    %c0_i32 = arith.constant 0 : i32
    %c0_i32_0 = arith.constant 0 : i32
    %c0_i32_1 = arith.constant 0 : i32
    return %c0_i32, %c0_i32_0 : i32, i32
  }
  func.func @transform_17(%arg0: i32, %arg1: i32) -> (i32, i32) {
    %c0_i32 = arith.constant 0 : i32
    %c0_i32_0 = arith.constant 0 : i32
    %c0_i32_1 = arith.constant 0 : i32
    return %c0_i32, %c0_i32_0 : i32, i32
  }
  func.func @transform_18(%arg0: i32, %arg1: i32) -> (i32, i32) {
    %c0_i32 = arith.constant 0 : i32
    %c0_i32_0 = arith.constant 0 : i32
    return %c0_i32, %arg1 : i32, i32
  }
  func.func @transform_19(%arg0: i32, %arg1: i32) -> (i32, i32) {
    %c0_i32 = arith.constant 0 : i32
    %c0_i32_0 = arith.constant 0 : i32
    return %c0_i32, %arg1 : i32, i32
  }
  func.func @transform_20(%arg0: i32, %arg1: i32) -> (i32, i32) {
    %c0_i32 = arith.constant 0 : i32
    %c0_i32_0 = arith.constant 0 : i32
    return %arg1, %c0_i32 : i32, i32
  }
  func.func @transform_21(%arg0: i32, %arg1: i32) -> (i32, i32) {
    %c0_i32 = arith.constant 0 : i32
    %c0_i32_0 = arith.constant 0 : i32
    %c0_i32_1 = arith.constant 0 : i32
    return %c0_i32, %c0_i32_0 : i32, i32
  }
  func.func @transform_22(%arg0: i32, %arg1: i32) -> (i32, i32, i32) {
    %c0_i32 = arith.constant 0 : i32
    %c0_i32_0 = arith.constant 0 : i32
    %c0_i32_1 = arith.constant 0 : i32
    return %arg0, %c0_i32, %c0_i32_0 : i32, i32, i32
  }
}

module attributes {stable_mosaic.version = 11 : i64} {
  func.func @_block_kernel(%arg0: i32, %arg1: i32, %arg2: memref<1x8x32xf32, #tpu.memory_space<vmem>>, %arg3: memref<1x12x32xbf16, #tpu.memory_space<vmem>>, %arg4: memref<1x32xf32, #tpu.memory_space<vmem>>, %arg5: memref<1x32xf32, #tpu.memory_space<vmem>>, %arg6: memref<32x96xbf16, #tpu.memory_space<vmem>>, %arg7: memref<1x96xf32, #tpu.memory_space<vmem>>, %arg8: memref<32x32xbf16, #tpu.memory_space<vmem>>, %arg9: memref<1x32xf32, #tpu.memory_space<vmem>>, %arg10: memref<1x32xf32, #tpu.memory_space<vmem>>, %arg11: memref<1x32xf32, #tpu.memory_space<vmem>>, %arg12: memref<32x32xbf16, #tpu.memory_space<vmem>>, %arg13: memref<1x32xf32, #tpu.memory_space<vmem>>, %arg14: memref<32x64xbf16, #tpu.memory_space<vmem>>, %arg15: memref<1x64xf32, #tpu.memory_space<vmem>>, %arg16: memref<32x32xbf16, #tpu.memory_space<vmem>>, %arg17: memref<1x32xf32, #tpu.memory_space<vmem>>, %arg18: memref<1x32xf32, #tpu.memory_space<vmem>>, %arg19: memref<1x32xf32, #tpu.memory_space<vmem>>, %arg20: memref<32x128xbf16, #tpu.memory_space<vmem>>, %arg21: memref<1x128xf32, #tpu.memory_space<vmem>>, %arg22: memref<128x32xbf16, #tpu.memory_space<vmem>>, %arg23: memref<1x32xf32, #tpu.memory_space<vmem>>, %arg24: memref<1x8x32xf32, #tpu.memory_space<vmem>>, %arg25: memref<8x32xf32, #tpu.memory_space<vmem>>, %arg26: memref<8x32xf32, #tpu.memory_space<vmem>>) attributes {dimension_semantics = [#tpu.dimension_semantics<parallel>, #tpu.dimension_semantics<arbitrary>], iteration_bounds = array<i64: 2, 1>, scalar_prefetch = 0 : i64, scratch_operands = 2 : i64, tpu.core_type = #tpu.core_type<tc>, window_params = [{transform_indices = @transform_0, window_bounds = array<i64: 1, 8, 32>}, {transform_indices = @transform_1, window_bounds = array<i64: 1, 12, 32>}, {pipeline_mode = #tpu.pipeline_mode<synchronous>, transform_indices = @transform_2, window_bounds = array<i64: 1, 32>}, {pipeline_mode = #tpu.pipeline_mode<synchronous>, transform_indices = @transform_3, window_bounds = array<i64: 1, 32>}, {pipeline_mode = #tpu.pipeline_mode<synchronous>, transform_indices = @transform_4, window_bounds = array<i64: 32, 96>}, {pipeline_mode = #tpu.pipeline_mode<synchronous>, transform_indices = @transform_5, window_bounds = array<i64: 1, 96>}, {pipeline_mode = #tpu.pipeline_mode<synchronous>, transform_indices = @transform_6, window_bounds = array<i64: 32, 32>}, {pipeline_mode = #tpu.pipeline_mode<synchronous>, transform_indices = @transform_7, window_bounds = array<i64: 1, 32>}, {pipeline_mode = #tpu.pipeline_mode<synchronous>, transform_indices = @transform_8, window_bounds = array<i64: 1, 32>}, {pipeline_mode = #tpu.pipeline_mode<synchronous>, transform_indices = @transform_9, window_bounds = array<i64: 1, 32>}, {pipeline_mode = #tpu.pipeline_mode<synchronous>, transform_indices = @transform_10, window_bounds = array<i64: 32, 32>}, {pipeline_mode = #tpu.pipeline_mode<synchronous>, transform_indices = @transform_11, window_bounds = array<i64: 1, 32>}, {pipeline_mode = #tpu.pipeline_mode<synchronous>, transform_indices = @transform_12, window_bounds = array<i64: 32, 64>}, {pipeline_mode = #tpu.pipeline_mode<synchronous>, transform_indices = @transform_13, window_bounds = array<i64: 1, 64>}, {pipeline_mode = #tpu.pipeline_mode<synchronous>, transform_indices = @transform_14, window_bounds = array<i64: 32, 32>}, {pipeline_mode = #tpu.pipeline_mode<synchronous>, transform_indices = @transform_15, window_bounds = array<i64: 1, 32>}, {pipeline_mode = #tpu.pipeline_mode<synchronous>, transform_indices = @transform_16, window_bounds = array<i64: 1, 32>}, {pipeline_mode = #tpu.pipeline_mode<synchronous>, transform_indices = @transform_17, window_bounds = array<i64: 1, 32>}, {transform_indices = @transform_18, window_bounds = array<i64: 32, 128>}, {transform_indices = @transform_19, window_bounds = array<i64: 1, 128>}, {transform_indices = @transform_20, window_bounds = array<i64: 128, 32>}, {pipeline_mode = #tpu.pipeline_mode<synchronous>, transform_indices = @transform_21, window_bounds = array<i64: 1, 32>}, {transform_indices = @transform_22, window_bounds = array<i64: 1, 8, 32>}]} {
    %c0_i32 = arith.constant 0 : i32
    %0 = arith.cmpi eq, %arg1, %c0_i32 : i32
    %1 = arith.extui %0 : i1 to i32
    %c0_i32_0 = arith.constant 0 : i32
    %2 = arith.cmpi ne, %1, %c0_i32_0 : i32
    scf.if %2 {
      %c0_30 = arith.constant 0 : index
      %c0_31 = arith.constant 0 : index
      %c0_32 = arith.constant 0 : index
      %59 = vector.load %arg2[%c0_30, %c0_31, %c0_32] : memref<1x8x32xf32, #tpu.memory_space<vmem>>, vector<1x8x32xf32>
      %60 = vector.shape_cast %59 : vector<1x8x32xf32> to vector<8x32xf32>
      %c0_33 = arith.constant 0 : index
      %c0_34 = arith.constant 0 : index
      %61 = vector.load %arg4[%c0_33, %c0_34] : memref<1x32xf32, #tpu.memory_space<vmem>>, vector<1x32xf32>
      %c0_35 = arith.constant 0 : index
      %c0_36 = arith.constant 0 : index
      %62 = vector.load %arg5[%c0_35, %c0_36] : memref<1x32xf32, #tpu.memory_space<vmem>>, vector<1x32xf32>
      %cst_37 = arith.constant dense<0.000000e+00> : vector<8xf32>
      %63 = vector.multi_reduction <add>, %60, %cst_37 [1] : vector<8x32xf32> to vector<8xf32>
      %64 = vector.shape_cast %63 : vector<8xf32> to vector<8x1xf32>
      %cst_38 = arith.constant 3.200000e+01 : f32
      %65 = vector.broadcast %cst_38 : f32 to vector<8x1xf32>
      %66 = arith.divf %64, %65 : vector<8x1xf32>
      %67 = vector.broadcast %66 : vector<8x1xf32> to vector<8x32xf32>
      %68 = arith.subf %60, %67 : vector<8x32xf32>
      %69 = arith.mulf %68, %68 : vector<8x32xf32>
      %cst_39 = arith.constant dense<0.000000e+00> : vector<8xf32>
      %70 = vector.multi_reduction <add>, %69, %cst_39 [1] : vector<8x32xf32> to vector<8xf32>
      %71 = vector.shape_cast %70 : vector<8xf32> to vector<8x1xf32>
      %cst_40 = arith.constant 3.200000e+01 : f32
      %72 = vector.broadcast %cst_40 : f32 to vector<8x1xf32>
      %73 = arith.divf %71, %72 : vector<8x1xf32>
      %74 = vector.broadcast %66 : vector<8x1xf32> to vector<8x32xf32>
      %75 = arith.subf %60, %74 : vector<8x32xf32>
      %cst_41 = arith.constant 9.99999974E-6 : f32
      %76 = vector.broadcast %cst_41 : f32 to vector<8x1xf32>
      %77 = arith.addf %73, %76 : vector<8x1xf32>
      %78 = math.rsqrt %77 : vector<8x1xf32>
      %79 = vector.broadcast %78 : vector<8x1xf32> to vector<8x32xf32>
      %80 = arith.mulf %75, %79 : vector<8x32xf32>
      %81 = vector.broadcast %61 : vector<1x32xf32> to vector<8x32xf32>
      %82 = arith.mulf %80, %81 : vector<8x32xf32>
      %83 = vector.broadcast %62 : vector<1x32xf32> to vector<8x32xf32>
      %84 = arith.addf %82, %83 : vector<8x32xf32>
      %85 = arith.truncf %84 : vector<8x32xf32> to vector<8x32xbf16>
      %c0_42 = arith.constant 0 : index
      %c0_43 = arith.constant 0 : index
      %86 = vector.load %arg6[%c0_42, %c0_43] : memref<32x96xbf16, #tpu.memory_space<vmem>>, vector<32x96xbf16>
      %cst_44 = arith.constant dense<0.000000e+00> : vector<8x96xf32>
      %87 = tpu.matmul %85, %86, %cst_44 {dimension_numbers = #tpu.dot_dimension_numbers<[1], [0], [0], [1], [0, 0, 1, 1], [], []>} : vector<8x32xbf16>, vector<32x96xbf16>, vector<8x96xf32> -> vector<8x96xf32>
      %c0_45 = arith.constant 0 : index
      %c0_46 = arith.constant 0 : index
      %88 = vector.load %arg7[%c0_45, %c0_46] : memref<1x96xf32, #tpu.memory_space<vmem>>, vector<1x96xf32>
      %89 = vector.broadcast %88 : vector<1x96xf32> to vector<8x96xf32>
      %90 = arith.addf %87, %89 : vector<8x96xf32>
      %91 = arith.truncf %90 : vector<8x96xf32> to vector<8x96xbf16>
      %92 = tpu.iota {dimensions = array<i32: 0>} : vector<8x8xi32>
      %93 = tpu.iota {dimensions = array<i32: 1>} : vector<8x8xi32>
      %94 = arith.cmpi sgt, %93, %92 : vector<8x8xi32>
      %cst_47 = arith.constant -1.000000e+09 : f32
      %cst_48 = arith.constant 0.000000e+00 : f32
      %95 = vector.broadcast %cst_47 : f32 to vector<8x8xf32>
      %96 = vector.broadcast %cst_48 : f32 to vector<8x8xf32>
      %97 = arith.select %94, %95, %96 : vector<8x8xi1>, vector<8x8xf32>
      %98 = vector.extract_strided_slice %91 {offsets = [0, 0], sizes = [8, 32], strides = [1, 1]} : vector<8x96xbf16> to vector<8x32xbf16>
      %99 = vector.extract_strided_slice %91 {offsets = [0, 32], sizes = [8, 32], strides = [1, 1]} : vector<8x96xbf16> to vector<8x32xbf16>
      %100 = vector.extract_strided_slice %91 {offsets = [0, 64], sizes = [8, 32], strides = [1, 1]} : vector<8x96xbf16> to vector<8x32xbf16>
      %101 = vector.extract_strided_slice %98 {offsets = [0, 0], sizes = [8, 16], strides = [1, 1]} : vector<8x32xbf16> to vector<8x16xbf16>
      %102 = vector.extract_strided_slice %99 {offsets = [0, 0], sizes = [8, 16], strides = [1, 1]} : vector<8x32xbf16> to vector<8x16xbf16>
      %103 = vector.extract_strided_slice %100 {offsets = [0, 0], sizes = [8, 16], strides = [1, 1]} : vector<8x32xbf16> to vector<8x16xbf16>
      %cst_49 = arith.constant dense<0.000000e+00> : vector<8x8xf32>
      %104 = tpu.matmul %101, %102, %cst_49 {dimension_numbers = #tpu.dot_dimension_numbers<[1], [1], [0], [0], [0, 0, 1, 0], [], []>} : vector<8x16xbf16>, vector<8x16xbf16>, vector<8x8xf32> -> vector<8x8xf32>
      %cst_50 = arith.constant 2.500000e-01 : f32
      %105 = vector.broadcast %cst_50 : f32 to vector<8x8xf32>
      %106 = arith.mulf %104, %105 : vector<8x8xf32>
      %107 = arith.addf %106, %97 : vector<8x8xf32>
      %cst_51 = arith.constant dense<0xFF800000> : vector<8xf32>
      %108 = vector.multi_reduction <maximumf>, %107, %cst_51 [1] : vector<8x8xf32> to vector<8xf32>
      %109 = vector.shape_cast %108 : vector<8xf32> to vector<8x1xf32>
      %110 = vector.broadcast %109 : vector<8x1xf32> to vector<8x8xf32>
      %111 = arith.subf %107, %110 : vector<8x8xf32>
      %112 = math.exp %111 : vector<8x8xf32>
      %cst_52 = arith.constant dense<0.000000e+00> : vector<8xf32>
      %113 = vector.multi_reduction <add>, %112, %cst_52 [1] : vector<8x8xf32> to vector<8xf32>
      %114 = vector.shape_cast %113 : vector<8xf32> to vector<8x1xf32>
      %115 = tpu.reciprocal %114 {approx = true} : vector<8x1xf32> -> vector<8x1xf32>
      %116 = vector.broadcast %115 : vector<8x1xf32> to vector<8x8xf32>
      %117 = arith.mulf %112, %116 : vector<8x8xf32>
      %118 = arith.truncf %117 : vector<8x8xf32> to vector<8x8xbf16>
      %cst_53 = arith.constant dense<0.000000e+00> : vector<8x16xf32>
      %119 = tpu.matmul %118, %103, %cst_53 {dimension_numbers = #tpu.dot_dimension_numbers<[1], [0], [0], [1], [0, 0, 1, 1], [], []>} : vector<8x8xbf16>, vector<8x16xbf16>, vector<8x16xf32> -> vector<8x16xf32>
      %c0_54 = arith.constant 0 : index
      %c0_55 = arith.constant 0 : index
      %120 = vector.load %arg26[%c0_54, %c0_55] : memref<8x32xf32, #tpu.memory_space<vmem>>, vector<8x16xf32>
      tpu.vector_store %arg26[%c0_54, %c0_55], %119 {strides = array<i32>} : memref<8x32xf32, #tpu.memory_space<vmem>>, vector<8x16xf32>,
      %121 = vector.extract_strided_slice %98 {offsets = [0, 16], sizes = [8, 16], strides = [1, 1]} : vector<8x32xbf16> to vector<8x16xbf16>
      %122 = vector.extract_strided_slice %99 {offsets = [0, 16], sizes = [8, 16], strides = [1, 1]} : vector<8x32xbf16> to vector<8x16xbf16>
      %123 = vector.extract_strided_slice %100 {offsets = [0, 16], sizes = [8, 16], strides = [1, 1]} : vector<8x32xbf16> to vector<8x16xbf16>
      %cst_56 = arith.constant dense<0.000000e+00> : vector<8x8xf32>
      %124 = tpu.matmul %121, %122, %cst_56 {dimension_numbers = #tpu.dot_dimension_numbers<[1], [1], [0], [0], [0, 0, 1, 0], [], []>} : vector<8x16xbf16>, vector<8x16xbf16>, vector<8x8xf32> -> vector<8x8xf32>
      %cst_57 = arith.constant 2.500000e-01 : f32
      %125 = vector.broadcast %cst_57 : f32 to vector<8x8xf32>
      %126 = arith.mulf %124, %125 : vector<8x8xf32>
      %127 = arith.addf %126, %97 : vector<8x8xf32>
      %cst_58 = arith.constant dense<0xFF800000> : vector<8xf32>
      %128 = vector.multi_reduction <maximumf>, %127, %cst_58 [1] : vector<8x8xf32> to vector<8xf32>
      %129 = vector.shape_cast %128 : vector<8xf32> to vector<8x1xf32>
      %130 = vector.broadcast %129 : vector<8x1xf32> to vector<8x8xf32>
      %131 = arith.subf %127, %130 : vector<8x8xf32>
      %132 = math.exp %131 : vector<8x8xf32>
      %cst_59 = arith.constant dense<0.000000e+00> : vector<8xf32>
      %133 = vector.multi_reduction <add>, %132, %cst_59 [1] : vector<8x8xf32> to vector<8xf32>
      %134 = vector.shape_cast %133 : vector<8xf32> to vector<8x1xf32>
      %135 = tpu.reciprocal %134 {approx = true} : vector<8x1xf32> -> vector<8x1xf32>
      %136 = vector.broadcast %135 : vector<8x1xf32> to vector<8x8xf32>
      %137 = arith.mulf %132, %136 : vector<8x8xf32>
      %138 = arith.truncf %137 : vector<8x8xf32> to vector<8x8xbf16>
      %cst_60 = arith.constant dense<0.000000e+00> : vector<8x16xf32>
      %139 = tpu.matmul %138, %123, %cst_60 {dimension_numbers = #tpu.dot_dimension_numbers<[1], [0], [0], [1], [0, 0, 1, 1], [], []>} : vector<8x8xbf16>, vector<8x16xbf16>, vector<8x16xf32> -> vector<8x16xf32>
      %c0_61 = arith.constant 0 : index
      %c16 = arith.constant 16 : index
      %140 = vector.load %arg26[%c0_61, %c16] : memref<8x32xf32, #tpu.memory_space<vmem>>, vector<8x16xf32>
      tpu.vector_store %arg26[%c0_61, %c16], %139 {strides = array<i32>} : memref<8x32xf32, #tpu.memory_space<vmem>>, vector<8x16xf32>,
      %c0_62 = arith.constant 0 : index
      %c0_63 = arith.constant 0 : index
      %141 = vector.load %arg26[%c0_62, %c0_63] : memref<8x32xf32, #tpu.memory_space<vmem>>, vector<8x32xf32>
      %142 = arith.truncf %141 : vector<8x32xf32> to vector<8x32xbf16>
      %c0_64 = arith.constant 0 : index
      %c0_65 = arith.constant 0 : index
      %143 = vector.load %arg8[%c0_64, %c0_65] : memref<32x32xbf16, #tpu.memory_space<vmem>>, vector<32x32xbf16>
      %cst_66 = arith.constant dense<0.000000e+00> : vector<8x32xf32>
      %144 = tpu.matmul %142, %143, %cst_66 {dimension_numbers = #tpu.dot_dimension_numbers<[1], [0], [0], [1], [0, 0, 1, 1], [], []>} : vector<8x32xbf16>, vector<32x32xbf16>, vector<8x32xf32> -> vector<8x32xf32>
      %145 = arith.addf %60, %144 : vector<8x32xf32>
      %c0_67 = arith.constant 0 : index
      %c0_68 = arith.constant 0 : index
      %146 = vector.load %arg9[%c0_67, %c0_68] : memref<1x32xf32, #tpu.memory_space<vmem>>, vector<1x32xf32>
      %147 = vector.broadcast %146 : vector<1x32xf32> to vector<8x32xf32>
      %148 = arith.addf %145, %147 : vector<8x32xf32>
      %c0_69 = arith.constant 0 : index
      %c0_70 = arith.constant 0 : index
      %149 = vector.load %arg10[%c0_69, %c0_70] : memref<1x32xf32, #tpu.memory_space<vmem>>, vector<1x32xf32>
      %c0_71 = arith.constant 0 : index
      %c0_72 = arith.constant 0 : index
      %150 = vector.load %arg11[%c0_71, %c0_72] : memref<1x32xf32, #tpu.memory_space<vmem>>, vector<1x32xf32>
      %cst_73 = arith.constant dense<0.000000e+00> : vector<8xf32>
      %151 = vector.multi_reduction <add>, %148, %cst_73 [1] : vector<8x32xf32> to vector<8xf32>
      %152 = vector.shape_cast %151 : vector<8xf32> to vector<8x1xf32>
      %cst_74 = arith.constant 3.200000e+01 : f32
      %153 = vector.broadcast %cst_74 : f32 to vector<8x1xf32>
      %154 = arith.divf %152, %153 : vector<8x1xf32>
      %155 = vector.broadcast %154 : vector<8x1xf32> to vector<8x32xf32>
      %156 = arith.subf %148, %155 : vector<8x32xf32>
      %157 = arith.mulf %156, %156 : vector<8x32xf32>
      %cst_75 = arith.constant dense<0.000000e+00> : vector<8xf32>
      %158 = vector.multi_reduction <add>, %157, %cst_75 [1] : vector<8x32xf32> to vector<8xf32>
      %159 = vector.shape_cast %158 : vector<8xf32> to vector<8x1xf32>
      %cst_76 = arith.constant 3.200000e+01 : f32
      %160 = vector.broadcast %cst_76 : f32 to vector<8x1xf32>
      %161 = arith.divf %159, %160 : vector<8x1xf32>
      %162 = vector.broadcast %154 : vector<8x1xf32> to vector<8x32xf32>
      %163 = arith.subf %148, %162 : vector<8x32xf32>
      %cst_77 = arith.constant 9.99999974E-6 : f32
      %164 = vector.broadcast %cst_77 : f32 to vector<8x1xf32>
      %165 = arith.addf %161, %164 : vector<8x1xf32>
      %166 = math.rsqrt %165 : vector<8x1xf32>
      %167 = vector.broadcast %166 : vector<8x1xf32> to vector<8x32xf32>
      %168 = arith.mulf %163, %167 : vector<8x32xf32>
      %169 = vector.broadcast %149 : vector<1x32xf32> to vector<8x32xf32>
      %170 = arith.mulf %168, %169 : vector<8x32xf32>
      %171 = vector.broadcast %150 : vector<1x32xf32> to vector<8x32xf32>
      %172 = arith.addf %170, %171 : vector<8x32xf32>
      %173 = arith.truncf %172 : vector<8x32xf32> to vector<8x32xbf16>
      %c0_78 = arith.constant 0 : index
      %c0_79 = arith.constant 0 : index
      %174 = vector.load %arg12[%c0_78, %c0_79] : memref<32x32xbf16, #tpu.memory_space<vmem>>, vector<32x32xbf16>
      %cst_80 = arith.constant dense<0.000000e+00> : vector<8x32xf32>
      %175 = tpu.matmul %173, %174, %cst_80 {dimension_numbers = #tpu.dot_dimension_numbers<[1], [0], [0], [1], [0, 0, 1, 1], [], []>} : vector<8x32xbf16>, vector<32x32xbf16>, vector<8x32xf32> -> vector<8x32xf32>
      %c0_81 = arith.constant 0 : index
      %c0_82 = arith.constant 0 : index
      %176 = vector.load %arg13[%c0_81, %c0_82] : memref<1x32xf32, #tpu.memory_space<vmem>>, vector<1x32xf32>
      %177 = vector.broadcast %176 : vector<1x32xf32> to vector<8x32xf32>
      %178 = arith.addf %175, %177 : vector<8x32xf32>
      %179 = arith.truncf %178 : vector<8x32xf32> to vector<8x32xbf16>
      %c0_83 = arith.constant 0 : index
      %c0_84 = arith.constant 0 : index
      %c0_85 = arith.constant 0 : index
      %180 = vector.load %arg3[%c0_83, %c0_84, %c0_85] : memref<1x12x32xbf16, #tpu.memory_space<vmem>>, vector<1x12x32xbf16>
      %181 = vector.shape_cast %180 : vector<1x12x32xbf16> to vector<12x32xbf16>
      %c0_86 = arith.constant 0 : index
      %c0_87 = arith.constant 0 : index
      %182 = vector.load %arg14[%c0_86, %c0_87] : memref<32x64xbf16, #tpu.memory_space<vmem>>, vector<32x64xbf16>
      %cst_88 = arith.constant dense<0.000000e+00> : vector<12x64xf32>
      %183 = tpu.matmul %181, %182, %cst_88 {dimension_numbers = #tpu.dot_dimension_numbers<[1], [0], [0], [1], [0, 0, 1, 1], [], []>} : vector<12x32xbf16>, vector<32x64xbf16>, vector<12x64xf32> -> vector<12x64xf32>
      %c0_89 = arith.constant 0 : index
      %c0_90 = arith.constant 0 : index
      %184 = vector.load %arg15[%c0_89, %c0_90] : memref<1x64xf32, #tpu.memory_space<vmem>>, vector<1x64xf32>
      %185 = vector.broadcast %184 : vector<1x64xf32> to vector<12x64xf32>
      %186 = arith.addf %183, %185 : vector<12x64xf32>
      %187 = arith.truncf %186 : vector<12x64xf32> to vector<12x64xbf16>
      %188 = vector.extract_strided_slice %187 {offsets = [0, 0], sizes = [12, 32], strides = [1, 1]} : vector<12x64xbf16> to vector<12x32xbf16>
      %189 = vector.extract_strided_slice %187 {offsets = [0, 32], sizes = [12, 32], strides = [1, 1]} : vector<12x64xbf16> to vector<12x32xbf16>
      %190 = vector.extract_strided_slice %179 {offsets = [0, 0], sizes = [8, 16], strides = [1, 1]} : vector<8x32xbf16> to vector<8x16xbf16>
      %191 = vector.extract_strided_slice %188 {offsets = [0, 0], sizes = [12, 16], strides = [1, 1]} : vector<12x32xbf16> to vector<12x16xbf16>
      %192 = vector.extract_strided_slice %189 {offsets = [0, 0], sizes = [12, 16], strides = [1, 1]} : vector<12x32xbf16> to vector<12x16xbf16>
      %cst_91 = arith.constant dense<0.000000e+00> : vector<8x12xf32>
      %193 = tpu.matmul %190, %191, %cst_91 {dimension_numbers = #tpu.dot_dimension_numbers<[1], [1], [0], [0], [0, 0, 1, 0], [], []>} : vector<8x16xbf16>, vector<12x16xbf16>, vector<8x12xf32> -> vector<8x12xf32>
      %cst_92 = arith.constant 2.500000e-01 : f32
      %194 = vector.broadcast %cst_92 : f32 to vector<8x12xf32>
      %195 = arith.mulf %193, %194 : vector<8x12xf32>
      %cst_93 = arith.constant dense<0xFF800000> : vector<8xf32>
      %196 = vector.multi_reduction <maximumf>, %195, %cst_93 [1] : vector<8x12xf32> to vector<8xf32>
      %197 = vector.shape_cast %196 : vector<8xf32> to vector<8x1xf32>
      %198 = vector.broadcast %197 : vector<8x1xf32> to vector<8x12xf32>
      %199 = arith.subf %195, %198 : vector<8x12xf32>
      %200 = math.exp %199 : vector<8x12xf32>
      %cst_94 = arith.constant dense<0.000000e+00> : vector<8xf32>
      %201 = vector.multi_reduction <add>, %200, %cst_94 [1] : vector<8x12xf32> to vector<8xf32>
      %202 = vector.shape_cast %201 : vector<8xf32> to vector<8x1xf32>
      %203 = tpu.reciprocal %202 {approx = true} : vector<8x1xf32> -> vector<8x1xf32>
      %204 = vector.broadcast %203 : vector<8x1xf32> to vector<8x12xf32>
      %205 = arith.mulf %200, %204 : vector<8x12xf32>
      %206 = arith.truncf %205 : vector<8x12xf32> to vector<8x12xbf16>
      %cst_95 = arith.constant dense<0.000000e+00> : vector<8x16xf32>
      %207 = tpu.matmul %206, %192, %cst_95 {dimension_numbers = #tpu.dot_dimension_numbers<[1], [0], [0], [1], [0, 0, 1, 1], [], []>} : vector<8x12xbf16>, vector<12x16xbf16>, vector<8x16xf32> -> vector<8x16xf32>
      %c0_96 = arith.constant 0 : index
      %c0_97 = arith.constant 0 : index
      %208 = vector.load %arg26[%c0_96, %c0_97] : memref<8x32xf32, #tpu.memory_space<vmem>>, vector<8x16xf32>
      tpu.vector_store %arg26[%c0_96, %c0_97], %207 {strides = array<i32>} : memref<8x32xf32, #tpu.memory_space<vmem>>, vector<8x16xf32>,
      %209 = vector.extract_strided_slice %179 {offsets = [0, 16], sizes = [8, 16], strides = [1, 1]} : vector<8x32xbf16> to vector<8x16xbf16>
      %210 = vector.extract_strided_slice %188 {offsets = [0, 16], sizes = [12, 16], strides = [1, 1]} : vector<12x32xbf16> to vector<12x16xbf16>
      %211 = vector.extract_strided_slice %189 {offsets = [0, 16], sizes = [12, 16], strides = [1, 1]} : vector<12x32xbf16> to vector<12x16xbf16>
      %cst_98 = arith.constant dense<0.000000e+00> : vector<8x12xf32>
      %212 = tpu.matmul %209, %210, %cst_98 {dimension_numbers = #tpu.dot_dimension_numbers<[1], [1], [0], [0], [0, 0, 1, 0], [], []>} : vector<8x16xbf16>, vector<12x16xbf16>, vector<8x12xf32> -> vector<8x12xf32>
      %cst_99 = arith.constant 2.500000e-01 : f32
      %213 = vector.broadcast %cst_99 : f32 to vector<8x12xf32>
      %214 = arith.mulf %212, %213 : vector<8x12xf32>
      %cst_100 = arith.constant dense<0xFF800000> : vector<8xf32>
      %215 = vector.multi_reduction <maximumf>, %214, %cst_100 [1] : vector<8x12xf32> to vector<8xf32>
      %216 = vector.shape_cast %215 : vector<8xf32> to vector<8x1xf32>
      %217 = vector.broadcast %216 : vector<8x1xf32> to vector<8x12xf32>
      %218 = arith.subf %214, %217 : vector<8x12xf32>
      %219 = math.exp %218 : vector<8x12xf32>
      %cst_101 = arith.constant dense<0.000000e+00> : vector<8xf32>
      %220 = vector.multi_reduction <add>, %219, %cst_101 [1] : vector<8x12xf32> to vector<8xf32>
      %221 = vector.shape_cast %220 : vector<8xf32> to vector<8x1xf32>
      %222 = tpu.reciprocal %221 {approx = true} : vector<8x1xf32> -> vector<8x1xf32>
      %223 = vector.broadcast %222 : vector<8x1xf32> to vector<8x12xf32>
      %224 = arith.mulf %219, %223 : vector<8x12xf32>
      %225 = arith.truncf %224 : vector<8x12xf32> to vector<8x12xbf16>
      %cst_102 = arith.constant dense<0.000000e+00> : vector<8x16xf32>
      %226 = tpu.matmul %225, %211, %cst_102 {dimension_numbers = #tpu.dot_dimension_numbers<[1], [0], [0], [1], [0, 0, 1, 1], [], []>} : vector<8x12xbf16>, vector<12x16xbf16>, vector<8x16xf32> -> vector<8x16xf32>
      %c0_103 = arith.constant 0 : index
      %c16_104 = arith.constant 16 : index
      %227 = vector.load %arg26[%c0_103, %c16_104] : memref<8x32xf32, #tpu.memory_space<vmem>>, vector<8x16xf32>
      tpu.vector_store %arg26[%c0_103, %c16_104], %226 {strides = array<i32>} : memref<8x32xf32, #tpu.memory_space<vmem>>, vector<8x16xf32>,
      %c0_105 = arith.constant 0 : index
      %c0_106 = arith.constant 0 : index
      %228 = vector.load %arg26[%c0_105, %c0_106] : memref<8x32xf32, #tpu.memory_space<vmem>>, vector<8x32xf32>
      %229 = arith.truncf %228 : vector<8x32xf32> to vector<8x32xbf16>
      %c0_107 = arith.constant 0 : index
      %c0_108 = arith.constant 0 : index
      %230 = vector.load %arg16[%c0_107, %c0_108] : memref<32x32xbf16, #tpu.memory_space<vmem>>, vector<32x32xbf16>
      %cst_109 = arith.constant dense<0.000000e+00> : vector<8x32xf32>
      %231 = tpu.matmul %229, %230, %cst_109 {dimension_numbers = #tpu.dot_dimension_numbers<[1], [0], [0], [1], [0, 0, 1, 1], [], []>} : vector<8x32xbf16>, vector<32x32xbf16>, vector<8x32xf32> -> vector<8x32xf32>
      %232 = arith.addf %148, %231 : vector<8x32xf32>
      %c0_110 = arith.constant 0 : index
      %c0_111 = arith.constant 0 : index
      %233 = vector.load %arg17[%c0_110, %c0_111] : memref<1x32xf32, #tpu.memory_space<vmem>>, vector<1x32xf32>
      %234 = vector.broadcast %233 : vector<1x32xf32> to vector<8x32xf32>
      %235 = arith.addf %232, %234 : vector<8x32xf32>
      %c0_112 = arith.constant 0 : index
      %c0_113 = arith.constant 0 : index
      %236 = vector.load %arg18[%c0_112, %c0_113] : memref<1x32xf32, #tpu.memory_space<vmem>>, vector<1x32xf32>
      %c0_114 = arith.constant 0 : index
      %c0_115 = arith.constant 0 : index
      %237 = vector.load %arg19[%c0_114, %c0_115] : memref<1x32xf32, #tpu.memory_space<vmem>>, vector<1x32xf32>
      %cst_116 = arith.constant dense<0.000000e+00> : vector<8xf32>
      %238 = vector.multi_reduction <add>, %235, %cst_116 [1] : vector<8x32xf32> to vector<8xf32>
      %239 = vector.shape_cast %238 : vector<8xf32> to vector<8x1xf32>
      %cst_117 = arith.constant 3.200000e+01 : f32
      %240 = vector.broadcast %cst_117 : f32 to vector<8x1xf32>
      %241 = arith.divf %239, %240 : vector<8x1xf32>
      %242 = vector.broadcast %241 : vector<8x1xf32> to vector<8x32xf32>
      %243 = arith.subf %235, %242 : vector<8x32xf32>
      %244 = arith.mulf %243, %243 : vector<8x32xf32>
      %cst_118 = arith.constant dense<0.000000e+00> : vector<8xf32>
      %245 = vector.multi_reduction <add>, %244, %cst_118 [1] : vector<8x32xf32> to vector<8xf32>
      %246 = vector.shape_cast %245 : vector<8xf32> to vector<8x1xf32>
      %cst_119 = arith.constant 3.200000e+01 : f32
      %247 = vector.broadcast %cst_119 : f32 to vector<8x1xf32>
      %248 = arith.divf %246, %247 : vector<8x1xf32>
      %249 = vector.broadcast %241 : vector<8x1xf32> to vector<8x32xf32>
      %250 = arith.subf %235, %249 : vector<8x32xf32>
      %cst_120 = arith.constant 9.99999974E-6 : f32
      %251 = vector.broadcast %cst_120 : f32 to vector<8x1xf32>
      %252 = arith.addf %248, %251 : vector<8x1xf32>
      %253 = math.rsqrt %252 : vector<8x1xf32>
      %254 = vector.broadcast %253 : vector<8x1xf32> to vector<8x32xf32>
      %255 = arith.mulf %250, %254 : vector<8x32xf32>
      %256 = vector.broadcast %236 : vector<1x32xf32> to vector<8x32xf32>
      %257 = arith.mulf %255, %256 : vector<8x32xf32>
      %258 = vector.broadcast %237 : vector<1x32xf32> to vector<8x32xf32>
      %259 = arith.addf %257, %258 : vector<8x32xf32>
      %c0_121 = arith.constant 0 : index
      %c0_122 = arith.constant 0 : index
      %260 = vector.load %arg25[%c0_121, %c0_122] : memref<8x32xf32, #tpu.memory_space<vmem>>, vector<8x32xf32>
      tpu.vector_store %arg25[%c0_121, %c0_122], %259 {strides = array<i32>} : memref<8x32xf32, #tpu.memory_space<vmem>>, vector<8x32xf32>,
      %c0_123 = arith.constant 0 : index
      %c0_124 = arith.constant 0 : index
      %261 = vector.load %arg23[%c0_123, %c0_124] : memref<1x32xf32, #tpu.memory_space<vmem>>, vector<1x32xf32>
      %262 = vector.broadcast %261 : vector<1x32xf32> to vector<8x32xf32>
      %263 = arith.addf %235, %262 : vector<8x32xf32>
      %c0_125 = arith.constant 0 : index
      %c0_126 = arith.constant 0 : index
      %c0_127 = arith.constant 0 : index
      %264 = vector.load %arg24[%c0_125, %c0_126, %c0_127] : memref<1x8x32xf32, #tpu.memory_space<vmem>>, vector<1x8x32xf32>
      %265 = vector.shape_cast %264 : vector<1x8x32xf32> to vector<8x32xf32>
      %266 = vector.shape_cast %263 : vector<8x32xf32> to vector<1x8x32xf32>
      tpu.vector_store %arg24[%c0_125, %c0_126, %c0_127], %266 {strides = array<i32>} : memref<1x8x32xf32, #tpu.memory_space<vmem>>, vector<1x8x32xf32>,
    } else {
    }
    %c0 = arith.constant 0 : index
    %c0_1 = arith.constant 0 : index
    %3 = vector.load %arg25[%c0, %c0_1] : memref<8x32xf32, #tpu.memory_space<vmem>>, vector<8x32xf32>
    %4 = arith.truncf %3 : vector<8x32xf32> to vector<8x32xbf16>
    %c0_2 = arith.constant 0 : index
    %c0_3 = arith.constant 0 : index
    %5 = vector.load %arg20[%c0_2, %c0_3] : memref<32x128xbf16, #tpu.memory_space<vmem>>, vector<32x128xbf16>
    %cst = arith.constant dense<0.000000e+00> : vector<8x128xf32>
    %6 = tpu.matmul %4, %5, %cst {dimension_numbers = #tpu.dot_dimension_numbers<[1], [0], [0], [1], [0, 0, 1, 1], [], []>} : vector<8x32xbf16>, vector<32x128xbf16>, vector<8x128xf32> -> vector<8x128xf32>
    %c0_4 = arith.constant 0 : index
    %c0_5 = arith.constant 0 : index
    %7 = vector.load %arg21[%c0_4, %c0_5] : memref<1x128xf32, #tpu.memory_space<vmem>>, vector<1x128xf32>
    %8 = vector.broadcast %7 : vector<1x128xf32> to vector<8x128xf32>
    %9 = arith.addf %6, %8 : vector<8x128xf32>
    %cst_6 = arith.constant 5.000000e-01 : f32
    %10 = vector.broadcast %cst_6 : f32 to vector<8x128xf32>
    %11 = arith.mulf %10, %9 : vector<8x128xf32>
    %cst_7 = arith.constant 0.707106769 : f32
    %12 = vector.broadcast %cst_7 : f32 to vector<8x128xf32>
    %13 = arith.mulf %9, %12 : vector<8x128xf32>
    %cst_8 = arith.constant 0.000000e+00 : f32
    %14 = vector.broadcast %cst_8 : f32 to vector<8x128xf32>
    %15 = arith.cmpf oge, %13, %14 : vector<8x128xf32>
    %cst_9 = arith.constant 1.000000e+00 : f32
    %cst_10 = arith.constant -1.000000e+00 : f32
    %16 = vector.broadcast %cst_9 : f32 to vector<8x128xf32>
    %17 = vector.broadcast %cst_10 : f32 to vector<8x128xf32>
    %18 = arith.select %15, %16, %17 : vector<8x128xi1>, vector<8x128xf32>
    %19 = math.absf %13 : vector<8x128xf32>
    %cst_11 = arith.constant 0.327591091 : f32
    %20 = vector.broadcast %cst_11 : f32 to vector<8x128xf32>
    %21 = arith.mulf %20, %19 : vector<8x128xf32>
    %cst_12 = arith.constant 1.000000e+00 : f32
    %22 = vector.broadcast %cst_12 : f32 to vector<8x128xf32>
    %23 = arith.addf %22, %21 : vector<8x128xf32>
    %24 = tpu.reciprocal %23 {approx = true} : vector<8x128xf32> -> vector<8x128xf32>
    %cst_13 = arith.constant 1.06140542 : f32
    %25 = vector.broadcast %cst_13 : f32 to vector<8x128xf32>
    %26 = arith.mulf %25, %24 : vector<8x128xf32>
    %cst_14 = arith.constant -1.45315206 : f32
    %27 = vector.broadcast %cst_14 : f32 to vector<8x128xf32>
    %28 = arith.addf %26, %27 : vector<8x128xf32>
    %29 = arith.mulf %28, %24 : vector<8x128xf32>
    %cst_15 = arith.constant 1.42141378 : f32
    %30 = vector.broadcast %cst_15 : f32 to vector<8x128xf32>
    %31 = arith.addf %29, %30 : vector<8x128xf32>
    %32 = arith.mulf %31, %24 : vector<8x128xf32>
    %cst_16 = arith.constant -0.284496725 : f32
    %33 = vector.broadcast %cst_16 : f32 to vector<8x128xf32>
    %34 = arith.addf %32, %33 : vector<8x128xf32>
    %35 = arith.mulf %34, %24 : vector<8x128xf32>
    %cst_17 = arith.constant 0.254829586 : f32
    %36 = vector.broadcast %cst_17 : f32 to vector<8x128xf32>
    %37 = arith.addf %35, %36 : vector<8x128xf32>
    %38 = arith.mulf %37, %24 : vector<8x128xf32>
    %cst_18 = arith.constant 0.000000e+00 : f32
    %39 = vector.broadcast %cst_18 : f32 to vector<8x128xf32>
    %40 = arith.subf %39, %19 : vector<8x128xf32>
    %41 = arith.mulf %40, %19 : vector<8x128xf32>
    %42 = math.exp %41 : vector<8x128xf32>
    %43 = arith.mulf %38, %42 : vector<8x128xf32>
    %cst_19 = arith.constant 1.000000e+00 : f32
    %44 = vector.broadcast %cst_19 : f32 to vector<8x128xf32>
    %45 = arith.subf %44, %43 : vector<8x128xf32>
    %46 = arith.mulf %18, %45 : vector<8x128xf32>
    %cst_20 = arith.constant 1.000000e+00 : f32
    %47 = vector.broadcast %cst_20 : f32 to vector<8x128xf32>
    %48 = arith.addf %47, %46 : vector<8x128xf32>
    %49 = arith.mulf %11, %48 : vector<8x128xf32>
    %c0_21 = arith.constant 0 : index
    %c0_22 = arith.constant 0 : index
    %c0_23 = arith.constant 0 : index
    %50 = vector.load %arg24[%c0_21, %c0_22, %c0_23] : memref<1x8x32xf32, #tpu.memory_space<vmem>>, vector<1x8x32xf32>
    %51 = vector.shape_cast %50 : vector<1x8x32xf32> to vector<8x32xf32>
    %52 = arith.truncf %49 : vector<8x128xf32> to vector<8x128xbf16>
    %c0_24 = arith.constant 0 : index
    %c0_25 = arith.constant 0 : index
    %53 = vector.load %arg22[%c0_24, %c0_25] : memref<128x32xbf16, #tpu.memory_space<vmem>>, vector<128x32xbf16>
    %cst_26 = arith.constant dense<0.000000e+00> : vector<8x32xf32>
    %54 = tpu.matmul %52, %53, %cst_26 {dimension_numbers = #tpu.dot_dimension_numbers<[1], [0], [0], [1], [0, 0, 1, 1], [], []>} : vector<8x128xbf16>, vector<128x32xbf16>, vector<8x32xf32> -> vector<8x32xf32>
    %55 = arith.addf %51, %54 : vector<8x32xf32>
    %c0_27 = arith.constant 0 : index
    %c0_28 = arith.constant 0 : index
    %c0_29 = arith.constant 0 : index
    %56 = vector.load %arg24[%c0_27, %c0_28, %c0_29] : memref<1x8x32xf32, #tpu.memory_space<vmem>>, vector<1x8x32xf32>
    %57 = vector.shape_cast %56 : vector<1x8x32xf32> to vector<8x32xf32>
    %58 = vector.shape_cast %55 : vector<8x32xf32> to vector<1x8x32xf32>
    tpu.vector_store %arg24[%c0_27, %c0_28, %c0_29], %58 {strides = array<i32>} : memref<1x8x32xf32, #tpu.memory_space<vmem>>, vector<1x8x32xf32>,
    return
  }
  func.func @transform_0(%arg0: i32, %arg1: i32) -> (i32, i32, i32) {
    %c0_i32 = arith.constant 0 : i32
    %c0_i32_0 = arith.constant 0 : i32
    %c0_i32_1 = arith.constant 0 : i32
    return %arg0, %c0_i32, %c0_i32_0 : i32, i32, i32
  }
  func.func @transform_1(%arg0: i32, %arg1: i32) -> (i32, i32, i32) {
    %c0_i32 = arith.constant 0 : i32
    %c0_i32_0 = arith.constant 0 : i32
    %c0_i32_1 = arith.constant 0 : i32
    return %arg0, %c0_i32, %c0_i32_0 : i32, i32, i32
  }
  func.func @transform_2(%arg0: i32, %arg1: i32) -> (i32, i32) {
    %c0_i32 = arith.constant 0 : i32
    %c0_i32_0 = arith.constant 0 : i32
    %c0_i32_1 = arith.constant 0 : i32
    return %c0_i32, %c0_i32_0 : i32, i32
  }
  func.func @transform_3(%arg0: i32, %arg1: i32) -> (i32, i32) {
    %c0_i32 = arith.constant 0 : i32
    %c0_i32_0 = arith.constant 0 : i32
    %c0_i32_1 = arith.constant 0 : i32
    return %c0_i32, %c0_i32_0 : i32, i32
  }
  func.func @transform_4(%arg0: i32, %arg1: i32) -> (i32, i32) {
    %c0_i32 = arith.constant 0 : i32
    %c0_i32_0 = arith.constant 0 : i32
    %c0_i32_1 = arith.constant 0 : i32
    return %c0_i32, %c0_i32_0 : i32, i32
  }
  func.func @transform_5(%arg0: i32, %arg1: i32) -> (i32, i32) {
    %c0_i32 = arith.constant 0 : i32
    %c0_i32_0 = arith.constant 0 : i32
    %c0_i32_1 = arith.constant 0 : i32
    return %c0_i32, %c0_i32_0 : i32, i32
  }
  func.func @transform_6(%arg0: i32, %arg1: i32) -> (i32, i32) {
    %c0_i32 = arith.constant 0 : i32
    %c0_i32_0 = arith.constant 0 : i32
    %c0_i32_1 = arith.constant 0 : i32
    return %c0_i32, %c0_i32_0 : i32, i32
  }
  func.func @transform_7(%arg0: i32, %arg1: i32) -> (i32, i32) {
    %c0_i32 = arith.constant 0 : i32
    %c0_i32_0 = arith.constant 0 : i32
    %c0_i32_1 = arith.constant 0 : i32
    return %c0_i32, %c0_i32_0 : i32, i32
  }
  func.func @transform_8(%arg0: i32, %arg1: i32) -> (i32, i32) {
    %c0_i32 = arith.constant 0 : i32
    %c0_i32_0 = arith.constant 0 : i32
    %c0_i32_1 = arith.constant 0 : i32
    return %c0_i32, %c0_i32_0 : i32, i32
  }
  func.func @transform_9(%arg0: i32, %arg1: i32) -> (i32, i32) {
    %c0_i32 = arith.constant 0 : i32
    %c0_i32_0 = arith.constant 0 : i32
    %c0_i32_1 = arith.constant 0 : i32
    return %c0_i32, %c0_i32_0 : i32, i32
  }
  func.func @transform_10(%arg0: i32, %arg1: i32) -> (i32, i32) {
    %c0_i32 = arith.constant 0 : i32
    %c0_i32_0 = arith.constant 0 : i32
    %c0_i32_1 = arith.constant 0 : i32
    return %c0_i32, %c0_i32_0 : i32, i32
  }
  func.func @transform_11(%arg0: i32, %arg1: i32) -> (i32, i32) {
    %c0_i32 = arith.constant 0 : i32
    %c0_i32_0 = arith.constant 0 : i32
    %c0_i32_1 = arith.constant 0 : i32
    return %c0_i32, %c0_i32_0 : i32, i32
  }
  func.func @transform_12(%arg0: i32, %arg1: i32) -> (i32, i32) {
    %c0_i32 = arith.constant 0 : i32
    %c0_i32_0 = arith.constant 0 : i32
    %c0_i32_1 = arith.constant 0 : i32
    return %c0_i32, %c0_i32_0 : i32, i32
  }
  func.func @transform_13(%arg0: i32, %arg1: i32) -> (i32, i32) {
    %c0_i32 = arith.constant 0 : i32
    %c0_i32_0 = arith.constant 0 : i32
    %c0_i32_1 = arith.constant 0 : i32
    return %c0_i32, %c0_i32_0 : i32, i32
  }
  func.func @transform_14(%arg0: i32, %arg1: i32) -> (i32, i32) {
    %c0_i32 = arith.constant 0 : i32
    %c0_i32_0 = arith.constant 0 : i32
    %c0_i32_1 = arith.constant 0 : i32
    return %c0_i32, %c0_i32_0 : i32, i32
  }
  func.func @transform_15(%arg0: i32, %arg1: i32) -> (i32, i32) {
    %c0_i32 = arith.constant 0 : i32
    %c0_i32_0 = arith.constant 0 : i32
    %c0_i32_1 = arith.constant 0 : i32
    return %c0_i32, %c0_i32_0 : i32, i32
  }
  func.func @transform_16(%arg0: i32, %arg1: i32) -> (i32, i32) {
    %c0_i32 = arith.constant 0 : i32
    %c0_i32_0 = arith.constant 0 : i32
    %c0_i32_1 = arith.constant 0 : i32
    return %c0_i32, %c0_i32_0 : i32, i32
  }
  func.func @transform_17(%arg0: i32, %arg1: i32) -> (i32, i32) {
    %c0_i32 = arith.constant 0 : i32
    %c0_i32_0 = arith.constant 0 : i32
    %c0_i32_1 = arith.constant 0 : i32
    return %c0_i32, %c0_i32_0 : i32, i32
  }
  func.func @transform_18(%arg0: i32, %arg1: i32) -> (i32, i32) {
    %c0_i32 = arith.constant 0 : i32
    %c0_i32_0 = arith.constant 0 : i32
    return %c0_i32, %arg1 : i32, i32
  }
  func.func @transform_19(%arg0: i32, %arg1: i32) -> (i32, i32) {
    %c0_i32 = arith.constant 0 : i32
    %c0_i32_0 = arith.constant 0 : i32
    return %c0_i32, %arg1 : i32, i32
  }
  func.func @transform_20(%arg0: i32, %arg1: i32) -> (i32, i32) {
    %c0_i32 = arith.constant 0 : i32
    %c0_i32_0 = arith.constant 0 : i32
    return %arg1, %c0_i32 : i32, i32
  }
  func.func @transform_21(%arg0: i32, %arg1: i32) -> (i32, i32) {
    %c0_i32 = arith.constant 0 : i32
    %c0_i32_0 = arith.constant 0 : i32
    %c0_i32_1 = arith.constant 0 : i32
    return %c0_i32, %c0_i32_0 : i32, i32
  }
  func.func @transform_22(%arg0: i32, %arg1: i32) -> (i32, i32, i32) {
    %c0_i32 = arith.constant 0 : i32
    %c0_i32_0 = arith.constant 0 : i32
    %c0_i32_1 = arith.constant 0 : i32
    return %arg0, %c0_i32, %c0_i32_0 : i32, i32, i32
  }
}

</mosaic_0001>

<bundles_post_ra>
// kernel: tpu_custom_call.1
= control target key start
LH: loop header
LB: loop body
LE: loop exit
PB: predicated region body
PF: predicated region fallthrough
CT: control target
= control target key end

     0   :  { %s3436_s0 = inlined_call_operand.vmem [shape: f32[2,8,32], index: 0, kind: input, shape index: {}]   ;;  %s3437_s1 = inlined_call_operand.vmem [shape: bf16[2,12,32], index: 1, kind: input, shape index: {}]   ;;  %s3438_s2 = inlined_call_operand.hbm [shape: f32[1,32], index: 2, kind: input, shape index: {}]   ;;  %s3439_s3 = inlined_call_operand.hbm [shape: f32[1,32], index: 3, kind: input, shape index: {}]   ;;  %s3440_s4 = inlined_call_operand.vmem [shape: bf16[32,96], index: 4, kind: input, shape index: {}]   ;;  %s3441_s5 = inlined_call_operand.hbm [shape: f32[1,96], index: 5, kind: input, shape index: {}]   ;;  %s3442_s6 = inlined_call_operand.vmem [shape: bf16[32,32], index: 6, kind: input, shape index: {}]   ;;  %s3443_s7 = inlined_call_operand.hbm [shape: f32[1,32], index: 7, kind: input, shape index: {}]   ;;  %s3444_s8 = inlined_call_operand.hbm [shape: f32[1,32], index: 8, kind: input, shape index: {}]   ;;  %s3445_s9 = inlined_call_operand.hbm [shape: f32[1,32], index: 9, kind: input, shape index: {}]   ;;  %s3446_s10 = inlined_call_operand.vmem [shape: bf16[32,32], index: 10, kind: input, shape index: {}]   ;;  %s3447_s11 = inlined_call_operand.hbm [shape: f32[1,32], index: 11, kind: input, shape index: {}]   ;;  %s3448_s12 = inlined_call_operand.vmem [shape: bf16[32,64], index: 12, kind: input, shape index: {}]   ;;  %s3449_s13 = inlined_call_operand.vmem [shape: f32[1,64], index: 13, kind: input, shape index: {}]   ;;  %s3450_s14 = inlined_call_operand.vmem [shape: bf16[32,32], index: 14, kind: input, shape index: {}]   ;;  %s3451_s15 = inlined_call_operand.vmem [shape: f32[1,32], index: 15, kind: input, shape index: {}]   ;;  %s3452_s16 = inlined_call_operand.vmem [shape: f32[1,32], index: 16, kind: input, shape index: {}]   ;;  %s3453_s17 = inlined_call_operand.vmem [shape: f32[1,32], index: 17, kind: input, shape index: {}]   ;;  %s3454_s18 = inlined_call_operand.vmem [shape: bf16[32,128], index: 18, kind: input, shape index: {}]   ;;  %s3455_s19 = inlined_call_operand.vmem [shape: f32[1,128], index: 19, kind: input, shape index: {}]   ;;  %s3456_s20 = inlined_call_operand.vmem [shape: bf16[128,32], index: 20, kind: input, shape index: {}]   ;;  %s3457_s21 = inlined_call_operand.vmem [shape: f32[1,32], index: 21, kind: input, shape index: {}]   ;;  %s3458_s22 = inlined_call_operand.hbm [shape: f32[2,8,32], index: 22, kind: output, shape index: {}]  }
   0x1   :  { %3475 = sst [smem:[#allocation30_spill]] %s3436_s0 }
   0x2   :  { %3476 = sst [smem:[#allocation31_spill]] %s3437_s1 }
   0x3   :  { %3477 = sst [smem:[#allocation32_spill]] %s3438_s2 }
   0x4   :  { %3478 = sst [smem:[#allocation33_spill]] %s3439_s3 }
   0x5   :  { %3479 = sst [smem:[#allocation34_spill]] %s3440_s4 }
   0x6   :  { %3480 = sst [smem:[#allocation35_spill]] %s3441_s5 }
   0x7   :  { %3481 = sst [smem:[#allocation36_spill]] %s3442_s6 }
   0x8   :  { %3482 = sst [smem:[#allocation37_spill]] %s3443_s7 }
   0x9   :  { %3483 = sst [smem:[#allocation38_spill]] %s3458_s22 }
   0xa   :  { %27 = vsyncpa [#allocation5], 0 }
   0xb   :  { %28 = vsyncpa [#allocation8], 0 }
   0xc   :  { %29 = vsyncpa [#allocation11], 0 }
   0xd   :  { %30 = vsyncpa [#allocation14], 0 }
   0xe   :  { %31 = vsyncpa [#allocation6], 0 }
   0xf   :  { %33 = vsyncpa [#allocation6 + $0x1], 0  ;;  %s3013_s3 = smov 0   ;;  %s3015_s28 = smov 0  }
  0x10   :  { %s3017_s29 = smov 0   ;;  %s3019_s30 = smov 0  }
  0x11   :  { %s3021_s4 = smov 0   ;;  %s3023_s0 = smov 0  }
  0x12 LB: > { %3484 = sst [smem:[#allocation22_spill]] %s2859_s3  ;;  %s2185_s23 = sadd.s32 4294967295, %s2879_s0   ;;  %s2879_s0 = sphi %s3023_s0, %s39_s0   ;;  %s2875_s4 = sphi %s3021_s4, %s3518_s4   ;;  %s2871_s30 = sphi %s3019_s30, %s3517_s30   ;;  %s2867_s29 = sphi %s3017_s29, %s3516_s29   ;;  %s2863_s28 = sphi %s3015_s28, %s3520_s28   ;;  %s2859_s3 = sphi %s3013_s3, %s3519_s3  }
  0x13   : > { %3485 = sst [smem:[#allocation23_spill]] %s2867_s29  ;;  %s2186_s1 = sadd.s32 4294967294, %s2879_s0  }
  0x14   : > { %3486 = sst [smem:[#allocation24_spill]] %s2875_s4  ;;  %s51_s5 = sadd.s32 1, %s2875_s4 }
  0x15   : > { %3487 = sst [smem:[#allocation25_spill]] %s2879_s0  ;;  %s545_s24 = sadd.s32 1, %s2867_s29 }
  0x16   : > { %p53_p0 = scmp.ge.s32.totalorder %s51_s5, 2  ;;  %p555_p1 = scmp.ne.s32.totalorder %s2867_s29, %s2863_s28 }
  0x17   : > { %p556_p2 = scmp.eq.s32.totalorder %s2185_s23, 1  ;;  %p561_p3 = scmp.ne.s32.totalorder %s2863_s28, %s2859_s3 }
  0x18   : > { %s3522_s5 = smov (%p53_p0, %s51_s5), 0  ;;  %p562_p5 = scmp.eq.s32.totalorder %s2186_s1, 1 }
  0x19   : > { %3488 = sst [smem:[#allocation26_spill]] %s3522_s5  ;;  %p3053_p4 = por %p556_p2, %p555_p1 }
  0x1a   : > { %s542_s25 = ssub.s32 %s2875_s4, %s3522_s5  ;;  %p2187_p6 = scmp.ge.s32.totalorder %s2879_s0, 1 }
  0x1b   : > { %s3489_s6 = scalar_select %p3053_p4, 1, 0 }
  0x1c   : > { %p543_p7 = scmp.eq.s32.totalorder %s542_s25, 0  ;;  %p3060_p8 = por %p562_p5, %p561_p3 }
  0x1d   : > { %3490 = sst [smem:[#allocation27_spill]] %s3489_s6  ;;  %p569_p9 = scmp.lt.s32.totalorder %s2879_s0, 3 }
  0x1e   : > { %s3491_s26 = scalar_select %p3060_p8, 1, 0 }
  0x1f   : > { %s3066_s2 = scalar_select %p543_p7, %s2867_s29, %s545_s24  }
  0x20   : > { %3492 = sst [smem:[#allocation28_spill]] %s3491_s26  ;;  %p3068_p10 = pnand %p2187_p6, %p569_p9 }
  0x21   : > { %3493 = sst [smem:[#allocation29_spill]] %s3066_s2  ;;  %p3072_p11 = scmp.eq.s32.totalorder %s2185_s23, 0 }
  0x22   : > { %s3494_s27 = scalar_select %p3068_p10, 1, 0 }
  0x23   : > { %s3495_s3 = scalar_select %p3072_p11, 1, 0 }
  0x24   : > { %p2453_p12 = pneg %p3068_p10  ;;  %s2881_s1 = smov [#allocation7]  }
  0x25   : > { %s601_s25 = sshll.u32 %s2881_s1, 4  ;;  %s2882_s5 = smov [#allocation10]   ;;  %s602_s25 = int_to_ptr.vmem [resolvable:$true] %s601_s25 }
  0x26   : > { %s629_s4 = sshll.u32 %s2882_s5, 4  ;;  %p3080_p13 = pnand %p3072_p11, %p2453_p12  ;;  %s630_s4 = int_to_ptr.vmem [resolvable:$true] %s629_s4 }
  0x27   : > { %s2883_s2 = smov [#allocation13]   ;;  %s2616_s26 = scalar_lea.vmem %s602_s25, 16 }
  0x28   : > { %s651_s23 = sshll.u32 %s2883_s2, 4  ;;  %p3086_p0 = pneg %p3080_p13  ;;  %s652_s23 = int_to_ptr.vmem [resolvable:$true] %s651_s23 }
  0x29   : > { %p2617_p1 = scmp.ne.s32.totalorder %s602_s25, %s2616_s26  ;;  %s2623_s5 = scalar_lea.vmem %s602_s25, 32 }
  0x2a   : > { %p2624_p5 = scmp.lt.s32.totalorder %s602_s25, %s602_s25  ;;  %p2625_p6 = scmp.lt.s32.totalorder %s2623_s5, %s2616_s26 }
  0x2b   : > { %p2619_p2 = pnand %p2617_p1, %p3086_p0 }
  0x2c   : > { %p2626_p7 = por %p2625_p6, %p2624_p5 }
  0x2d   : > { %p2620_p3 = pneg %p2619_p2 }
  0x2f   : > { %p2627_p9 = pnand %p2626_p7, %p2620_p3 }
  0x31   : > { %2630 = shalt.err (!%p2627_p9)
}
  0x32   : > { %s3498_s0 = sld [smem:[#allocation33_spill]]  ;;  %s2642_s22 = scalar_lea.vmem %s630_s4, 16 }
  0x33   : > { %p2643_p12 = scmp.ne.s32.totalorder %s630_s4, %s2642_s22  ;;  %s2649_s6 = scalar_lea.vmem %s630_s4, 32 }
  0x34   : > { %p2650_p1 = scmp.lt.s32.totalorder %s630_s4, %s630_s4  ;;  %p2651_p2 = scmp.lt.s32.totalorder %s2649_s6, %s2642_s22 }
  0x35   : > { %p2645_p8 = pnand %p2643_p12, %p3086_p0 }
  0x36   : > { %p2652_p11 = por %p2651_p2, %p2650_p1 }
  0x37   : > { %p2646_p4 = pneg %p2645_p8 }
  0x38   : > { %2459 = dma.hbm_to_vmem [thread:$0]  (!%p3080_p13), %s3498_s0, 16, %s602_s25, [#allocation8]  }
  0x39   : > { %p2653_p10 = pnand %p2652_p11, %p2646_p4 }
  0x3b   : > { %2656 = shalt.err (!%p2653_p10)
}
  0x3c   : > { %s3499_s7 = sld [smem:[#allocation37_spill]]  ;;  %s2668_s0 = scalar_lea.vmem %s652_s23, 16 }
  0x3d   : > { %p2669_p3 = scmp.ne.s32.totalorder %s652_s23, %s2668_s0  ;;  %s2675_s25 = scalar_lea.vmem %s652_s23, 32 }
  0x3e   : > { %p2676_p8 = scmp.lt.s32.totalorder %s652_s23, %s652_s23  ;;  %p2677_p7 = scmp.lt.s32.totalorder %s2675_s25, %s2668_s0 }
  0x3f   : > { %p2671_p5 = pnand %p2669_p3, %p3086_p0 }
  0x40   : > { %p2678_p9 = por %p2677_p7, %p2676_p8 }
  0x41   : > { %p2672_p6 = pneg %p2671_p5 }
  0x42   : > { %2465 = dma.hbm_to_vmem [thread:$0]  (!%p3080_p13), %s3499_s7, 16, %s630_s4, [#allocation11]  }
  0x43   : > { %p2679_p12 = pnand %p2678_p9, %p2672_p6 }
  0x45   : > { %2682 = shalt.err (!%p2679_p12)
}
  0x46   : > { %2471 = dma.hbm_to_vmem [thread:$0]  (!%p3080_p13), %s3445_s9, 16, %s652_s23, [#allocation14]  }
  0x47   : > { %s2884_s4 = smov [#allocation4]   ;;  %s2885_s1 = smov [#allocation9]  }
  0x48   : > { %s590_s2 = sshll.u32 %s2884_s4, 4  ;;  %s615_s26 = sshll.u32 %s2885_s1, 4  ;;  %s591_s2 = int_to_ptr.vmem [resolvable:$true] %s590_s2  ;;  %s616_s26 = int_to_ptr.vmem [resolvable:$true] %s615_s26 }
  0x49   : > { %s2694_s5 = scalar_lea.vmem %s591_s2, 16  ;;  %s2701_s0 = scalar_lea.vmem %s591_s2, 32 }
  0x4a   : > { %p2695_p4 = scmp.ne.s32.totalorder %s591_s2, %s2694_s5  ;;  %p2702_p1 = scmp.lt.s32.totalorder %s591_s2, %s591_s2 }
  0x4b   : > { %p2703_p2 = scmp.lt.s32.totalorder %s2701_s0, %s2694_s5 }
  0x4c   : > { %p2697_p10 = pnand %p2695_p4, %p3086_p0 }
  0x4d   : > { %p2704_p3 = por %p2703_p2, %p2702_p1 }
  0x4e   : > { %p2698_p11 = pneg %p2697_p10 }
  0x50   : > { %p2705_p5 = pnand %p2704_p3, %p2698_p11 }
  0x52   : > { %2708 = shalt.err (!%p2705_p5)
}
  0x53   : > { %s3500_s22 = sld [smem:[#allocation32_spill]]  ;;  %s2720_s6 = scalar_lea.vmem %s616_s26, 16 }
  0x54   : > { %p2721_p6 = scmp.ne.s32.totalorder %s616_s26, %s2720_s6  ;;  %s2727_s4 = scalar_lea.vmem %s616_s26, 32 }
  0x55   : > { %p2728_p9 = scmp.lt.s32.totalorder %s616_s26, %s616_s26  ;;  %p2729_p12 = scmp.lt.s32.totalorder %s2727_s4, %s2720_s6 }
  0x56   : > { %p2723_p8 = pnand %p2721_p6, %p3086_p0 }
  0x57   : > { %p2730_p4 = por %p2729_p12, %p2728_p9 }
  0x58   : > { %p2724_p7 = pneg %p2723_p8 }
  0x59   : > { %2456 = dma.hbm_to_vmem [thread:$0]  (!%p3080_p13), %s3500_s22, 16, %s591_s2, [#allocation5]  }
  0x5a   : > { %p2731_p10 = pnand %p2730_p4, %p2724_p7 }
  0x5c   : > { %2734 = shalt.err (!%p2731_p10)
}
  0x5d   : > { %s3501_s0 = sld [smem:[#allocation35_spill]]  ;;  %s2886_s23 = smov [#allocation12]  }
  0x5e   : > { %s640_s2 = sshll.u32 %s2886_s23, 4  ;;  %s2887_s25 = smov [#allocation15]   ;;  %s641_s2 = int_to_ptr.vmem [resolvable:$true] %s640_s2 }
  0x5f   : > { %s665_s22 = sshll.u32 %s2887_s25, 4  ;;  %s2746_s7 = scalar_lea.vmem %s641_s2, 16  ;;  %s666_s22 = int_to_ptr.vmem [resolvable:$true] %s665_s22 }
  0x60   : > { %p2747_p11 = scmp.ne.s32.totalorder %s641_s2, %s2746_s7  ;;  %s2753_s6 = scalar_lea.vmem %s641_s2, 32 }
  0x61   : > { %p2754_p3 = scmp.lt.s32.totalorder %s641_s2, %s641_s2  ;;  %p2755_p5 = scmp.lt.s32.totalorder %s2753_s6, %s2746_s7 }
  0x62   : > { %p2749_p1 = pnand %p2747_p11, %p3086_p0 }
  0x63   : > { %2462 = dma.hbm_to_vmem [thread:$0]  (!%p3080_p13), %s3501_s0, 16, %s616_s26, [#allocation8]  }
  0x64   : > { %p2750_p2 = pneg %p2749_p1  ;;  %p2756_p6 = por %p2755_p5, %p2754_p3 }
  0x66   : > { %p2757_p8 = pnand %p2756_p6, %p2750_p2 }
  0x68   : > { %2760 = shalt.err (!%p2757_p8)
}
  0x69   : > { %2468 = dma.hbm_to_vmem [thread:$0]  (!%p3080_p13), %s3444_s8, 16, %s641_s2, [#allocation11]  }
  0x6a   : > { %s2772_s1 = scalar_lea.vmem %s666_s22, 16  ;;  %s2779_s5 = scalar_lea.vmem %s666_s22, 32 }
  0x6b   : > { %p2773_p7 = scmp.ne.s32.totalorder %s666_s22, %s2772_s1  ;;  %p2780_p4 = scmp.lt.s32.totalorder %s666_s22, %s666_s22 }
  0x6c   : > { %p2781_p10 = scmp.lt.s32.totalorder %s2779_s5, %s2772_s1 }
  0x6d   : > { %p2775_p9 = pnand %p2773_p7, %p3086_p0 }
  0x6e   : > { %p2782_p11 = por %p2781_p10, %p2780_p4 }
  0x6f   : > { %p2776_p12 = pneg %p2775_p9 }
  0x71   : > { %p2783_p1 = pnand %p2782_p11, %p2776_p12 }
  0x73   : > { %2786 = shalt.err (!%p2783_p1)
}
  0x74   : > { %2474 = dma.hbm_to_vmem [thread:$0]  (!%p3080_p13), %s3447_s11, 16, %s666_s22, [#allocation14]  }
  0x75   : > { %p3502_p2 = scmp.ne.s32.totalorder %s3494_s27, 0 }
  0x76   : > { %p3503_p3 = scmp.ne.s32.totalorder (!%p3502_p2), %s3495_s3, 0 }
  0x77   : > { %728 = sbr.rel (%p3502_p2) target bundleno = 4734 (0x127e), region = 108 }
  0x7c   : > { %2838 = dma.done.wait (%p3503_p3), [#allocation5], 16  }
  0x7d   : > { %2840 = vsyncadd (%p3503_p3), [#allocation5], 4294967280 }
  0x7e   : > { %2842 = dma.done.wait (%p3503_p3), [#allocation8], 32  }
  0x7f   : > { %2844 = vsyncadd (%p3503_p3), [#allocation8], 4294967264 }
  0x80   : > { %2846 = dma.done.wait (%p3503_p3), [#allocation11], 32  }
  0x81   : > { %2848 = vsyncadd (%p3503_p3), [#allocation11], 4294967264 }
  0x82   : > { %2850 = dma.done.wait (%p3503_p3), [#allocation14], 32  }
  0x83   : > { %2852 = vsyncadd (%p3503_p3), [#allocation14], 4294967264  ;;  %p830_p13 = scmp.lt.s32.totalorder %s2871_s30, 1  ;;  %s3504_s2 = sld [smem:[#allocation30_spill]]  ;;  %vm860_vm0 = vcmask 261120   ;;  %v2888_v8 = vmov 0.0   ;;  %v957_v31 = vlaneseq }
  0x84   : > { %s3505_s26 = sld [smem:[#allocation31_spill]]  ;;  %2307 = vmatprep.subr.bf16.mxu1 %v2888_v8  ;;  %vm2889_vm1 = vmmov 0   ;;  %2333 = vmatprep.subr.bf16.mxu0 %v2888_v8  ;;  %v2211_v14 = vld [vmem:[#allocation4] ss:$0 sm:$0xff]  ;;  %v2212_v16 = vld [vmem:[#allocation7] ss:$0 sm:$0xff] }
  0x85   : > { %s831_s29 = scalar_select %p830_p13, %s2871_s30, 1  ;;  %2311 = vmatprep.mubr.msk.bf16.mxu1 %vm2889_vm1, %v2888_v8  ;;  %2335 = vmatprep.mubr.msk.bf16.mxu0 %vm2889_vm1, %v2888_v8  ;;  %v2213_v20 = vld [vmem:[#allocation9] ss:$0 sm:$0xff]  ;;  %vm966_vm2 = vcmask 130048   ;;  %vm1033_vm3 = vcmask 1043456   ;;  %v958_v32 = vshrl.u32 %v957_v31, 7 }
  0x86   : > { %s3506_s5 = sld [smem:[#allocation34_spill]]  ;;  %v960_v33 = vand.u32 127, %v957_v31  ;;  %vm1015_vm5 = vcmask 64512   ;;  %s2892_s24 = smov 80   ;;  %vm1194_vm6 = vcmask 261248   ;;  %vm1485_vm7 = vcmask 97280  }
  0x87   : > { %s2208_s27 = sshll.u32 %s831_s29, 3  ;;  %s2890_s29 = smov 64   ;;  %vm1504_vm8 = vcmask 1045504  }
  0x88   : > { %vm961_vm4 = vcmp.gt.s32.totalorder %v960_v33, %v958_v32  ;;  %s2893_s23 = smov 112   ;;  %s3507_s6 = sld [smem:[#allocation36_spill]] }
  0x89   : > { %s833_s25 = scalar_lea.vmem %s3504_s2, %s2208_s27  ;;  %v962_v35 = vsel %vm961_vm4, -1e+09, %v2888_v8  ;;  %s2894_s2 = smov 48  }
  0x8a   : > { %s3165_s4 = scalar_lea.vmem %s3505_s26, %s2208_s27  ;;  %v3167_v0 = vld [vmem:[%s833_s25] sm:$0xff]  ;;  %s2891_s27 = smov 96  }
  0x8b   : > { %v861_v1 = vsel %vm860_vm0, %v3167_v0, 0.0  ;;  %s2895_s1 = smov 16   ;;  %s2260_s0 = sshll.u32 %s2871_s30, 7 }
  0x8c   : > { %862 = vadd.xlane.f32.xlu0 %v861_v1  ;;  %v2559_v7 = vld [vmem:[%s3506_s5 + $0x8] sm:$0xff]   ;;  %v2560_v9 = vld [vmem:[%s3506_s5] sm:$0xff]   ;;  %s3509_s22 = sld [smem:[#allocation38_spill]]  ;;  %s2897_s7 = smov [#allocation16]  }
  0x8d   : > { %2308 = vmatpush3.bf16.msra.mxu1 %v2559_v7 }
  0x8e   : > { %2309 = vmatprep.subr.bf16.mxu1 %v2888_v8 }
  0x91   : > { %2310 = vmatpush3.bf16.msra.mxu1 %v2560_v9 }
  0x92   : > { %2315 = vmatprep.subr.bf16.mxu1 %v2888_v8  ;;  %s3386_s26 = scalar_lea.hbm %s3509_s22, %s2260_s0 }
 0x115   : > { %v863_v2 = vpop.xlane.xlu0 %862 }
 0x116   : > { %v865_v3 = vmul.f32 0.03125, %v863_v2 }
 0x118   : > { %v866_v4 = vsub.f32 %v3167_v0, %v865_v3 }
 0x11a   : > { %v867_v5 = vmul.f32 %v866_v4, %v866_v4 }
 0x11c   : > { %v868_v6 = vsel %vm860_vm0, %v867_v5, 0.0 }
 0x11d   : > { %869 = vadd.xlane.f32.xlu0 %v868_v6 }
 0x1a6   : > { %v870_v10 = vpop.xlane.xlu0 %869 }
 0x1a7   : > { %v871_v11 = vmul.f32 0.03125, %v870_v10 }
 0x1a9   : > { %v872_v12 = vadd.f32 1e-05, %v871_v11 }
 0x1ab   : > { %2579 = vrsqrt.f32 %v872_v12 }
 0x1b8   : > { %v2580_v13 = vpop.eup %2579 }
 0x1b9   : > { %v874_v15 = vmul.f32 %v2580_v13, %v866_v4 }
 0x1bb   : > { %v881_v17 = vmul.f32 %v2211_v14, %v874_v15  ;;  %v2561_v14 = vld [vmem:[%s3507_s6 + $0x8] sm:$0xff]   ;;  %v2562_v15 = vld [vmem:[%s3507_s6] sm:$0xff]  }
 0x1bd   : > { %v888_v18 = vadd.f32 %v2212_v16, %v881_v17 }
 0x1bf   : > { %v889_v19 = vpack.c.bf16 %v888_v18, %v888_v18 }
 0x1c1   : > { %2312 = vmatmul.mubr.msk.bf16.vlgmr.msra.gmra.mxu1 %vm860_vm0, %v889_v19 }
 0x1c2   : > { %2317 = vmatprep.mubr.msk.bf16.mxu1 %vm2889_vm1, %v2888_v8 }
 0x281   : > { %v950_v21 = vpop.f32.mrf.mxu1 }
 0x282   : > { %v951_v22 = vadd.f32 %v2213_v20, %v950_v21 }
 0x283   : > { %v2313_v23 = vpop.f32.mrf.mxu1 }
 0x284   : > { %v3190_v24 = vpack.c.bf16 %v951_v22, %v951_v22 }
 0x285   : > { %v953_v25 = vpop.f32.mrf.mxu1 }
 0x286   : > { %1028 = vrot.lane.b32.xlu0 %v3190_v24, %s2890_s29  ;;  %964 = vrot.lane.b32.xlu1 %v3190_v24, %s2891_s27  ;;  %s827_s29 = sand.u32 1, %s2863_s28  }
 0x287   : > { %v2314_v26 = vpop.f32.mrf.mxu1  ;;  %s1979_s30 = scalar_lea.sflag [#allocation6], %s827_s29 }
 0x2f8   : > { %v965_v27 = vpop.permute.xlu1 %964  ;;  %v1029_v29 = vpop.permute.xlu0 %1028 }
 0x2f9   : > { %v971_v28 = vsel %vm966_vm2, %v965_v27, 0  ;;  %v1035_v30 = vsel %vm1033_vm3, %v1029_v29, 0 }
 0x2fa   : > { %2316 = vmatpush3.bf16.xpose.msra.mxu1 %v971_v28 }
 0x2fb   : > { %2321 = vmatprep.subr.bf16.mxu1 %v2888_v8 }
 0x301   : > { %2318 = vmatmul.mubr.msk.bf16.vlgmr.msra.gmra.mxu1 %vm966_vm2, %v3190_v24 }
 0x302   : > { %2322 = vmatpush3.bf16.msra.mxu1 %v1035_v30  ;;  %2323 = vmatprep.mubr.msk.bf16.mxu1 %vm2889_vm1, %v2888_v8 }
 0x303   : > { %2327 = vmatprep.subr.bf16.mxu1 %v2888_v8 }
 0x3c1   : > { %v1007_v34 = vpop.f32.mrf.mxu1 }
 0x3c2   : > { %v1013_v36 = vmul.f32 0.25, %v1007_v34 }
 0x3c3   : > { %v2319_v37 = vpop.f32.mrf.mxu1 }
 0x3c4   : > { %v1014_v38 = vadd.f32 %v1013_v36, %v962_v35  ;;  %v2564_v36 = vld [vmem:[%s3448_s12] sm:$0xff]  }
 0x3c5   : > { %v1010_v39 = vpop.f32.mrf.mxu1  ;;  %v2558_v37 = vld [vmem:[%s3165_s4] sm:$0x3f]  }
 0x3c6   : > { %v1016_v40 = vsel %vm1015_vm5, %v1014_v38, -inf  ;;  %v2566_v39 = vld [vmem:[%s3446_s10] sm:$0xff]  }
 0x3c7   : > { %1017 = vmax.xlane.f32.xlu1 %v1016_v40  ;;  %v2320_v41 = vpop.f32.mrf.mxu1 }
 0x450   : > { %v1018_v42 = vpop.xlane.xlu1 %1017 }
 0x451   : > { %v1019_v43 = vsub.f32 %v1014_v38, %v1018_v42  ;;  %v2565_v38 = vld [vmem:[%s3446_s10 + $0x8] sm:$0xff]  }
 0x453   : > { %v1020_v44 = vmul.f32 1.442695, %v1019_v43 }
 0x455   : > { %2581 = vpow2.f32 %v1020_v44  ;;  %v2225_v44 = vld [vmem:[#allocation12] ss:$0 sm:$0xff] }
 0x462   : > { %v2582_v45 = vpop.eup %2581 }
 0x463   : > { %v1022_v46 = vsel %vm1015_vm5, %v2582_v45, 0.0 }
 0x464   : > { %1023 = vadd.xlane.f32.xlu0 %v1022_v46  ;;  %v2226_v46 = vld [vmem:[#allocation13] ss:$0 sm:$0xff] }
 0x47a   : > { %1080 = vrot.lane.b32.xlu0 %v3190_v24, %s2892_s24 }
 0x47e   : > { %1078 = vrot.lane.b32.xlu0 %v3190_v24, %s2893_s23 }
 0x4ed   : > { %v1024_v47 = vpop.xlane.xlu0 %1023 }
 0x4ee   : > { %2583 = vrcp.f32 %v1024_v47 }
 0x4f1   : > { %v1081_v50 = vpop.permute.xlu0 %1080 }
 0x4f2   : > { %v1086_v52 = vsel %vm966_vm2, %v1081_v50, 0  ;;  %v2231_v50 = vld [vmem:[%s3449_s13] ss:$0 sm:$0xff] }
 0x4f5   : > { %v1079_v53 = vpop.permute.xlu0 %1078 }
 0x4fb   : > { %v2584_v48 = vpop.eup %2583 }
 0x4fc   : > { %v1026_v49 = vmul.f32 %v2584_v48, %v2582_v45 }
 0x4fe   : > { %v1027_v51 = vpack.c.bf16 %v1026_v49, %v1026_v49 }
 0x500   : > { %2324 = vmatmul.mubr.msk.bf16.vlgmr.msra.gmra.mxu1 %vm1015_vm5, %v1027_v51 }
 0x501   : > { %2328 = vmatpush3.bf16.xpose.msra.mxu1 %v1086_v52  ;;  %2329 = vmatprep.mubr.msk.bf16.mxu1 %vm2889_vm1, %v2888_v8 }
 0x502   : > { %2339 = vmatprep.subr.bf16.mxu1 %v2888_v8 }
 0x508   : > { %2330 = vmatmul.mubr.msk.bf16.vlgmr.msra.gmra.mxu1 %vm966_vm2, %v1079_v53 }
 0x509   : > { %2343 = vmatprep.mubr.msk.bf16.mxu1 %vm2889_vm1, %v2888_v8  ;;  %2340 = vmatpush3.bf16.msra.mxu1 %v2561_v14 }
 0x50a   : > { %2341 = vmatprep.subr.bf16.mxu1 %v2888_v8 }
 0x50d   : > { %2342 = vmatpush3.bf16.msra.mxu1 %v2562_v15 }
 0x50e   : > { %2355 = vmatprep.subr.bf16.mxu1 %v2888_v8 }
 0x5c0   : > { %v1071_v54 = vpop.f32.mrf.mxu1 }
 0x5c1   : > { %1077 = vst.msk [vmem:[#allocation3] sm:$0xff] %vm966_vm2, %v1071_v54 }
 0x5c2   : > { %v2325_v55 = vpop.f32.mrf.mxu1 }
 0x5c4   : > { %v1074_v56 = vpop.f32.mrf.mxu1 }
 0x5c6   : > { %v2326_v57 = vpop.f32.mrf.mxu1 }
 0x5c8   : > { %v1122_v58 = vpop.f32.mrf.mxu1 }
 0x5c9   : > { %v1128_v59 = vmul.f32 0.25, %v1122_v58 }
 0x5ca   : > { %v2331_v60 = vpop.f32.mrf.mxu1 }
 0x5cb   : > { %v1129_v61 = vadd.f32 %v1128_v59, %v962_v35  ;;  %v2227_v59 = vld [vmem:[#allocation15] ss:$0 sm:$0xff] }
 0x5cc   : > { %v1125_v62 = vpop.f32.mrf.mxu1 }
 0x5cd   : > { %v1130_v63 = vsel %vm1015_vm5, %v1129_v61, -inf }
 0x5ce   : > { %1131 = vmax.xlane.f32.xlu1 %v1130_v63  ;;  %v2332_v1 = vpop.f32.mrf.mxu1 }
 0x5df   : > { %1142 = vrot.lane.b32.xlu1 %v3190_v24, %s2894_s2  ;;  %v2224_v24 = vld [vmem:[#allocation10] ss:$0 sm:$0xff] }
 0x657   : > { %v1132_v2 = vpop.xlane.xlu1 %1131 }
 0x658   : > { %v1133_v3 = vsub.f32 %v1129_v61, %v1132_v2 }
 0x65a   : > { %v1134_v4 = vmul.f32 1.442695, %v1133_v3 }
 0x65b   : > { %v1143_v5 = vpop.permute.xlu1 %1142 }
 0x65c   : > { %2585 = vpow2.f32 %v1134_v4  ;;  %v1148_v6 = vsel %vm1033_vm3, %v1143_v5, 0 }
 0x65d   : > { %2334 = vmatpush3.bf16.msra.mxu0 %v1148_v6 }
 0x65e   : > { %2347 = vmatprep.subr.bf16.mxu0 %v2888_v8 }
 0x669   : > { %v2586_v7 = vpop.eup %2585 }
 0x66a   : > { %v1136_v9 = vsel %vm1015_vm5, %v2586_v7, 0.0 }
 0x66b   : > { %1137 = vadd.xlane.f32.xlu0 %v1136_v9 }
 0x6f4   : > { %v1138_v10 = vpop.xlane.xlu0 %1137 }
 0x6f5   : > { %2587 = vrcp.f32 %v1138_v10 }
 0x702   : > { %v2588_v11 = vpop.eup %2587 }
 0x703   : > { %v1140_v12 = vmul.f32 %v2588_v11, %v2586_v7 }
 0x705   : > { %v1141_v13 = vpack.c.bf16 %v1140_v12, %v1140_v12 }
 0x707   : > { %2336 = vmatmul.mubr.msk.bf16.vlgmr.msra.gmra.mxu0 %vm1015_vm5, %v1141_v13 }
 0x708   : > { %2351 = vmatprep.mubr.msk.bf16.mxu0 %vm2889_vm1, %v2888_v8  ;;  %2348 = vmatpush3.bf16.msra.mxu0 %v2565_v38 }
 0x709   : > { %2349 = vmatprep.subr.bf16.mxu0 %v2888_v8 }
 0x70c   : > { %2350 = vmatpush3.bf16.msra.mxu0 %v2566_v39 }
 0x70d   : > { %2363 = vmatprep.subr.bf16.mxu0 %v2888_v8 }
 0x7c7   : > { %v1184_v16 = vpop.f32.mrf.mxu0 }
 0x7c8   : > { %1191 = vrot.lane.b32.xlu1 %v1184_v16, %s2895_s1 }
 0x7c9   : > { %v2337_v17 = vpop.f32.mrf.mxu0 }
 0x7cb   : > { %v1187_v18 = vpop.f32.mrf.mxu0 }
 0x7cd   : > { %v2338_v19 = vpop.f32.mrf.mxu0 }
 0x83a   : > { %v1192_v20 = vpop.permute.xlu1 %1191 }
 0x83b   : > { %1195 = vst.msk [vmem:[#allocation3] sm:$0xff] %vm1194_vm6, %v1192_v20 }
 0x842   : > { %v1196_v21 = vld [vmem:[#allocation3] sm:$0xff] }
 0x843   : > { %v1197_v22 = vpack.c.bf16 %v1196_v21, %v1196_v21 }
 0x845   : > { %2344 = vmatmul.mubr.msk.bf16.vlgmr.msra.gmra.mxu1 %vm860_vm0, %v1197_v22 }
 0x846   : > { %2359 = vmatprep.mubr.msk.bf16.mxu1 %vm2889_vm1, %v2888_v8 }
 0x905   : > { %v1251_v23 = vpop.f32.mrf.mxu1 }
 0x906   : > { %v1257_v25 = vadd.f32 %v1251_v23, %v3167_v0  ;;  %v2563_v0 = vld [vmem:[%s3448_s12 + $0x8] sm:$0xff]  }
 0x907   : > { %v2345_v26 = vpop.f32.mrf.mxu1  ;;  %2356 = vmatpush3.bf16.msra.mxu1 %v2563_v0 }
 0x908   : > { %v3241_v27 = vadd.f32 %v2224_v24, %v1257_v25  ;;  %2357 = vmatprep.subr.bf16.mxu1 %v2888_v8 }
 0x909   : > { %v1254_v28 = vpop.f32.mrf.mxu1 }
 0x90a   : > { %v1268_v29 = vsel %vm860_vm0, %v3241_v27, 0.0 }
 0x90b   : > { %1269 = vadd.xlane.f32.xlu1 %v1268_v29  ;;  %v2346_v30 = vpop.f32.mrf.mxu1  ;;  %2358 = vmatpush3.bf16.msra.mxu1 %v2564_v36 }
 0x90c   : > { %2369 = vmatprep.subr.bf16.mxu1 %v2888_v8 }
 0x90e   : > { %2360 = vmatmul.mubr.msk.bf16.vlgmr.msra.gmra.mxu1 %vm860_vm0, %v2558_v37 }
 0x90f   : > { %2371 = vmatprep.mubr.msk.bf16.mxu1 %vm2889_vm1, %v2888_v8 }
 0x994   : > { %v1270_v31 = vpop.xlane.xlu1 %1269 }
 0x995   : > { %v1271_v32 = vmul.f32 0.03125, %v1270_v31 }
 0x997   : > { %v1272_v33 = vsub.f32 %v3241_v27, %v1271_v32 }
 0x999   : > { %v1273_v34 = vmul.f32 %v1272_v33, %v1272_v33 }
 0x99b   : > { %v1274_v35 = vsel %vm860_vm0, %v1273_v34, 0.0 }
 0x99c   : > { %1275 = vadd.xlane.f32.xlu0 %v1274_v35 }
 0x9ce   : > { %v1430_v51 = vpop.f32.mrf.mxu1 }
 0x9cf   : > { %v1431_v53 = vadd.f32 %v2231_v50, %v1430_v51 }
 0x9d0   : > { %v2361_v52 = vpop.f32.mrf.mxu1 }
 0x9d2   : > { %v1433_v54 = vpop.f32.mrf.mxu1 }
 0x9d3   : > { %v1434_v55 = vadd.f32 %v2231_v50, %v1433_v54 }
 0x9d4   : > { %v2362_v56 = vpop.f32.mrf.mxu1 }
 0x9d5   : > { %v1437_v57 = vpack.c.bf16 %v1434_v55, %v1431_v53  ;;  %v2243_v55 = vld [vmem:[%s3451_s15] ss:$0 sm:$0xff] }
 0x9d7   : > { %1552 = vrot.lane.b32.xlu0 %v1437_v57, %s2893_s23  ;;  %v1442_v58 = vsel %vm966_vm2, %v1437_v57, 0 }
 0xa25   : > { %v1276_v40 = vpop.xlane.xlu0 %1275 }
 0xa26   : > { %v1277_v41 = vmul.f32 0.03125, %v1276_v40 }
 0xa28   : > { %v1278_v42 = vadd.f32 1e-05, %v1277_v41 }
 0xa2a   : > { %2589 = vrsqrt.f32 %v1278_v42 }
 0xa37   : > { %v2590_v43 = vpop.eup %2589 }
 0xa38   : > { %v1280_v45 = vmul.f32 %v2590_v43, %v1272_v33 }
 0xa3a   : > { %v1287_v47 = vmul.f32 %v2225_v44, %v1280_v45  ;;  %v2567_v45 = vld [vmem:[%s3450_s14 + $0x8] sm:$0xff]  }
 0xa3c   : > { %v1294_v48 = vadd.f32 %v2226_v46, %v1287_v47  ;;  %v2568_v46 = vld [vmem:[%s3450_s14] sm:$0xff]  }
 0xa3e   : > { %v1295_v49 = vpack.c.bf16 %v1294_v48, %v1294_v48 }
 0xa40   : > { %2352 = vmatmul.mubr.msk.bf16.vlgmr.msra.gmra.mxu0 %vm860_vm0, %v1295_v49 }
 0xa41   : > { %2365 = vmatprep.mubr.msk.bf16.mxu0 %vm2889_vm1, %v2888_v8  ;;  %2364 = vmatpush3.bf16.xpose.msra.mxu0 %v1442_v58 }
 0xa42   : > { %2375 = vmatprep.subr.bf16.mxu0 %v2888_v8 }
 0xa49   : > { %v1553_v61 = vpop.permute.xlu0 %1552 }
 0xa4a   : > { %v1558_v2 = vsel %vm966_vm2, %v1553_v61, 0 }
 0xb00   : > { %v1356_v60 = vpop.f32.mrf.mxu0 }
 0xb01   : > { %v1357_v62 = vadd.f32 %v2227_v59, %v1356_v60 }
 0xb02   : > { %v2353_v63 = vpop.f32.mrf.mxu0 }
 0xb03   : > { %v1362_v1 = vpack.c.bf16 %v1357_v62, %v1357_v62 }
 0xb04   : > { %v1359_v3 = vpop.f32.mrf.mxu0 }
 0xb05   : > { %1550 = vrot.lane.b32.xlu0 %v1362_v1, %s2893_s23  ;;  %2366 = vmatmul.mubr.msk.bf16.vlgmr.msra.gmra.mxu0 %vm966_vm2, %v1362_v1  ;;  %s3508_s23 = sld [smem:[#allocation27_spill]] }
 0xb06   : > { %v2354_v4 = vpop.f32.mrf.mxu0  ;;  %2376 = vmatpush3.bf16.xpose.msra.mxu0 %v1558_v2  ;;  %2377 = vmatprep.mubr.msk.bf16.mxu0 %vm2889_vm1, %v2888_v8 }
 0xb07   : > { %2387 = vmatprep.subr.bf16.mxu0 %v2888_v8 }
 0xb0b   : > { %p3510_p5 = scmp.ne.s32.totalorder %s3508_s23, 0 }
 0xb77   : > { %v1551_v5 = vpop.permute.xlu0 %1550 }
 0xb78   : > { %2378 = vmatmul.mubr.msk.bf16.vlgmr.msra.gmra.mxu0 %vm966_vm2, %v1551_v5  ;;  %v2569_v5 = vld [vmem:[%s3454_s18 + $0x8] sm:$0xff]  }
 0xb79   : > { %2391 = vmatprep.mubr.msk.bf16.mxu0 %vm2889_vm1, %v2888_v8  ;;  %2388 = vmatpush3.bf16.msra.mxu0 %v2567_v45 }
 0xb7a   : > { %2389 = vmatprep.subr.bf16.mxu0 %v2888_v8 }
 0xb7d   : > { %2390 = vmatpush3.bf16.msra.mxu0 %v2568_v46 }
 0xb7e   : > { %2403 = vmatprep.subr.bf16.mxu0 %v2888_v8 }
 0xbc5   : > { %v1478_v6 = vpop.f32.mrf.mxu0 }
 0xbc6   : > { %v1484_v7 = vmul.f32 0.25, %v1478_v6  ;;  %v2570_v6 = vld [vmem:[%s3454_s18] sm:$0xff]  }
 0xbc7   : > { %v2367_v9 = vpop.f32.mrf.mxu0 }
 0xbc8   : > { %v1486_v10 = vsel %vm1485_vm7, %v1484_v7, -inf }
 0xbc9   : > { %1487 = vmax.xlane.f32.xlu1 %v1486_v10  ;;  %v1481_v11 = vpop.f32.mrf.mxu0 }
 0xbcb   : > { %v2368_v12 = vpop.f32.mrf.mxu0 }
 0xbcc   : > { %v2244_v12 = vld [vmem:[%s3452_s16] ss:$0 sm:$0xff] }
 0xbda   : > { %1499 = vrot.lane.b32.xlu1 %v1437_v57, %s2891_s27  ;;  %s2791_s27 = sshll.u32 %s2897_s7, 4  ;;  %s2792_s27 = int_to_ptr.vmem [resolvable:$false] %s2791_s27 }
 0xc38   : > { %v1594_v13 = vpop.f32.mrf.mxu0 }
 0xc39   : > { %v1600_v14 = vmul.f32 0.25, %v1594_v13 }
 0xc3a   : > { %v2379_v15 = vpop.f32.mrf.mxu0 }
 0xc3b   : > { %v1601_v16 = vsel %vm1485_vm7, %v1600_v14, -inf }
 0xc3c   : > { %1602 = vmax.xlane.f32.xlu0 %v1601_v16  ;;  %v1597_v17 = vpop.f32.mrf.mxu0 }
 0xc3e   : > { %v2380_v18 = vpop.f32.mrf.mxu0 }
 0xc52   : > { %v1488_v19 = vpop.xlane.xlu1 %1487 }
 0xc53   : > { %v1489_v20 = vsub.f32 %v1484_v7, %v1488_v19  ;;  %v2571_v19 = vld [vmem:[%s3456_s20 + $0x38] sm:$0xff]  }
 0xc55   : > { %v1490_v21 = vmul.f32 1.442695, %v1489_v20  ;;  %v2572_v20 = vld [vmem:[%s3456_s20 + $0x30] sm:$0xff]  }
 0xc56   : > { %v1500_v22 = vpop.permute.xlu1 %1499 }
 0xc57   : > { %2591 = vpow2.f32 %v1490_v21  ;;  %v1506_v23 = vsel %vm1504_vm8, %v1500_v22, 0  ;;  %v2573_v21 = vld [vmem:[%s3456_s20 + $0x28] sm:$0xff]   ;;  %v2574_v22 = vld [vmem:[%s3456_s20 + $0x20] sm:$0xff]  }
 0xc58   : > { %2370 = vmatpush3.bf16.msra.mxu1 %v1506_v23  ;;  %v2575_v23 = vld [vmem:[%s3456_s20 + $0x18] sm:$0xff]  }
 0xc59   : > { %2381 = vmatprep.subr.bf16.mxu1 %v2888_v8 }
 0xc64   : > { %v2592_v24 = vpop.eup %2591 }
 0xc65   : > { %v1492_v25 = vsel %vm1485_vm7, %v2592_v24, 0.0 }
 0xc66   : > { %1493 = vadd.xlane.f32.xlu1 %v1492_v25  ;;  %v2577_v25 = vld [vmem:[%s3456_s20 + $0x8] sm:$0xff]  }
 0xcc5   : > { %v1603_v26 = vpop.xlane.xlu0 %1602 }
 0xcc6   : > { %v1604_v28 = vsub.f32 %v1600_v14, %v1603_v26  ;;  %v2245_v14 = vld [vmem:[%s3453_s17] ss:$0 sm:$0xff] }
 0xcc7   : > { %v2578_v26 = vld [vmem:[%s3456_s20] sm:$0xff]  }
 0xcc8   : > { %v1605_v29 = vmul.f32 1.442695, %v1604_v28  ;;  %v2247_v28 = vld [vmem:[%s3455_s19] ss:$0 sm:$0xff] }
 0xcca   : > { %2593 = vpow2.f32 %v1605_v29 }
 0xcd7   : > { %v2594_v30 = vpop.eup %2593 }
 0xcd8   : > { %v1607_v31 = vsel %vm1485_vm7, %v2594_v30, 0.0 }
 0xcd9   : > { %1608 = vadd.xlane.f32.xlu1 %v1607_v31 }
 0xcea   : > { %1613 = vrot.lane.b32.xlu1 %v1437_v57, %s2892_s24  ;;  %v2246_v57 = vld [vmem:[%s3457_s21] ss:$0 sm:$0xff]  ;;  %s2793_s24 = scalar_lea.vmem %s2792_s27, 256 }
 0xcef   : > { %v1494_v32 = vpop.xlane.xlu1 %1493 }
 0xcf0   : > { %2595 = vrcp.f32 %v1494_v32 }
 0xcfd   : > { %v2596_v33 = vpop.eup %2595 }
 0xcfe   : > { %v1496_v34 = vmul.f32 %v2596_v33, %v2592_v24  ;;  %v2576_v24 = vld [vmem:[%s3456_s20 + $0x10] sm:$0xff]  }
 0xd00   : > { %v1497_v35 = vpack.c.bf16 %v1496_v34, %v1496_v34 }
 0xd02   : > { %2372 = vmatmul.mubr.msk.bf16.vlgmr.msra.gmra.mxu1 %vm1485_vm7, %v1497_v35 }
 0xd03   : > { %2383 = vmatprep.mubr.msk.bf16.mxu1 %vm2889_vm1, %v2888_v8 }
 0xd62   : > { %v1609_v0 = vpop.xlane.xlu1 %1608 }
 0xd63   : > { %2597 = vrcp.f32 %v1609_v0 }
 0xd66   : > { %v1614_v36 = vpop.permute.xlu1 %1613 }
 0xd67   : > { %v1619_v37 = vsel %vm1504_vm8, %v1614_v36, 0 }
 0xd68   : > { %2382 = vmatpush3.bf16.msra.mxu1 %v1619_v37 }
 0xd69   : > { %2395 = vmatprep.subr.bf16.mxu1 %v2888_v8 }
 0xd70   : > { %v2598_v38 = vpop.eup %2597 }
 0xd71   : > { %v1611_v39 = vmul.f32 %v2598_v38, %v2594_v30 }
 0xd73   : > { %v1612_v40 = vpack.c.bf16 %v1611_v39, %v1611_v39 }
 0xd75   : > { %2384 = vmatmul.mubr.msk.bf16.vlgmr.msra.gmra.mxu1 %vm1485_vm7, %v1612_v40 }
 0xd76   : > { %2399 = vmatprep.mubr.msk.bf16.mxu1 %vm2889_vm1, %v2888_v8  ;;  %2396 = vmatpush3.bf16.msra.mxu1 %v2569_v5 }
 0xd77   : > { %2397 = vmatprep.subr.bf16.mxu1 %v2888_v8 }
 0xd7a   : > { %2398 = vmatpush3.bf16.msra.mxu1 %v2570_v6 }
 0xdc2   : > { %v1542_v41 = vpop.f32.mrf.mxu1 }
 0xdc3   : > { %1548 = vst.msk [vmem:[#allocation3] sm:$0xff] %vm966_vm2, %v1542_v41 }
 0xdc4   : > { %v2373_v42 = vpop.f32.mrf.mxu1 }
 0xdc6   : > { %v1545_v43 = vpop.f32.mrf.mxu1 }
 0xdc8   : > { %v2374_v44 = vpop.f32.mrf.mxu1 }
 0xe35   : > { %v1655_v47 = vpop.f32.mrf.mxu1 }
 0xe36   : > { %1662 = vrot.lane.b32.xlu0 %v1655_v47, %s2895_s1  ;;  %s2207_s1 = sshll.u32 %s827_s29, 3 }
 0xe37   : > { %v2385_v48 = vpop.f32.mrf.mxu1  ;;  %s3326_s3 = scalar_lea.vmem [#allocation16], %s2207_s1 }
 0xe38   : > { %s1992_s2 = sshll.u32 %s3326_s3, 4  ;;  %s3388_s2 = int_to_ptr.vmem [resolvable:$true] %s1992_s2 }
 0xe39   : > { %v1658_v49 = vpop.f32.mrf.mxu1  ;;  %s2787_s4 = scalar_lea.vmem %s3388_s2, 128  ;;  %p2794_p7 = scmp.lt.s32.totalorder %s3388_s2, %s2792_s27 }
 0xe3a   : > { %p2788_p0 = scmp.ne.s32.totalorder %s3388_s2, %s2787_s4  ;;  %p2795_p9 = scmp.lt.s32.totalorder %s2793_s24, %s2787_s4 }
 0xe3b   : > { %v2386_v50 = vpop.f32.mrf.mxu1 }
 0xe3c   : > { %p2789_p6 = pnand %p2788_p0, %p3510_p5  ;;  %p2796_p12 = por %p2795_p9, %p2794_p7 }
 0xe3e   : > { %p2790_p8 = pneg %p2789_p6 }
 0xe40   : > { %p2797_p4 = pnand %p2796_p12, %p2790_p8 }
 0xea8   : > { %v1663_v51 = vpop.permute.xlu0 %1662 }
 0xea9   : > { %1665 = vst.msk [vmem:[#allocation3] sm:$0xff] %vm1194_vm6, %v1663_v51 }
 0xeb0   : > { %v1666_v52 = vld [vmem:[#allocation3] sm:$0xff] }
 0xeb1   : > { %v1667_v53 = vpack.c.bf16 %v1666_v52, %v1666_v52  ;;  %v2896_v52 = vmov -1.0  }
 0xeb3   : > { %2392 = vmatmul.mubr.msk.bf16.vlgmr.msra.gmra.mxu0 %vm860_vm0, %v1667_v53 }
 0xeb4   : > { %2419 = vmatprep.mubr.msk.bf16.mxu0 %vm2889_vm1, %v2888_v8  ;;  %2404 = vmatpush3.bf16.msra.mxu0 %v2571_v19 }
 0xeb5   : > { %2405 = vmatprep.subr.bf16.mxu0 %v2888_v8 }
 0xeb8   : > { %2406 = vmatpush3.bf16.msra.mxu0 %v2572_v20 }
 0xeb9   : > { %2407 = vmatprep.subr.bf16.mxu0 %v2888_v8 }
 0xebc   : > { %2408 = vmatpush3.bf16.msra.mxu0 %v2573_v21 }
 0xebd   : > { %2409 = vmatprep.subr.bf16.mxu0 %v2888_v8 }
 0xec0   : > { %2410 = vmatpush3.bf16.msra.mxu0 %v2574_v22 }
 0xec1   : > { %2411 = vmatprep.subr.bf16.mxu0 %v2888_v8 }
 0xec4   : > { %2412 = vmatpush3.bf16.msra.mxu0 %v2575_v23 }
 0xec5   : > { %2413 = vmatprep.subr.bf16.mxu0 %v2888_v8 }
 0xec8   : > { %2414 = vmatpush3.bf16.msra.mxu0 %v2576_v24 }
 0xec9   : > { %2415 = vmatprep.subr.bf16.mxu0 %v2888_v8 }
 0xecc   : > { %2416 = vmatpush3.bf16.msra.mxu0 %v2577_v25 }
 0xecd   : > { %2417 = vmatprep.subr.bf16.mxu0 %v2888_v8 }
 0xed0   : > { %2418 = vmatpush3.bf16.msra.mxu0 %v2578_v26 }
 0xf73   : > { %v1721_v54 = vpop.f32.mrf.mxu0 }
 0xf74   : > { %v1727_v56 = vadd.f32 %v1721_v54, %v3241_v27 }
 0xf75   : > { %v2393_v58 = vpop.f32.mrf.mxu0 }
 0xf76   : > { %v1735_v59 = vadd.f32 %v2243_v55, %v1727_v56 }
 0xf77   : > { %v1724_v60 = vpop.f32.mrf.mxu0 }
 0xf78   : > { %v1773_v61 = vadd.f32 %v2246_v57, %v1735_v59  ;;  %v1738_v62 = vsel %vm860_vm0, %v1735_v59, 0.0 }
 0xf79   : > { %1739 = vadd.xlane.f32.xlu1 %v1738_v62  ;;  %v2394_v63 = vpop.f32.mrf.mxu0 }
 0xf7a   : > { %1774 = vst.msk [vmem:[%s3326_s3] sm:$0xff] %vm860_vm0, %v1773_v61 }
0x1002   : > { %v1740_v27 = vpop.xlane.xlu1 %1739 }
0x1003   : > { %v1741_v1 = vmul.f32 0.03125, %v1740_v27 }
0x1005   : > { %v1742_v2 = vsub.f32 %v1735_v59, %v1741_v1  ;;  %v1870_v59 = vld [vmem:[%s3326_s3] sm:$0xff] }
0x1007   : > { %v1743_v3 = vmul.f32 %v1742_v2, %v1742_v2 }
0x1009   : > { %v1744_v4 = vsel %vm860_vm0, %v1743_v3, 0.0 }
0x100a   : > { %1745 = vadd.xlane.f32.xlu0 %v1744_v4 }
0x1093   : > { %v1746_v7 = vpop.xlane.xlu0 %1745 }
0x1094   : > { %v1747_v9 = vmul.f32 0.03125, %v1746_v7 }
0x1096   : > { %v1748_v10 = vadd.f32 1e-05, %v1747_v9 }
0x1098   : > { %2599 = vrsqrt.f32 %v1748_v10 }
0x10a5   : > { %v2600_v11 = vpop.eup %2599 }
0x10a6   : > { %v1750_v13 = vmul.f32 %v2600_v11, %v1742_v2 }
0x10a8   : > { %v1757_v15 = vmul.f32 %v2244_v12, %v1750_v13 }
0x10aa   : > { %v1764_v16 = vadd.f32 %v2245_v14, %v1757_v15 }
0x10ac   : > { %1765 = vst.msk [vmem:[#allocation2] sm:$0xff] %vm860_vm0, %v1764_v16 }
0x10b3   : > { %v1775_v17 = vld [vmem:[#allocation2] sm:$0xff] }
0x10b4   : > { %v1776_v18 = vpack.c.bf16 %v1775_v17, %v1775_v17 }
0x10b6   : > { %2400 = vmatmul.mubr.msk.bf16.vlgmr.msra.gmra.mxu1 %vm860_vm0, %v1776_v18 }
0x1176   : > { %v1838_v29 = vpop.f32.mrf.mxu1 }
0x1177   : > { %v1839_v30 = vadd.f32 %v2247_v28, %v1838_v29 }
0x1178   : > { %v2401_v31 = vpop.f32.mrf.mxu1 }
0x1179   : > { %v1845_v32 = vmul.f32 0.70710677, %v1839_v30  ;;  %v1844_v55 = vmul.f32 0.5, %v1839_v30 }
0x117a   : > { %v1841_v33 = vpop.f32.mrf.mxu1 }
0x117b   : > { %v1848_v34 = vand.u32 2147483647, %v1845_v32  ;;  %vm1846_vm9 = vcmp.ge.f32.partialorder %v1845_v32, 0.0 }
0x117c   : > { %v2402_v35 = vpop.f32.mrf.mxu1  ;;  %v1847_v53 = vsel %vm1846_vm9, 1.0, %v2896_v52 }
0x117d   : > { %v1849_v0 = vmul.f32 0.3275911, %v1848_v34  ;;  %v1861_v8 = vsub.f32 0.0, %v1848_v34 }
0x117f   : > { %v1850_v36 = vadd.f32 1.0, %v1849_v0  ;;  %v1862_v37 = vmul.f32 %v1861_v8, %v1848_v34 }
0x1181   : > { %2601 = vrcp.f32 %v1850_v36  ;;  %v1863_v40 = vmul.f32 1.442695, %v1862_v37 }
0x1183   : > { %2603 = vpow2.f32 %v1863_v40 }
0x118e   : > { %v2602_v38 = vpop.eup %2601 }
0x118f   : > { %v1852_v39 = vmul.f32 1.0614054, %v2602_v38 }
0x1190   : > { %v2604_v49 = vpop.eup %2603 }
0x1191   : > { %v1853_v41 = vadd.f32 -1.4531521, %v1852_v39 }
0x1193   : > { %v1854_v42 = vmul.f32 %v2602_v38, %v1853_v41 }
0x1195   : > { %v1855_v43 = vadd.f32 1.4214138, %v1854_v42 }
0x1197   : > { %v1856_v44 = vmul.f32 %v2602_v38, %v1855_v43 }
0x1199   : > { %v1857_v45 = vadd.f32 -0.28449672, %v1856_v44 }
0x119b   : > { %v1858_v46 = vmul.f32 %v2602_v38, %v1857_v45 }
0x119d   : > { %v1859_v47 = vadd.f32 0.2548296, %v1858_v46 }
0x119f   : > { %v1860_v48 = vmul.f32 %v2602_v38, %v1859_v47 }
0x11a1   : > { %v1865_v50 = vmul.f32 %v2604_v49, %v1860_v48 }
0x11a3   : > { %v1866_v51 = vsub.f32 1.0, %v1865_v50 }
0x11a5   : > { %v1867_v54 = vmul.f32 %v1866_v51, %v1847_v53 }
0x11a7   : > { %v1868_v56 = vadd.f32 1.0, %v1867_v54 }
0x11a9   : > { %v1869_v57 = vmul.f32 %v1868_v56, %v1844_v55 }
0x11ab   : > { %v1871_v58 = vpack.c.bf16 %v1869_v57, %v1869_v57 }
0x11ad   : > { %2420 = vmatmul.mubr.bf16.vlgmr.msra.gmra.mxu0 %v1871_v58 }
0x126d   : > { %v1970_v60 = vpop.f32.mrf.mxu0 }
0x126e   : > { %v1976_v61 = vadd.f32 %v1970_v60, %v1870_v59 }
0x126f   : > { %v2421_v62 = vpop.f32.mrf.mxu0 }
0x1270   : > { %1977 = vst.msk [vmem:[%s3326_s3] sm:$0xff] %vm860_vm0, %v1976_v61 }
0x1271   : > { %v1973_v63 = vpop.f32.mrf.mxu0 }
0x1272   : > { %2800 = shalt.err (!%p2797_p4)
}
0x1273   : > { %s2801_s3 = scalar_lea.hbm %s3386_s26, 128  ;;  %s2805_s25 = scalar_lea.hbm %s3509_s22, 256 }
0x1274   : > { %p2802_p10 = scmp.ne.s32.totalorder %s3386_s26, %s2801_s3  ;;  %p2806_p2 = scmp.lt.s32.totalorder %s3386_s26, %s3509_s22 }
0x1275   : > { %p2807_p3 = scmp.lt.s32.totalorder %s2805_s25, %s2801_s3 }
0x1276   : > { %p2803_p11 = pnand %p2802_p10, %p3510_p5 }
0x1277   : > { %p2808_p13 = por %p2807_p3, %p2806_p2 }
0x1278   : > { %p2804_p1 = pneg %p2803_p11 }
0x127a   : > { %p2809_p0 = pnand %p2808_p13, %p2804_p1 }
0x127c   : > { %2812 = shalt.err (!%p2809_p0)
}
0x127d   : > { %2451 = dma.vmem_to_hbm [thread:$0]  (%p3510_p5), %s3388_s2, 128, %s3386_s26, %s1979_s30   ;;  %v2422_v27 = vpop.f32.mrf.mxu0 }
0x127e PF: > { %s3511_s4 = sld [smem:[#allocation25_spill]] }
0x127f   : > { %s3512_s27 = sld [smem:[#allocation22_spill]] }
0x1280   : > { %s3513_s24 = sld [smem:[#allocation28_spill]] }
0x1284   : > { %p2493_p6 = scmp.ge.s32.totalorder %s3511_s4, 2 }
0x1285   : > { %s2004_s29 = sand.u32 1, %s3512_s27  }
0x1286   : > { %p3514_p8 = scmp.ne.s32.totalorder %s3513_s24, 0  ;;  %s2005_s0 = scalar_lea.sflag [#allocation6], %s2004_s29 }
0x1288   : > { %p2476_p7 = pnand %p2493_p6, %p3514_p8 }
0x128a   : > { %p2477_p9 = pneg %p2476_p7 }
0x128c   : > { %2854 = dma.done.wait (%p2477_p9), %s2005_s0, 128  }
0x128d   : > { %2856 = vsyncadd (%p2477_p9), %s2005_s0, 4294967168  ;;  %s39_s0 = sadd.s32 1, %s3511_s4   ;;  %s3515_s23 = sld [smem:[#allocation23_spill]] }
0x128e   : > { %p36_p12 = scmp.ge.s32.totalorder %s39_s0, 4   ;;  %s3516_s29 = sld [smem:[#allocation29_spill]] }
0x128f   : > { %s3517_s30 = sld [smem:[#allocation24_spill]]  ;;  %s3519_s3 = smov %s2863_s28 }
0x1290   : > { %s3518_s4 = sld [smem:[#allocation26_spill]]  ;;  %38 = sbr.rel (!%p36_p12) target bundleno = 18 (0x12), region = 188 }
0x1293   : > { %s3520_s28 = smov %s3515_s23 }
0x1295   :  { %2010 = vsyncpa [#allocation5], 1 }
0x1296   :  { %2012 = vsyncpa [#allocation5 + $0x1], 1 }
0x1297   :  { %2013 = vsyncpa [#allocation8], 1 }
0x1298   :  { %2014 = vsyncpa [#allocation11], 1 }
0x1299   :  { %2015 = vsyncpa [#allocation14], 1 }
0x129a   :  { %2016 = vsyncpa [#allocation6], 1 }
0x129b   :  { %2018 = vsyncpa [#allocation6 + $0x1], 1 }

// kernel: tpu_custom_call.1
= control target key start
LH: loop header
LB: loop body
LE: loop exit
PB: predicated region body
PF: predicated region fallthrough
CT: control target
= control target key end

     0   :  { %s3433_s0 = inlined_call_operand.vmem [shape: f32[2,8,32], index: 0, kind: input, shape index: {}]   ;;  %s3434_s1 = inlined_call_operand.vmem [shape: bf16[2,12,32], index: 1, kind: input, shape index: {}]   ;;  %s3435_s2 = inlined_call_operand.hbm [shape: f32[1,32], index: 2, kind: input, shape index: {}]   ;;  %s3436_s3 = inlined_call_operand.hbm [shape: f32[1,32], index: 3, kind: input, shape index: {}]   ;;  %s3437_s4 = inlined_call_operand.vmem [shape: bf16[32,96], index: 4, kind: input, shape index: {}]   ;;  %s3438_s5 = inlined_call_operand.hbm [shape: f32[1,96], index: 5, kind: input, shape index: {}]   ;;  %s3439_s6 = inlined_call_operand.vmem [shape: bf16[32,32], index: 6, kind: input, shape index: {}]   ;;  %s3440_s7 = inlined_call_operand.hbm [shape: f32[1,32], index: 7, kind: input, shape index: {}]   ;;  %s3441_s8 = inlined_call_operand.hbm [shape: f32[1,32], index: 8, kind: input, shape index: {}]   ;;  %s3442_s9 = inlined_call_operand.hbm [shape: f32[1,32], index: 9, kind: input, shape index: {}]   ;;  %s3443_s10 = inlined_call_operand.vmem [shape: bf16[32,32], index: 10, kind: input, shape index: {}]   ;;  %s3444_s11 = inlined_call_operand.hbm [shape: f32[1,32], index: 11, kind: input, shape index: {}]   ;;  %s3445_s12 = inlined_call_operand.vmem [shape: bf16[32,64], index: 12, kind: input, shape index: {}]   ;;  %s3446_s13 = inlined_call_operand.vmem [shape: f32[1,64], index: 13, kind: input, shape index: {}]   ;;  %s3447_s14 = inlined_call_operand.vmem [shape: bf16[32,32], index: 14, kind: input, shape index: {}]   ;;  %s3448_s15 = inlined_call_operand.vmem [shape: f32[1,32], index: 15, kind: input, shape index: {}]   ;;  %s3449_s16 = inlined_call_operand.vmem [shape: f32[1,32], index: 16, kind: input, shape index: {}]   ;;  %s3450_s17 = inlined_call_operand.vmem [shape: f32[1,32], index: 17, kind: input, shape index: {}]   ;;  %s3451_s18 = inlined_call_operand.vmem [shape: bf16[32,128], index: 18, kind: input, shape index: {}]   ;;  %s3452_s19 = inlined_call_operand.vmem [shape: f32[1,128], index: 19, kind: input, shape index: {}]   ;;  %s3453_s20 = inlined_call_operand.vmem [shape: bf16[128,32], index: 20, kind: input, shape index: {}]   ;;  %s3454_s21 = inlined_call_operand.vmem [shape: f32[1,32], index: 21, kind: input, shape index: {}]   ;;  %s3455_s22 = inlined_call_operand.hbm [shape: f32[2,8,32], index: 22, kind: output, shape index: {}]  }
   0x1   :  { %3472 = sst [smem:[#allocation30_spill]] %s3433_s0 }
   0x2   :  { %3473 = sst [smem:[#allocation31_spill]] %s3434_s1 }
   0x3   :  { %3474 = sst [smem:[#allocation32_spill]] %s3435_s2 }
   0x4   :  { %3475 = sst [smem:[#allocation33_spill]] %s3436_s3 }
   0x5   :  { %3476 = sst [smem:[#allocation34_spill]] %s3437_s4 }
   0x6   :  { %3477 = sst [smem:[#allocation35_spill]] %s3438_s5 }
   0x7   :  { %3478 = sst [smem:[#allocation36_spill]] %s3439_s6 }
   0x8   :  { %3479 = sst [smem:[#allocation37_spill]] %s3440_s7 }
   0x9   :  { %3480 = sst [smem:[#allocation38_spill]] %s3455_s22 }
   0xa   :  { %27 = vsyncpa [#allocation5], 0 }
   0xb   :  { %28 = vsyncpa [#allocation8], 0 }
   0xc   :  { %29 = vsyncpa [#allocation11], 0 }
   0xd   :  { %30 = vsyncpa [#allocation14], 0 }
   0xe   :  { %31 = vsyncpa [#allocation6], 0 }
   0xf   :  { %33 = vsyncpa [#allocation6 + $0x1], 0  ;;  %s3010_s3 = smov 0   ;;  %s3012_s28 = smov 0  }
  0x10   :  { %s3014_s29 = smov 0   ;;  %s3016_s30 = smov 0  }
  0x11   :  { %s3018_s4 = smov 0   ;;  %s3020_s0 = smov 0  }
  0x12 LB: > { %3481 = sst [smem:[#allocation22_spill]] %s2856_s3  ;;  %s2182_s23 = sadd.s32 4294967295, %s2876_s0   ;;  %s2876_s0 = sphi %s3020_s0, %s39_s0   ;;  %s2872_s4 = sphi %s3018_s4, %s3515_s4   ;;  %s2868_s30 = sphi %s3016_s30, %s3514_s30   ;;  %s2864_s29 = sphi %s3014_s29, %s3513_s29   ;;  %s2860_s28 = sphi %s3012_s28, %s3517_s28   ;;  %s2856_s3 = sphi %s3010_s3, %s3516_s3  }
  0x13   : > { %3482 = sst [smem:[#allocation23_spill]] %s2864_s29  ;;  %s2183_s1 = sadd.s32 4294967294, %s2876_s0  }
  0x14   : > { %3483 = sst [smem:[#allocation24_spill]] %s2872_s4  ;;  %s51_s5 = sadd.s32 1, %s2872_s4 }
  0x15   : > { %3484 = sst [smem:[#allocation25_spill]] %s2876_s0  ;;  %s545_s24 = sadd.s32 1, %s2864_s29 }
  0x16   : > { %p53_p0 = scmp.ge.s32.totalorder %s51_s5, 2  ;;  %p555_p1 = scmp.ne.s32.totalorder %s2864_s29, %s2860_s28 }
  0x17   : > { %p556_p2 = scmp.eq.s32.totalorder %s2182_s23, 1  ;;  %p561_p3 = scmp.ne.s32.totalorder %s2860_s28, %s2856_s3 }
  0x18   : > { %s3519_s5 = smov (%p53_p0, %s51_s5), 0  ;;  %p562_p5 = scmp.eq.s32.totalorder %s2183_s1, 1 }
  0x19   : > { %3485 = sst [smem:[#allocation26_spill]] %s3519_s5  ;;  %p3050_p4 = por %p556_p2, %p555_p1 }
  0x1a   : > { %s542_s25 = ssub.s32 %s2872_s4, %s3519_s5  ;;  %p2184_p6 = scmp.ge.s32.totalorder %s2876_s0, 1 }
  0x1b   : > { %s3486_s6 = scalar_select %p3050_p4, 1, 0 }
  0x1c   : > { %p543_p7 = scmp.eq.s32.totalorder %s542_s25, 0  ;;  %p3057_p8 = por %p562_p5, %p561_p3 }
  0x1d   : > { %3487 = sst [smem:[#allocation27_spill]] %s3486_s6  ;;  %p569_p9 = scmp.lt.s32.totalorder %s2876_s0, 3 }
  0x1e   : > { %s3488_s26 = scalar_select %p3057_p8, 1, 0 }
  0x1f   : > { %s3063_s2 = scalar_select %p543_p7, %s2864_s29, %s545_s24  }
  0x20   : > { %3489 = sst [smem:[#allocation28_spill]] %s3488_s26  ;;  %p3065_p10 = pnand %p2184_p6, %p569_p9 }
  0x21   : > { %3490 = sst [smem:[#allocation29_spill]] %s3063_s2  ;;  %p3069_p11 = scmp.eq.s32.totalorder %s2182_s23, 0 }
  0x22   : > { %s3491_s27 = scalar_select %p3065_p10, 1, 0 }
  0x23   : > { %s3492_s3 = scalar_select %p3069_p11, 1, 0 }
  0x24   : > { %p2450_p12 = pneg %p3065_p10  ;;  %s2878_s1 = smov [#allocation7]  }
  0x25   : > { %s593_s25 = sshll.u32 %s2878_s1, 4  ;;  %s2879_s5 = smov [#allocation10]   ;;  %s594_s25 = int_to_ptr.vmem [resolvable:$true] %s593_s25 }
  0x26   : > { %s621_s4 = sshll.u32 %s2879_s5, 4  ;;  %p3077_p13 = pnand %p3069_p11, %p2450_p12  ;;  %s622_s4 = int_to_ptr.vmem [resolvable:$true] %s621_s4 }
  0x27   : > { %s2880_s2 = smov [#allocation13]   ;;  %s2613_s26 = scalar_lea.vmem %s594_s25, 16 }
  0x28   : > { %s643_s23 = sshll.u32 %s2880_s2, 4  ;;  %p3083_p0 = pneg %p3077_p13  ;;  %s644_s23 = int_to_ptr.vmem [resolvable:$true] %s643_s23 }
  0x29   : > { %p2614_p1 = scmp.ne.s32.totalorder %s594_s25, %s2613_s26  ;;  %s2620_s5 = scalar_lea.vmem %s594_s25, 32 }
  0x2a   : > { %p2621_p5 = scmp.lt.s32.totalorder %s594_s25, %s594_s25  ;;  %p2622_p6 = scmp.lt.s32.totalorder %s2620_s5, %s2613_s26 }
  0x2b   : > { %p2616_p2 = pnand %p2614_p1, %p3083_p0 }
  0x2c   : > { %p2623_p7 = por %p2622_p6, %p2621_p5 }
  0x2d   : > { %p2617_p3 = pneg %p2616_p2 }
  0x2f   : > { %p2624_p9 = pnand %p2623_p7, %p2617_p3 }
  0x31   : > { %2627 = shalt.err (!%p2624_p9)
}
  0x32   : > { %s3495_s0 = sld [smem:[#allocation33_spill]]  ;;  %s2639_s22 = scalar_lea.vmem %s622_s4, 16 }
  0x33   : > { %p2640_p12 = scmp.ne.s32.totalorder %s622_s4, %s2639_s22  ;;  %s2646_s6 = scalar_lea.vmem %s622_s4, 32 }
  0x34   : > { %p2647_p1 = scmp.lt.s32.totalorder %s622_s4, %s622_s4  ;;  %p2648_p2 = scmp.lt.s32.totalorder %s2646_s6, %s2639_s22 }
  0x35   : > { %p2642_p8 = pnand %p2640_p12, %p3083_p0 }
  0x36   : > { %p2649_p11 = por %p2648_p2, %p2647_p1 }
  0x37   : > { %p2643_p4 = pneg %p2642_p8 }
  0x38   : > { %2456 = dma.hbm_to_vmem [thread:$0]  (!%p3077_p13), %s3495_s0, 16, %s594_s25, [#allocation8]  }
  0x39   : > { %p2650_p10 = pnand %p2649_p11, %p2643_p4 }
  0x3b   : > { %2653 = shalt.err (!%p2650_p10)
}
  0x3c   : > { %s3496_s7 = sld [smem:[#allocation37_spill]]  ;;  %s2665_s0 = scalar_lea.vmem %s644_s23, 16 }
  0x3d   : > { %p2666_p3 = scmp.ne.s32.totalorder %s644_s23, %s2665_s0  ;;  %s2672_s25 = scalar_lea.vmem %s644_s23, 32 }
  0x3e   : > { %p2673_p8 = scmp.lt.s32.totalorder %s644_s23, %s644_s23  ;;  %p2674_p7 = scmp.lt.s32.totalorder %s2672_s25, %s2665_s0 }
  0x3f   : > { %p2668_p5 = pnand %p2666_p3, %p3083_p0 }
  0x40   : > { %p2675_p9 = por %p2674_p7, %p2673_p8 }
  0x41   : > { %p2669_p6 = pneg %p2668_p5 }
  0x42   : > { %2462 = dma.hbm_to_vmem [thread:$0]  (!%p3077_p13), %s3496_s7, 16, %s622_s4, [#allocation11]  }
  0x43   : > { %p2676_p12 = pnand %p2675_p9, %p2669_p6 }
  0x45   : > { %2679 = shalt.err (!%p2676_p12)
}
  0x46   : > { %2468 = dma.hbm_to_vmem [thread:$0]  (!%p3077_p13), %s3442_s9, 16, %s644_s23, [#allocation14]  }
  0x47   : > { %s2881_s4 = smov [#allocation4]   ;;  %s2882_s1 = smov [#allocation9]  }
  0x48   : > { %s582_s2 = sshll.u32 %s2881_s4, 4  ;;  %s607_s26 = sshll.u32 %s2882_s1, 4  ;;  %s583_s2 = int_to_ptr.vmem [resolvable:$true] %s582_s2  ;;  %s608_s26 = int_to_ptr.vmem [resolvable:$true] %s607_s26 }
  0x49   : > { %s2691_s5 = scalar_lea.vmem %s583_s2, 16  ;;  %s2698_s0 = scalar_lea.vmem %s583_s2, 32 }
  0x4a   : > { %p2692_p4 = scmp.ne.s32.totalorder %s583_s2, %s2691_s5  ;;  %p2699_p1 = scmp.lt.s32.totalorder %s583_s2, %s583_s2 }
  0x4b   : > { %p2700_p2 = scmp.lt.s32.totalorder %s2698_s0, %s2691_s5 }
  0x4c   : > { %p2694_p10 = pnand %p2692_p4, %p3083_p0 }
  0x4d   : > { %p2701_p3 = por %p2700_p2, %p2699_p1 }
  0x4e   : > { %p2695_p11 = pneg %p2694_p10 }
  0x50   : > { %p2702_p5 = pnand %p2701_p3, %p2695_p11 }
  0x52   : > { %2705 = shalt.err (!%p2702_p5)
}
  0x53   : > { %s3497_s22 = sld [smem:[#allocation32_spill]]  ;;  %s2717_s6 = scalar_lea.vmem %s608_s26, 16 }
  0x54   : > { %p2718_p6 = scmp.ne.s32.totalorder %s608_s26, %s2717_s6  ;;  %s2724_s4 = scalar_lea.vmem %s608_s26, 32 }
  0x55   : > { %p2725_p9 = scmp.lt.s32.totalorder %s608_s26, %s608_s26  ;;  %p2726_p12 = scmp.lt.s32.totalorder %s2724_s4, %s2717_s6 }
  0x56   : > { %p2720_p8 = pnand %p2718_p6, %p3083_p0 }
  0x57   : > { %p2727_p4 = por %p2726_p12, %p2725_p9 }
  0x58   : > { %p2721_p7 = pneg %p2720_p8 }
  0x59   : > { %2453 = dma.hbm_to_vmem [thread:$0]  (!%p3077_p13), %s3497_s22, 16, %s583_s2, [#allocation5]  }
  0x5a   : > { %p2728_p10 = pnand %p2727_p4, %p2721_p7 }
  0x5c   : > { %2731 = shalt.err (!%p2728_p10)
}
  0x5d   : > { %s3498_s0 = sld [smem:[#allocation35_spill]]  ;;  %s2883_s23 = smov [#allocation12]  }
  0x5e   : > { %s632_s2 = sshll.u32 %s2883_s23, 4  ;;  %s2884_s25 = smov [#allocation15]   ;;  %s633_s2 = int_to_ptr.vmem [resolvable:$true] %s632_s2 }
  0x5f   : > { %s657_s22 = sshll.u32 %s2884_s25, 4  ;;  %s2743_s7 = scalar_lea.vmem %s633_s2, 16  ;;  %s658_s22 = int_to_ptr.vmem [resolvable:$true] %s657_s22 }
  0x60   : > { %p2744_p11 = scmp.ne.s32.totalorder %s633_s2, %s2743_s7  ;;  %s2750_s6 = scalar_lea.vmem %s633_s2, 32 }
  0x61   : > { %p2751_p3 = scmp.lt.s32.totalorder %s633_s2, %s633_s2  ;;  %p2752_p5 = scmp.lt.s32.totalorder %s2750_s6, %s2743_s7 }
  0x62   : > { %p2746_p1 = pnand %p2744_p11, %p3083_p0 }
  0x63   : > { %2459 = dma.hbm_to_vmem [thread:$0]  (!%p3077_p13), %s3498_s0, 16, %s608_s26, [#allocation8]  }
  0x64   : > { %p2747_p2 = pneg %p2746_p1  ;;  %p2753_p6 = por %p2752_p5, %p2751_p3 }
  0x66   : > { %p2754_p8 = pnand %p2753_p6, %p2747_p2 }
  0x68   : > { %2757 = shalt.err (!%p2754_p8)
}
  0x69   : > { %2465 = dma.hbm_to_vmem [thread:$0]  (!%p3077_p13), %s3441_s8, 16, %s633_s2, [#allocation11]  }
  0x6a   : > { %s2769_s1 = scalar_lea.vmem %s658_s22, 16  ;;  %s2776_s5 = scalar_lea.vmem %s658_s22, 32 }
  0x6b   : > { %p2770_p7 = scmp.ne.s32.totalorder %s658_s22, %s2769_s1  ;;  %p2777_p4 = scmp.lt.s32.totalorder %s658_s22, %s658_s22 }
  0x6c   : > { %p2778_p10 = scmp.lt.s32.totalorder %s2776_s5, %s2769_s1 }
  0x6d   : > { %p2772_p9 = pnand %p2770_p7, %p3083_p0 }
  0x6e   : > { %p2779_p11 = por %p2778_p10, %p2777_p4 }
  0x6f   : > { %p2773_p12 = pneg %p2772_p9 }
  0x71   : > { %p2780_p1 = pnand %p2779_p11, %p2773_p12 }
  0x73   : > { %2783 = shalt.err (!%p2780_p1)
}
  0x74   : > { %2471 = dma.hbm_to_vmem [thread:$0]  (!%p3077_p13), %s3444_s11, 16, %s658_s22, [#allocation14]  }
  0x75   : > { %p3499_p2 = scmp.ne.s32.totalorder %s3491_s27, 0 }
  0x76   : > { %p3500_p3 = scmp.ne.s32.totalorder (!%p3499_p2), %s3492_s3, 0 }
  0x77   : > { %728 = sbr.rel (%p3499_p2) target bundleno = 4734 (0x127e), region = 108 }
  0x7c   : > { %2835 = dma.done.wait (%p3500_p3), [#allocation5], 16  }
  0x7d   : > { %2837 = vsyncadd (%p3500_p3), [#allocation5], 4294967280 }
  0x7e   : > { %2839 = dma.done.wait (%p3500_p3), [#allocation8], 32  }
  0x7f   : > { %2841 = vsyncadd (%p3500_p3), [#allocation8], 4294967264 }
  0x80   : > { %2843 = dma.done.wait (%p3500_p3), [#allocation11], 32  }
  0x81   : > { %2845 = vsyncadd (%p3500_p3), [#allocation11], 4294967264 }
  0x82   : > { %2847 = dma.done.wait (%p3500_p3), [#allocation14], 32  }
  0x83   : > { %2849 = vsyncadd (%p3500_p3), [#allocation14], 4294967264  ;;  %p830_p13 = scmp.lt.s32.totalorder %s2868_s30, 1  ;;  %s3501_s2 = sld [smem:[#allocation30_spill]]  ;;  %vm860_vm0 = vcmask 261120   ;;  %v2885_v8 = vmov 0.0   ;;  %v957_v31 = vlaneseq }
  0x84   : > { %s3502_s26 = sld [smem:[#allocation31_spill]]  ;;  %2304 = vmatprep.subr.bf16.mxu1 %v2885_v8  ;;  %vm2886_vm1 = vmmov 0   ;;  %2330 = vmatprep.subr.bf16.mxu0 %v2885_v8  ;;  %v2208_v14 = vld [vmem:[#allocation4] ss:$0 sm:$0xff]  ;;  %v2209_v16 = vld [vmem:[#allocation7] ss:$0 sm:$0xff] }
  0x85   : > { %s831_s29 = scalar_select %p830_p13, %s2868_s30, 1  ;;  %2308 = vmatprep.mubr.msk.bf16.mxu1 %vm2886_vm1, %v2885_v8  ;;  %2332 = vmatprep.mubr.msk.bf16.mxu0 %vm2886_vm1, %v2885_v8  ;;  %v2210_v20 = vld [vmem:[#allocation9] ss:$0 sm:$0xff]  ;;  %vm966_vm2 = vcmask 130048   ;;  %vm1033_vm3 = vcmask 1043456   ;;  %v958_v32 = vshrl.u32 %v957_v31, 7 }
  0x86   : > { %s3503_s5 = sld [smem:[#allocation34_spill]]  ;;  %v960_v33 = vand.u32 127, %v957_v31  ;;  %vm1015_vm5 = vcmask 64512   ;;  %s2889_s24 = smov 80   ;;  %vm1194_vm6 = vcmask 261248   ;;  %vm1485_vm7 = vcmask 97280  }
  0x87   : > { %s2205_s27 = sshll.u32 %s831_s29, 3  ;;  %s2887_s29 = smov 64   ;;  %vm1504_vm8 = vcmask 1045504  }
  0x88   : > { %vm961_vm4 = vcmp.gt.s32.totalorder %v960_v33, %v958_v32  ;;  %s2890_s23 = smov 112   ;;  %s3504_s6 = sld [smem:[#allocation36_spill]] }
  0x89   : > { %s833_s25 = scalar_lea.vmem %s3501_s2, %s2205_s27  ;;  %v962_v35 = vsel %vm961_vm4, -1e+09, %v2885_v8  ;;  %s2891_s2 = smov 48  }
  0x8a   : > { %s3162_s4 = scalar_lea.vmem %s3502_s26, %s2205_s27  ;;  %v3164_v0 = vld [vmem:[%s833_s25] sm:$0xff]  ;;  %s2888_s27 = smov 96  }
  0x8b   : > { %v861_v1 = vsel %vm860_vm0, %v3164_v0, 0.0  ;;  %s2892_s1 = smov 16   ;;  %s2257_s0 = sshll.u32 %s2868_s30, 7 }
  0x8c   : > { %862 = vadd.xlane.f32.xlu0 %v861_v1  ;;  %v2556_v7 = vld [vmem:[%s3503_s5 + $0x8] sm:$0xff]   ;;  %v2557_v9 = vld [vmem:[%s3503_s5] sm:$0xff]   ;;  %s3506_s22 = sld [smem:[#allocation38_spill]]  ;;  %s2894_s7 = smov [#allocation16]  }
  0x8d   : > { %2305 = vmatpush3.bf16.msra.mxu1 %v2556_v7 }
  0x8e   : > { %2306 = vmatprep.subr.bf16.mxu1 %v2885_v8 }
  0x91   : > { %2307 = vmatpush3.bf16.msra.mxu1 %v2557_v9 }
  0x92   : > { %2312 = vmatprep.subr.bf16.mxu1 %v2885_v8  ;;  %s3383_s26 = scalar_lea.hbm %s3506_s22, %s2257_s0 }
 0x115   : > { %v863_v2 = vpop.xlane.xlu0 %862 }
 0x116   : > { %v865_v3 = vmul.f32 0.03125, %v863_v2 }
 0x118   : > { %v866_v4 = vsub.f32 %v3164_v0, %v865_v3 }
 0x11a   : > { %v867_v5 = vmul.f32 %v866_v4, %v866_v4 }
 0x11c   : > { %v868_v6 = vsel %vm860_vm0, %v867_v5, 0.0 }
 0x11d   : > { %869 = vadd.xlane.f32.xlu0 %v868_v6 }
 0x1a6   : > { %v870_v10 = vpop.xlane.xlu0 %869 }
 0x1a7   : > { %v871_v11 = vmul.f32 0.03125, %v870_v10 }
 0x1a9   : > { %v872_v12 = vadd.f32 1e-05, %v871_v11 }
 0x1ab   : > { %2576 = vrsqrt.f32 %v872_v12 }
 0x1b8   : > { %v2577_v13 = vpop.eup %2576 }
 0x1b9   : > { %v874_v15 = vmul.f32 %v2577_v13, %v866_v4 }
 0x1bb   : > { %v881_v17 = vmul.f32 %v2208_v14, %v874_v15  ;;  %v2558_v14 = vld [vmem:[%s3504_s6 + $0x8] sm:$0xff]   ;;  %v2559_v15 = vld [vmem:[%s3504_s6] sm:$0xff]  }
 0x1bd   : > { %v888_v18 = vadd.f32 %v2209_v16, %v881_v17 }
 0x1bf   : > { %v889_v19 = vpack.c.bf16 %v888_v18, %v888_v18 }
 0x1c1   : > { %2309 = vmatmul.mubr.msk.bf16.vlgmr.msra.gmra.mxu1 %vm860_vm0, %v889_v19 }
 0x1c2   : > { %2314 = vmatprep.mubr.msk.bf16.mxu1 %vm2886_vm1, %v2885_v8 }
 0x281   : > { %v950_v21 = vpop.f32.mrf.mxu1 }
 0x282   : > { %v951_v22 = vadd.f32 %v2210_v20, %v950_v21 }
 0x283   : > { %v2310_v23 = vpop.f32.mrf.mxu1 }
 0x284   : > { %v3187_v24 = vpack.c.bf16 %v951_v22, %v951_v22 }
 0x285   : > { %v953_v25 = vpop.f32.mrf.mxu1 }
 0x286   : > { %1028 = vrot.lane.b32.xlu0 %v3187_v24, %s2887_s29  ;;  %964 = vrot.lane.b32.xlu1 %v3187_v24, %s2888_s27  ;;  %s827_s29 = sand.u32 1, %s2860_s28  }
 0x287   : > { %v2311_v26 = vpop.f32.mrf.mxu1  ;;  %s1979_s30 = scalar_lea.sflag [#allocation6], %s827_s29 }
 0x2f8   : > { %v965_v27 = vpop.permute.xlu1 %964  ;;  %v1029_v29 = vpop.permute.xlu0 %1028 }
 0x2f9   : > { %v971_v28 = vsel %vm966_vm2, %v965_v27, 0  ;;  %v1035_v30 = vsel %vm1033_vm3, %v1029_v29, 0 }
 0x2fa   : > { %2313 = vmatpush3.bf16.xpose.msra.mxu1 %v971_v28 }
 0x2fb   : > { %2318 = vmatprep.subr.bf16.mxu1 %v2885_v8 }
 0x301   : > { %2315 = vmatmul.mubr.msk.bf16.vlgmr.msra.gmra.mxu1 %vm966_vm2, %v3187_v24 }
 0x302   : > { %2319 = vmatpush3.bf16.msra.mxu1 %v1035_v30  ;;  %2320 = vmatprep.mubr.msk.bf16.mxu1 %vm2886_vm1, %v2885_v8 }
 0x303   : > { %2324 = vmatprep.subr.bf16.mxu1 %v2885_v8 }
 0x3c1   : > { %v1007_v34 = vpop.f32.mrf.mxu1 }
 0x3c2   : > { %v1013_v36 = vmul.f32 0.25, %v1007_v34 }
 0x3c3   : > { %v2316_v37 = vpop.f32.mrf.mxu1 }
 0x3c4   : > { %v1014_v38 = vadd.f32 %v1013_v36, %v962_v35  ;;  %v2561_v36 = vld [vmem:[%s3445_s12] sm:$0xff]  }
 0x3c5   : > { %v1010_v39 = vpop.f32.mrf.mxu1  ;;  %v2555_v37 = vld [vmem:[%s3162_s4] sm:$0x3f]  }
 0x3c6   : > { %v1016_v40 = vsel %vm1015_vm5, %v1014_v38, -inf  ;;  %v2563_v39 = vld [vmem:[%s3443_s10] sm:$0xff]  }
 0x3c7   : > { %1017 = vmax.xlane.f32.xlu1 %v1016_v40  ;;  %v2317_v41 = vpop.f32.mrf.mxu1 }
 0x450   : > { %v1018_v42 = vpop.xlane.xlu1 %1017 }
 0x451   : > { %v1019_v43 = vsub.f32 %v1014_v38, %v1018_v42  ;;  %v2562_v38 = vld [vmem:[%s3443_s10 + $0x8] sm:$0xff]  }
 0x453   : > { %v1020_v44 = vmul.f32 1.442695, %v1019_v43 }
 0x455   : > { %2578 = vpow2.f32 %v1020_v44  ;;  %v2222_v44 = vld [vmem:[#allocation12] ss:$0 sm:$0xff] }
 0x462   : > { %v2579_v45 = vpop.eup %2578 }
 0x463   : > { %v1022_v46 = vsel %vm1015_vm5, %v2579_v45, 0.0 }
 0x464   : > { %1023 = vadd.xlane.f32.xlu0 %v1022_v46  ;;  %v2223_v46 = vld [vmem:[#allocation13] ss:$0 sm:$0xff] }
 0x47a   : > { %1080 = vrot.lane.b32.xlu0 %v3187_v24, %s2889_s24 }
 0x47e   : > { %1078 = vrot.lane.b32.xlu0 %v3187_v24, %s2890_s23 }
 0x4ed   : > { %v1024_v47 = vpop.xlane.xlu0 %1023 }
 0x4ee   : > { %2580 = vrcp.f32 %v1024_v47 }
 0x4f1   : > { %v1081_v50 = vpop.permute.xlu0 %1080 }
 0x4f2   : > { %v1086_v52 = vsel %vm966_vm2, %v1081_v50, 0  ;;  %v2228_v50 = vld [vmem:[%s3446_s13] ss:$0 sm:$0xff] }
 0x4f5   : > { %v1079_v53 = vpop.permute.xlu0 %1078 }
 0x4fb   : > { %v2581_v48 = vpop.eup %2580 }
 0x4fc   : > { %v1026_v49 = vmul.f32 %v2581_v48, %v2579_v45 }
 0x4fe   : > { %v1027_v51 = vpack.c.bf16 %v1026_v49, %v1026_v49 }
 0x500   : > { %2321 = vmatmul.mubr.msk.bf16.vlgmr.msra.gmra.mxu1 %vm1015_vm5, %v1027_v51 }
 0x501   : > { %2325 = vmatpush3.bf16.xpose.msra.mxu1 %v1086_v52  ;;  %2326 = vmatprep.mubr.msk.bf16.mxu1 %vm2886_vm1, %v2885_v8 }
 0x502   : > { %2336 = vmatprep.subr.bf16.mxu1 %v2885_v8 }
 0x508   : > { %2327 = vmatmul.mubr.msk.bf16.vlgmr.msra.gmra.mxu1 %vm966_vm2, %v1079_v53 }
 0x509   : > { %2340 = vmatprep.mubr.msk.bf16.mxu1 %vm2886_vm1, %v2885_v8  ;;  %2337 = vmatpush3.bf16.msra.mxu1 %v2558_v14 }
 0x50a   : > { %2338 = vmatprep.subr.bf16.mxu1 %v2885_v8 }
 0x50d   : > { %2339 = vmatpush3.bf16.msra.mxu1 %v2559_v15 }
 0x50e   : > { %2352 = vmatprep.subr.bf16.mxu1 %v2885_v8 }
 0x5c0   : > { %v1071_v54 = vpop.f32.mrf.mxu1 }
 0x5c1   : > { %1077 = vst.msk [vmem:[#allocation3] sm:$0xff] %vm966_vm2, %v1071_v54 }
 0x5c2   : > { %v2322_v55 = vpop.f32.mrf.mxu1 }
 0x5c4   : > { %v1074_v56 = vpop.f32.mrf.mxu1 }
 0x5c6   : > { %v2323_v57 = vpop.f32.mrf.mxu1 }
 0x5c8   : > { %v1122_v58 = vpop.f32.mrf.mxu1 }
 0x5c9   : > { %v1128_v59 = vmul.f32 0.25, %v1122_v58 }
 0x5ca   : > { %v2328_v60 = vpop.f32.mrf.mxu1 }
 0x5cb   : > { %v1129_v61 = vadd.f32 %v1128_v59, %v962_v35  ;;  %v2224_v59 = vld [vmem:[#allocation15] ss:$0 sm:$0xff] }
 0x5cc   : > { %v1125_v62 = vpop.f32.mrf.mxu1 }
 0x5cd   : > { %v1130_v63 = vsel %vm1015_vm5, %v1129_v61, -inf }
 0x5ce   : > { %1131 = vmax.xlane.f32.xlu1 %v1130_v63  ;;  %v2329_v1 = vpop.f32.mrf.mxu1 }
 0x5df   : > { %1142 = vrot.lane.b32.xlu1 %v3187_v24, %s2891_s2  ;;  %v2221_v24 = vld [vmem:[#allocation10] ss:$0 sm:$0xff] }
 0x657   : > { %v1132_v2 = vpop.xlane.xlu1 %1131 }
 0x658   : > { %v1133_v3 = vsub.f32 %v1129_v61, %v1132_v2 }
 0x65a   : > { %v1134_v4 = vmul.f32 1.442695, %v1133_v3 }
 0x65b   : > { %v1143_v5 = vpop.permute.xlu1 %1142 }
 0x65c   : > { %2582 = vpow2.f32 %v1134_v4  ;;  %v1148_v6 = vsel %vm1033_vm3, %v1143_v5, 0 }
 0x65d   : > { %2331 = vmatpush3.bf16.msra.mxu0 %v1148_v6 }
 0x65e   : > { %2344 = vmatprep.subr.bf16.mxu0 %v2885_v8 }
 0x669   : > { %v2583_v7 = vpop.eup %2582 }
 0x66a   : > { %v1136_v9 = vsel %vm1015_vm5, %v2583_v7, 0.0 }
 0x66b   : > { %1137 = vadd.xlane.f32.xlu0 %v1136_v9 }
 0x6f4   : > { %v1138_v10 = vpop.xlane.xlu0 %1137 }
 0x6f5   : > { %2584 = vrcp.f32 %v1138_v10 }
 0x702   : > { %v2585_v11 = vpop.eup %2584 }
 0x703   : > { %v1140_v12 = vmul.f32 %v2585_v11, %v2583_v7 }
 0x705   : > { %v1141_v13 = vpack.c.bf16 %v1140_v12, %v1140_v12 }
 0x707   : > { %2333 = vmatmul.mubr.msk.bf16.vlgmr.msra.gmra.mxu0 %vm1015_vm5, %v1141_v13 }
 0x708   : > { %2348 = vmatprep.mubr.msk.bf16.mxu0 %vm2886_vm1, %v2885_v8  ;;  %2345 = vmatpush3.bf16.msra.mxu0 %v2562_v38 }
 0x709   : > { %2346 = vmatprep.subr.bf16.mxu0 %v2885_v8 }
 0x70c   : > { %2347 = vmatpush3.bf16.msra.mxu0 %v2563_v39 }
 0x70d   : > { %2360 = vmatprep.subr.bf16.mxu0 %v2885_v8 }
 0x7c7   : > { %v1184_v16 = vpop.f32.mrf.mxu0 }
 0x7c8   : > { %1191 = vrot.lane.b32.xlu1 %v1184_v16, %s2892_s1 }
 0x7c9   : > { %v2334_v17 = vpop.f32.mrf.mxu0 }
 0x7cb   : > { %v1187_v18 = vpop.f32.mrf.mxu0 }
 0x7cd   : > { %v2335_v19 = vpop.f32.mrf.mxu0 }
 0x83a   : > { %v1192_v20 = vpop.permute.xlu1 %1191 }
 0x83b   : > { %1195 = vst.msk [vmem:[#allocation3] sm:$0xff] %vm1194_vm6, %v1192_v20 }
 0x842   : > { %v1196_v21 = vld [vmem:[#allocation3] sm:$0xff] }
 0x843   : > { %v1197_v22 = vpack.c.bf16 %v1196_v21, %v1196_v21 }
 0x845   : > { %2341 = vmatmul.mubr.msk.bf16.vlgmr.msra.gmra.mxu1 %vm860_vm0, %v1197_v22 }
 0x846   : > { %2356 = vmatprep.mubr.msk.bf16.mxu1 %vm2886_vm1, %v2885_v8 }
 0x905   : > { %v1251_v23 = vpop.f32.mrf.mxu1 }
 0x906   : > { %v1257_v25 = vadd.f32 %v1251_v23, %v3164_v0  ;;  %v2560_v0 = vld [vmem:[%s3445_s12 + $0x8] sm:$0xff]  }
 0x907   : > { %v2342_v26 = vpop.f32.mrf.mxu1  ;;  %2353 = vmatpush3.bf16.msra.mxu1 %v2560_v0 }
 0x908   : > { %v3238_v27 = vadd.f32 %v2221_v24, %v1257_v25  ;;  %2354 = vmatprep.subr.bf16.mxu1 %v2885_v8 }
 0x909   : > { %v1254_v28 = vpop.f32.mrf.mxu1 }
 0x90a   : > { %v1268_v29 = vsel %vm860_vm0, %v3238_v27, 0.0 }
 0x90b   : > { %1269 = vadd.xlane.f32.xlu1 %v1268_v29  ;;  %v2343_v30 = vpop.f32.mrf.mxu1  ;;  %2355 = vmatpush3.bf16.msra.mxu1 %v2561_v36 }
 0x90c   : > { %2366 = vmatprep.subr.bf16.mxu1 %v2885_v8 }
 0x90e   : > { %2357 = vmatmul.mubr.msk.bf16.vlgmr.msra.gmra.mxu1 %vm860_vm0, %v2555_v37 }
 0x90f   : > { %2368 = vmatprep.mubr.msk.bf16.mxu1 %vm2886_vm1, %v2885_v8 }
 0x994   : > { %v1270_v31 = vpop.xlane.xlu1 %1269 }
 0x995   : > { %v1271_v32 = vmul.f32 0.03125, %v1270_v31 }
 0x997   : > { %v1272_v33 = vsub.f32 %v3238_v27, %v1271_v32 }
 0x999   : > { %v1273_v34 = vmul.f32 %v1272_v33, %v1272_v33 }
 0x99b   : > { %v1274_v35 = vsel %vm860_vm0, %v1273_v34, 0.0 }
 0x99c   : > { %1275 = vadd.xlane.f32.xlu0 %v1274_v35 }
 0x9ce   : > { %v1430_v51 = vpop.f32.mrf.mxu1 }
 0x9cf   : > { %v1431_v53 = vadd.f32 %v2228_v50, %v1430_v51 }
 0x9d0   : > { %v2358_v52 = vpop.f32.mrf.mxu1 }
 0x9d2   : > { %v1433_v54 = vpop.f32.mrf.mxu1 }
 0x9d3   : > { %v1434_v55 = vadd.f32 %v2228_v50, %v1433_v54 }
 0x9d4   : > { %v2359_v56 = vpop.f32.mrf.mxu1 }
 0x9d5   : > { %v1437_v57 = vpack.c.bf16 %v1434_v55, %v1431_v53  ;;  %v2240_v55 = vld [vmem:[%s3448_s15] ss:$0 sm:$0xff] }
 0x9d7   : > { %1552 = vrot.lane.b32.xlu0 %v1437_v57, %s2890_s23  ;;  %v1442_v58 = vsel %vm966_vm2, %v1437_v57, 0 }
 0xa25   : > { %v1276_v40 = vpop.xlane.xlu0 %1275 }
 0xa26   : > { %v1277_v41 = vmul.f32 0.03125, %v1276_v40 }
 0xa28   : > { %v1278_v42 = vadd.f32 1e-05, %v1277_v41 }
 0xa2a   : > { %2586 = vrsqrt.f32 %v1278_v42 }
 0xa37   : > { %v2587_v43 = vpop.eup %2586 }
 0xa38   : > { %v1280_v45 = vmul.f32 %v2587_v43, %v1272_v33 }
 0xa3a   : > { %v1287_v47 = vmul.f32 %v2222_v44, %v1280_v45  ;;  %v2564_v45 = vld [vmem:[%s3447_s14 + $0x8] sm:$0xff]  }
 0xa3c   : > { %v1294_v48 = vadd.f32 %v2223_v46, %v1287_v47  ;;  %v2565_v46 = vld [vmem:[%s3447_s14] sm:$0xff]  }
 0xa3e   : > { %v1295_v49 = vpack.c.bf16 %v1294_v48, %v1294_v48 }
 0xa40   : > { %2349 = vmatmul.mubr.msk.bf16.vlgmr.msra.gmra.mxu0 %vm860_vm0, %v1295_v49 }
 0xa41   : > { %2362 = vmatprep.mubr.msk.bf16.mxu0 %vm2886_vm1, %v2885_v8  ;;  %2361 = vmatpush3.bf16.xpose.msra.mxu0 %v1442_v58 }
 0xa42   : > { %2372 = vmatprep.subr.bf16.mxu0 %v2885_v8 }
 0xa49   : > { %v1553_v61 = vpop.permute.xlu0 %1552 }
 0xa4a   : > { %v1558_v2 = vsel %vm966_vm2, %v1553_v61, 0 }
 0xb00   : > { %v1356_v60 = vpop.f32.mrf.mxu0 }
 0xb01   : > { %v1357_v62 = vadd.f32 %v2224_v59, %v1356_v60 }
 0xb02   : > { %v2350_v63 = vpop.f32.mrf.mxu0 }
 0xb03   : > { %v1362_v1 = vpack.c.bf16 %v1357_v62, %v1357_v62 }
 0xb04   : > { %v1359_v3 = vpop.f32.mrf.mxu0 }
 0xb05   : > { %1550 = vrot.lane.b32.xlu0 %v1362_v1, %s2890_s23  ;;  %2363 = vmatmul.mubr.msk.bf16.vlgmr.msra.gmra.mxu0 %vm966_vm2, %v1362_v1  ;;  %s3505_s23 = sld [smem:[#allocation27_spill]] }
 0xb06   : > { %v2351_v4 = vpop.f32.mrf.mxu0  ;;  %2373 = vmatpush3.bf16.xpose.msra.mxu0 %v1558_v2  ;;  %2374 = vmatprep.mubr.msk.bf16.mxu0 %vm2886_vm1, %v2885_v8 }
 0xb07   : > { %2384 = vmatprep.subr.bf16.mxu0 %v2885_v8 }
 0xb0b   : > { %p3507_p5 = scmp.ne.s32.totalorder %s3505_s23, 0 }
 0xb77   : > { %v1551_v5 = vpop.permute.xlu0 %1550 }
 0xb78   : > { %2375 = vmatmul.mubr.msk.bf16.vlgmr.msra.gmra.mxu0 %vm966_vm2, %v1551_v5  ;;  %v2566_v5 = vld [vmem:[%s3451_s18 + $0x8] sm:$0xff]  }
 0xb79   : > { %2388 = vmatprep.mubr.msk.bf16.mxu0 %vm2886_vm1, %v2885_v8  ;;  %2385 = vmatpush3.bf16.msra.mxu0 %v2564_v45 }
 0xb7a   : > { %2386 = vmatprep.subr.bf16.mxu0 %v2885_v8 }
 0xb7d   : > { %2387 = vmatpush3.bf16.msra.mxu0 %v2565_v46 }
 0xb7e   : > { %2400 = vmatprep.subr.bf16.mxu0 %v2885_v8 }
 0xbc5   : > { %v1478_v6 = vpop.f32.mrf.mxu0 }
 0xbc6   : > { %v1484_v7 = vmul.f32 0.25, %v1478_v6  ;;  %v2567_v6 = vld [vmem:[%s3451_s18] sm:$0xff]  }
 0xbc7   : > { %v2364_v9 = vpop.f32.mrf.mxu0 }
 0xbc8   : > { %v1486_v10 = vsel %vm1485_vm7, %v1484_v7, -inf }
 0xbc9   : > { %1487 = vmax.xlane.f32.xlu1 %v1486_v10  ;;  %v1481_v11 = vpop.f32.mrf.mxu0 }
 0xbcb   : > { %v2365_v12 = vpop.f32.mrf.mxu0 }
 0xbcc   : > { %v2241_v12 = vld [vmem:[%s3449_s16] ss:$0 sm:$0xff] }
 0xbda   : > { %1499 = vrot.lane.b32.xlu1 %v1437_v57, %s2888_s27  ;;  %s2788_s27 = sshll.u32 %s2894_s7, 4  ;;  %s2789_s27 = int_to_ptr.vmem [resolvable:$false] %s2788_s27 }
 0xc38   : > { %v1594_v13 = vpop.f32.mrf.mxu0 }
 0xc39   : > { %v1600_v14 = vmul.f32 0.25, %v1594_v13 }
 0xc3a   : > { %v2376_v15 = vpop.f32.mrf.mxu0 }
 0xc3b   : > { %v1601_v16 = vsel %vm1485_vm7, %v1600_v14, -inf }
 0xc3c   : > { %1602 = vmax.xlane.f32.xlu0 %v1601_v16  ;;  %v1597_v17 = vpop.f32.mrf.mxu0 }
 0xc3e   : > { %v2377_v18 = vpop.f32.mrf.mxu0 }
 0xc52   : > { %v1488_v19 = vpop.xlane.xlu1 %1487 }
 0xc53   : > { %v1489_v20 = vsub.f32 %v1484_v7, %v1488_v19  ;;  %v2568_v19 = vld [vmem:[%s3453_s20 + $0x38] sm:$0xff]  }
 0xc55   : > { %v1490_v21 = vmul.f32 1.442695, %v1489_v20  ;;  %v2569_v20 = vld [vmem:[%s3453_s20 + $0x30] sm:$0xff]  }
 0xc56   : > { %v1500_v22 = vpop.permute.xlu1 %1499 }
 0xc57   : > { %2588 = vpow2.f32 %v1490_v21  ;;  %v1506_v23 = vsel %vm1504_vm8, %v1500_v22, 0  ;;  %v2570_v21 = vld [vmem:[%s3453_s20 + $0x28] sm:$0xff]   ;;  %v2571_v22 = vld [vmem:[%s3453_s20 + $0x20] sm:$0xff]  }
 0xc58   : > { %2367 = vmatpush3.bf16.msra.mxu1 %v1506_v23  ;;  %v2572_v23 = vld [vmem:[%s3453_s20 + $0x18] sm:$0xff]  }
 0xc59   : > { %2378 = vmatprep.subr.bf16.mxu1 %v2885_v8 }
 0xc64   : > { %v2589_v24 = vpop.eup %2588 }
 0xc65   : > { %v1492_v25 = vsel %vm1485_vm7, %v2589_v24, 0.0 }
 0xc66   : > { %1493 = vadd.xlane.f32.xlu1 %v1492_v25  ;;  %v2574_v25 = vld [vmem:[%s3453_s20 + $0x8] sm:$0xff]  }
 0xcc5   : > { %v1603_v26 = vpop.xlane.xlu0 %1602 }
 0xcc6   : > { %v1604_v28 = vsub.f32 %v1600_v14, %v1603_v26  ;;  %v2242_v14 = vld [vmem:[%s3450_s17] ss:$0 sm:$0xff] }
 0xcc7   : > { %v2575_v26 = vld [vmem:[%s3453_s20] sm:$0xff]  }
 0xcc8   : > { %v1605_v29 = vmul.f32 1.442695, %v1604_v28  ;;  %v2244_v28 = vld [vmem:[%s3452_s19] ss:$0 sm:$0xff] }
 0xcca   : > { %2590 = vpow2.f32 %v1605_v29 }
 0xcd7   : > { %v2591_v30 = vpop.eup %2590 }
 0xcd8   : > { %v1607_v31 = vsel %vm1485_vm7, %v2591_v30, 0.0 }
 0xcd9   : > { %1608 = vadd.xlane.f32.xlu1 %v1607_v31 }
 0xcea   : > { %1613 = vrot.lane.b32.xlu1 %v1437_v57, %s2889_s24  ;;  %v2243_v57 = vld [vmem:[%s3454_s21] ss:$0 sm:$0xff]  ;;  %s2790_s24 = scalar_lea.vmem %s2789_s27, 256 }
 0xcef   : > { %v1494_v32 = vpop.xlane.xlu1 %1493 }
 0xcf0   : > { %2592 = vrcp.f32 %v1494_v32 }
 0xcfd   : > { %v2593_v33 = vpop.eup %2592 }
 0xcfe   : > { %v1496_v34 = vmul.f32 %v2593_v33, %v2589_v24  ;;  %v2573_v24 = vld [vmem:[%s3453_s20 + $0x10] sm:$0xff]  }
 0xd00   : > { %v1497_v35 = vpack.c.bf16 %v1496_v34, %v1496_v34 }
 0xd02   : > { %2369 = vmatmul.mubr.msk.bf16.vlgmr.msra.gmra.mxu1 %vm1485_vm7, %v1497_v35 }
 0xd03   : > { %2380 = vmatprep.mubr.msk.bf16.mxu1 %vm2886_vm1, %v2885_v8 }
 0xd62   : > { %v1609_v0 = vpop.xlane.xlu1 %1608 }
 0xd63   : > { %2594 = vrcp.f32 %v1609_v0 }
 0xd66   : > { %v1614_v36 = vpop.permute.xlu1 %1613 }
 0xd67   : > { %v1619_v37 = vsel %vm1504_vm8, %v1614_v36, 0 }
 0xd68   : > { %2379 = vmatpush3.bf16.msra.mxu1 %v1619_v37 }
 0xd69   : > { %2392 = vmatprep.subr.bf16.mxu1 %v2885_v8 }
 0xd70   : > { %v2595_v38 = vpop.eup %2594 }
 0xd71   : > { %v1611_v39 = vmul.f32 %v2595_v38, %v2591_v30 }
 0xd73   : > { %v1612_v40 = vpack.c.bf16 %v1611_v39, %v1611_v39 }
 0xd75   : > { %2381 = vmatmul.mubr.msk.bf16.vlgmr.msra.gmra.mxu1 %vm1485_vm7, %v1612_v40 }
 0xd76   : > { %2396 = vmatprep.mubr.msk.bf16.mxu1 %vm2886_vm1, %v2885_v8  ;;  %2393 = vmatpush3.bf16.msra.mxu1 %v2566_v5 }
 0xd77   : > { %2394 = vmatprep.subr.bf16.mxu1 %v2885_v8 }
 0xd7a   : > { %2395 = vmatpush3.bf16.msra.mxu1 %v2567_v6 }
 0xdc2   : > { %v1542_v41 = vpop.f32.mrf.mxu1 }
 0xdc3   : > { %1548 = vst.msk [vmem:[#allocation3] sm:$0xff] %vm966_vm2, %v1542_v41 }
 0xdc4   : > { %v2370_v42 = vpop.f32.mrf.mxu1 }
 0xdc6   : > { %v1545_v43 = vpop.f32.mrf.mxu1 }
 0xdc8   : > { %v2371_v44 = vpop.f32.mrf.mxu1 }
 0xe35   : > { %v1655_v47 = vpop.f32.mrf.mxu1 }
 0xe36   : > { %1662 = vrot.lane.b32.xlu0 %v1655_v47, %s2892_s1  ;;  %s2204_s1 = sshll.u32 %s827_s29, 3 }
 0xe37   : > { %v2382_v48 = vpop.f32.mrf.mxu1  ;;  %s3323_s3 = scalar_lea.vmem [#allocation16], %s2204_s1 }
 0xe38   : > { %s1992_s2 = sshll.u32 %s3323_s3, 4  ;;  %s3385_s2 = int_to_ptr.vmem [resolvable:$true] %s1992_s2 }
 0xe39   : > { %v1658_v49 = vpop.f32.mrf.mxu1  ;;  %s2784_s4 = scalar_lea.vmem %s3385_s2, 128  ;;  %p2791_p7 = scmp.lt.s32.totalorder %s3385_s2, %s2789_s27 }
 0xe3a   : > { %p2785_p0 = scmp.ne.s32.totalorder %s3385_s2, %s2784_s4  ;;  %p2792_p9 = scmp.lt.s32.totalorder %s2790_s24, %s2784_s4 }
 0xe3b   : > { %v2383_v50 = vpop.f32.mrf.mxu1 }
 0xe3c   : > { %p2786_p6 = pnand %p2785_p0, %p3507_p5  ;;  %p2793_p12 = por %p2792_p9, %p2791_p7 }
 0xe3e   : > { %p2787_p8 = pneg %p2786_p6 }
 0xe40   : > { %p2794_p4 = pnand %p2793_p12, %p2787_p8 }
 0xea8   : > { %v1663_v51 = vpop.permute.xlu0 %1662 }
 0xea9   : > { %1665 = vst.msk [vmem:[#allocation3] sm:$0xff] %vm1194_vm6, %v1663_v51 }
 0xeb0   : > { %v1666_v52 = vld [vmem:[#allocation3] sm:$0xff] }
 0xeb1   : > { %v1667_v53 = vpack.c.bf16 %v1666_v52, %v1666_v52  ;;  %v2893_v52 = vmov -1.0  }
 0xeb3   : > { %2389 = vmatmul.mubr.msk.bf16.vlgmr.msra.gmra.mxu0 %vm860_vm0, %v1667_v53 }
 0xeb4   : > { %2416 = vmatprep.mubr.msk.bf16.mxu0 %vm2886_vm1, %v2885_v8  ;;  %2401 = vmatpush3.bf16.msra.mxu0 %v2568_v19 }
 0xeb5   : > { %2402 = vmatprep.subr.bf16.mxu0 %v2885_v8 }
 0xeb8   : > { %2403 = vmatpush3.bf16.msra.mxu0 %v2569_v20 }
 0xeb9   : > { %2404 = vmatprep.subr.bf16.mxu0 %v2885_v8 }
 0xebc   : > { %2405 = vmatpush3.bf16.msra.mxu0 %v2570_v21 }
 0xebd   : > { %2406 = vmatprep.subr.bf16.mxu0 %v2885_v8 }
 0xec0   : > { %2407 = vmatpush3.bf16.msra.mxu0 %v2571_v22 }
 0xec1   : > { %2408 = vmatprep.subr.bf16.mxu0 %v2885_v8 }
 0xec4   : > { %2409 = vmatpush3.bf16.msra.mxu0 %v2572_v23 }
 0xec5   : > { %2410 = vmatprep.subr.bf16.mxu0 %v2885_v8 }
 0xec8   : > { %2411 = vmatpush3.bf16.msra.mxu0 %v2573_v24 }
 0xec9   : > { %2412 = vmatprep.subr.bf16.mxu0 %v2885_v8 }
 0xecc   : > { %2413 = vmatpush3.bf16.msra.mxu0 %v2574_v25 }
 0xecd   : > { %2414 = vmatprep.subr.bf16.mxu0 %v2885_v8 }
 0xed0   : > { %2415 = vmatpush3.bf16.msra.mxu0 %v2575_v26 }
 0xf73   : > { %v1721_v54 = vpop.f32.mrf.mxu0 }
 0xf74   : > { %v1727_v56 = vadd.f32 %v1721_v54, %v3238_v27 }
 0xf75   : > { %v2390_v58 = vpop.f32.mrf.mxu0 }
 0xf76   : > { %v1735_v59 = vadd.f32 %v2240_v55, %v1727_v56 }
 0xf77   : > { %v1724_v60 = vpop.f32.mrf.mxu0 }
 0xf78   : > { %v1773_v61 = vadd.f32 %v2243_v57, %v1735_v59  ;;  %v1738_v62 = vsel %vm860_vm0, %v1735_v59, 0.0 }
 0xf79   : > { %1739 = vadd.xlane.f32.xlu1 %v1738_v62  ;;  %v2391_v63 = vpop.f32.mrf.mxu0 }
 0xf7a   : > { %1774 = vst.msk [vmem:[%s3323_s3] sm:$0xff] %vm860_vm0, %v1773_v61 }
0x1002   : > { %v1740_v27 = vpop.xlane.xlu1 %1739 }
0x1003   : > { %v1741_v1 = vmul.f32 0.03125, %v1740_v27 }
0x1005   : > { %v1742_v2 = vsub.f32 %v1735_v59, %v1741_v1  ;;  %v1870_v59 = vld [vmem:[%s3323_s3] sm:$0xff] }
0x1007   : > { %v1743_v3 = vmul.f32 %v1742_v2, %v1742_v2 }
0x1009   : > { %v1744_v4 = vsel %vm860_vm0, %v1743_v3, 0.0 }
0x100a   : > { %1745 = vadd.xlane.f32.xlu0 %v1744_v4 }
0x1093   : > { %v1746_v7 = vpop.xlane.xlu0 %1745 }
0x1094   : > { %v1747_v9 = vmul.f32 0.03125, %v1746_v7 }
0x1096   : > { %v1748_v10 = vadd.f32 1e-05, %v1747_v9 }
0x1098   : > { %2596 = vrsqrt.f32 %v1748_v10 }
0x10a5   : > { %v2597_v11 = vpop.eup %2596 }
0x10a6   : > { %v1750_v13 = vmul.f32 %v2597_v11, %v1742_v2 }
0x10a8   : > { %v1757_v15 = vmul.f32 %v2241_v12, %v1750_v13 }
0x10aa   : > { %v1764_v16 = vadd.f32 %v2242_v14, %v1757_v15 }
0x10ac   : > { %1765 = vst.msk [vmem:[#allocation2] sm:$0xff] %vm860_vm0, %v1764_v16 }
0x10b3   : > { %v1775_v17 = vld [vmem:[#allocation2] sm:$0xff] }
0x10b4   : > { %v1776_v18 = vpack.c.bf16 %v1775_v17, %v1775_v17 }
0x10b6   : > { %2397 = vmatmul.mubr.msk.bf16.vlgmr.msra.gmra.mxu1 %vm860_vm0, %v1776_v18 }
0x1176   : > { %v1838_v29 = vpop.f32.mrf.mxu1 }
0x1177   : > { %v1839_v30 = vadd.f32 %v2244_v28, %v1838_v29 }
0x1178   : > { %v2398_v31 = vpop.f32.mrf.mxu1 }
0x1179   : > { %v1845_v32 = vmul.f32 0.70710677, %v1839_v30  ;;  %v1844_v55 = vmul.f32 0.5, %v1839_v30 }
0x117a   : > { %v1841_v33 = vpop.f32.mrf.mxu1 }
0x117b   : > { %v1848_v34 = vand.u32 2147483647, %v1845_v32  ;;  %vm1846_vm9 = vcmp.ge.f32.partialorder %v1845_v32, 0.0 }
0x117c   : > { %v2399_v35 = vpop.f32.mrf.mxu1  ;;  %v1847_v53 = vsel %vm1846_vm9, 1.0, %v2893_v52 }
0x117d   : > { %v1849_v0 = vmul.f32 0.3275911, %v1848_v34  ;;  %v1861_v8 = vsub.f32 0.0, %v1848_v34 }
0x117f   : > { %v1850_v36 = vadd.f32 1.0, %v1849_v0  ;;  %v1862_v37 = vmul.f32 %v1861_v8, %v1848_v34 }
0x1181   : > { %2598 = vrcp.f32 %v1850_v36  ;;  %v1863_v40 = vmul.f32 1.442695, %v1862_v37 }
0x1183   : > { %2600 = vpow2.f32 %v1863_v40 }
0x118e   : > { %v2599_v38 = vpop.eup %2598 }
0x118f   : > { %v1852_v39 = vmul.f32 1.0614054, %v2599_v38 }
0x1190   : > { %v2601_v49 = vpop.eup %2600 }
0x1191   : > { %v1853_v41 = vadd.f32 -1.4531521, %v1852_v39 }
0x1193   : > { %v1854_v42 = vmul.f32 %v2599_v38, %v1853_v41 }
0x1195   : > { %v1855_v43 = vadd.f32 1.4214138, %v1854_v42 }
0x1197   : > { %v1856_v44 = vmul.f32 %v2599_v38, %v1855_v43 }
0x1199   : > { %v1857_v45 = vadd.f32 -0.28449672, %v1856_v44 }
0x119b   : > { %v1858_v46 = vmul.f32 %v2599_v38, %v1857_v45 }
0x119d   : > { %v1859_v47 = vadd.f32 0.2548296, %v1858_v46 }
0x119f   : > { %v1860_v48 = vmul.f32 %v2599_v38, %v1859_v47 }
0x11a1   : > { %v1865_v50 = vmul.f32 %v2601_v49, %v1860_v48 }
0x11a3   : > { %v1866_v51 = vsub.f32 1.0, %v1865_v50 }
0x11a5   : > { %v1867_v54 = vmul.f32 %v1866_v51, %v1847_v53 }
0x11a7   : > { %v1868_v56 = vadd.f32 1.0, %v1867_v54 }
0x11a9   : > { %v1869_v57 = vmul.f32 %v1868_v56, %v1844_v55 }
0x11ab   : > { %v1871_v58 = vpack.c.bf16 %v1869_v57, %v1869_v57 }
0x11ad   : > { %2417 = vmatmul.mubr.bf16.vlgmr.msra.gmra.mxu0 %v1871_v58 }
0x126d   : > { %v1970_v60 = vpop.f32.mrf.mxu0 }
0x126e   : > { %v1976_v61 = vadd.f32 %v1970_v60, %v1870_v59 }
0x126f   : > { %v2418_v62 = vpop.f32.mrf.mxu0 }
0x1270   : > { %1977 = vst.msk [vmem:[%s3323_s3] sm:$0xff] %vm860_vm0, %v1976_v61 }
0x1271   : > { %v1973_v63 = vpop.f32.mrf.mxu0 }
0x1272   : > { %2797 = shalt.err (!%p2794_p4)
}
0x1273   : > { %s2798_s3 = scalar_lea.hbm %s3383_s26, 128  ;;  %s2802_s25 = scalar_lea.hbm %s3506_s22, 256 }
0x1274   : > { %p2799_p10 = scmp.ne.s32.totalorder %s3383_s26, %s2798_s3  ;;  %p2803_p2 = scmp.lt.s32.totalorder %s3383_s26, %s3506_s22 }
0x1275   : > { %p2804_p3 = scmp.lt.s32.totalorder %s2802_s25, %s2798_s3 }
0x1276   : > { %p2800_p11 = pnand %p2799_p10, %p3507_p5 }
0x1277   : > { %p2805_p13 = por %p2804_p3, %p2803_p2 }
0x1278   : > { %p2801_p1 = pneg %p2800_p11 }
0x127a   : > { %p2806_p0 = pnand %p2805_p13, %p2801_p1 }
0x127c   : > { %2809 = shalt.err (!%p2806_p0)
}
0x127d   : > { %2448 = dma.vmem_to_hbm [thread:$0]  (%p3507_p5), %s3385_s2, 128, %s3383_s26, %s1979_s30   ;;  %v2419_v27 = vpop.f32.mrf.mxu0 }
0x127e PF: > { %s3508_s4 = sld [smem:[#allocation25_spill]] }
0x127f   : > { %s3509_s27 = sld [smem:[#allocation22_spill]] }
0x1280   : > { %s3510_s24 = sld [smem:[#allocation28_spill]] }
0x1284   : > { %p2490_p6 = scmp.ge.s32.totalorder %s3508_s4, 2 }
0x1285   : > { %s2004_s29 = sand.u32 1, %s3509_s27  }
0x1286   : > { %p3511_p8 = scmp.ne.s32.totalorder %s3510_s24, 0  ;;  %s2005_s0 = scalar_lea.sflag [#allocation6], %s2004_s29 }
0x1288   : > { %p2473_p7 = pnand %p2490_p6, %p3511_p8 }
0x128a   : > { %p2474_p9 = pneg %p2473_p7 }
0x128c   : > { %2851 = dma.done.wait (%p2474_p9), %s2005_s0, 128  }
0x128d   : > { %2853 = vsyncadd (%p2474_p9), %s2005_s0, 4294967168  ;;  %s39_s0 = sadd.s32 1, %s3508_s4   ;;  %s3512_s23 = sld [smem:[#allocation23_spill]] }
0x128e   : > { %p36_p12 = scmp.ge.s32.totalorder %s39_s0, 4   ;;  %s3513_s29 = sld [smem:[#allocation29_spill]] }
0x128f   : > { %s3514_s30 = sld [smem:[#allocation24_spill]]  ;;  %s3516_s3 = smov %s2860_s28 }
0x1290   : > { %s3515_s4 = sld [smem:[#allocation26_spill]]  ;;  %38 = sbr.rel (!%p36_p12) target bundleno = 18 (0x12), region = 188 }
0x1293   : > { %s3517_s28 = smov %s3512_s23 }
0x1295   :  { %2010 = vsyncpa [#allocation5], 1 }
0x1296   :  { %2012 = vsyncpa [#allocation5 + $0x1], 1 }
0x1297   :  { %2013 = vsyncpa [#allocation8], 1 }
0x1298   :  { %2014 = vsyncpa [#allocation11], 1 }
0x1299   :  { %2015 = vsyncpa [#allocation14], 1 }
0x129a   :  { %2016 = vsyncpa [#allocation6], 1 }
0x129b   :  { %2018 = vsyncpa [#allocation6 + $0x1], 1 }

</bundles_post_ra>
